<compile_context>
chip_gen: v7x
topology: tpu7x:2x2x1
jax: 0.10.0
libtpu: 0.0.40
codegen_flags: <defaults>
</compile_context>

<pallas_src>
import functools

import jax
import jax.numpy as jnp
from jax.experimental import pallas as pl
from jax.experimental.pallas import tpu as pltpu

_LANE_PAD = 64   # zero padding on each side of the flattened H*W lane axis (>= W+1)


# ----------------------------------------------------------------------------
# Pallas kernel: one batch *tile* per grid step, everything fused.
# ----------------------------------------------------------------------------
def _decoder_kernel(x_ref, wtaps_ref, scale_ref, bias_ref, upn_ref, upi_ref,
                    w1t_ref, b1_ref, w2t_ref, b2_ref, wsse_ref, bsse_ref,
                    xnext_ref, xup_ref, *, h, w, lpad):
  b_tile = x_ref.shape[0]
  cin_p = x_ref.shape[1]
  c2 = scale_ref.shape[0]          # padded Cn + padded Ci
  cpn = xnext_ref.shape[1]         # padded Cn
  cpi = xup_ref.shape[1]           # padded Ci
  l_hw = h * w

  xb = x_ref[...]                                                  # (B, Cin_p, L_ext) bf16

  # per-output-pixel column index, for masking the dw=+-1 taps
  col = jax.lax.broadcasted_iota(jnp.int32, (1, 1, l_hw), 2) % w
  ok_left = col > 0                # valid output positions for dw = -1
  ok_right = col < (w - 1)         # valid output positions for dw = +1

  # ---- fused 3x3 conv (both branches): 9 accumulated batched MXU matmuls ----
  acc = jnp.zeros((b_tile, c2, l_hw), jnp.float32)
  for kh in range(3):
    for kw in range(3):
      dh, dw = kh - 1, kw - 1
      start = lpad + dh * w + dw
      tap = xb[:, :, start:start + l_hw]                           # (B, Cin_p, H*W)
      if dw == 1:
        tap = jnp.where(ok_right, tap, 0.0)
      elif dw == -1:
        tap = jnp.where(ok_left, tap, 0.0)
      wt = jnp.broadcast_to(wtaps_ref[kh * 3 + kw][None],
                            (b_tile, c2, cin_p))                   # (B, C2, Cin_p) bf16
      acc = acc + jnp.einsum('bck,bks->bcs', wt, tap,
                             preferred_element_type=jnp.float32)

  # folded conv-bias + eval-mode BatchNorm + ReLU (f32 VPU)
  y = jnp.maximum(acc * scale_ref[...][None] + bias_ref[...][None], 0.0)

  # ---- bilinear upsample == one MXU matmul per branch, batch folded on sublanes ----
  yn = y[:, :cpn, :].reshape(b_tile * cpn, l_hw).astype(jnp.bfloat16)
  yi = y[:, cpn:, :].reshape(b_tile * cpi, l_hw).astype(jnp.bfloat16)
  zn = jnp.dot(yn, upn_ref[...], preferred_element_type=jnp.float32)
  zi = jnp.dot(yi, upi_ref[...], preferred_element_type=jnp.float32)
  zn = zn.reshape(b_tile, cpn, zn.shape[-1])                       # (B, Cn_p, Hn*Wn)
  zi = zi.reshape(b_tile, cpi, zi.shape[-1])                       # (B, Ci_p, lanes_i)

  # ---- scSE on the "next" branch: all VPU/XLU/EUP, no MXU on this tail ----
  pooled = jnp.mean(zn, axis=2, keepdims=True)                     # (B, Cn_p, 1)
  h1 = jnp.maximum(
      jnp.sum(pooled * w1t_ref[...][None], axis=1, keepdims=True)
      + b1_ref[...][None], 0.0)                                    # (B, 1, Cr)
  cse = jax.nn.sigmoid(
      jnp.sum(h1 * w2t_ref[...][None], axis=2, keepdims=True)
      + b2_ref[...][None])                                         # (B, Cn_p, 1)
  sse = jax.nn.sigmoid(
      jnp.sum(zn * wsse_ref[...][None], axis=1, keepdims=True)
      + bsse_ref[...][None])                                       # (B, 1, Hn*Wn)

  # x*cSE + x*sSE == x * (cSE + sSE): saves one full-size VPU multiply.
  xnext_ref[...] = (zn * (cse + sse)).astype(xnext_ref.dtype)
  xup_ref[...] = zi.astype(xup_ref.dtype)


# ----------------------------------------------------------------------------
# Parameter setup (BN folded, channel/lane padded, bf16 MXU operands).
# ----------------------------------------------------------------------------
def bilinear_matrix(out_size, in_size):
  """PyTorch bilinear, align_corners=False: row-stochastic (out, in) matrix."""
  scale = in_size / out_size
  o = jnp.arange(out_size, dtype=jnp.float32)
  src = jnp.maximum((o + 0.5) * scale - 0.5, 0.0)
  i0 = jnp.minimum(jnp.floor(src).astype(jnp.int32), in_size - 1)
  i1 = jnp.minimum(i0 + 1, in_size - 1)
  w1 = src - i0.astype(jnp.float32)
  w0 = 1.0 - w1
  m = jnp.zeros((out_size, in_size), jnp.float32)
  m = m.at[jnp.arange(out_size), i0].add(w0)
  m = m.at[jnp.arange(out_size), i1].add(w1)
  return m


def init_params(key, cin=4, cn=8, ci=6, h=16, w=16,
                up_size_next=(32, 32), up_size_input=(24, 24), reduction=2):
  eps = 1e-5
  ks = jax.random.split(key, 20)

  def rnd(i, shape, scale=0.1):
    return scale * jax.random.normal(ks[i], shape, dtype=jnp.float32)

  def fold_bn(gamma, beta, mean, var, conv_bias):
    s = gamma / jnp.sqrt(var + eps)
    b = beta + s * (conv_bias - mean)
    return s, b

  # conv weights in OHWI layout (Cout, 3, 3, Cin); eval-mode BN folded into scale/bias
  wn = rnd(0, (cn, 3, 3, cin))
  sn, bn = fold_bn(1.0 + rnd(1, (cn,)), rnd(2, (cn,)),
                   rnd(3, (cn,)), 1.0 + jnp.abs(rnd(4, (cn,))), rnd(5, (cn,)))
  wi = rnd(6, (ci, 3, 3, cin))
  si, bi = fold_bn(1.0 + rnd(7, (ci,)), rnd(8, (ci,)),
                   rnd(9, (ci,)), 1.0 + jnp.abs(rnd(10, (ci,))), rnd(11, (ci,)))

  # scSE params (standard concurrent scSE, reduction=2)
  cr = max(cn // reduction, 1)
  wfc1 = rnd(12, (cr, cn)); bfc1 = rnd(13, (cr,))
  wfc2 = rnd(14, (cn, cr)); bfc2 = rnd(15, (cn,))
  wsse = rnd(16, (cn,));    bsse = rnd(17, ())

  # separable bilinear factors (f32; used by reference and to build kernel matrices)
  hn, wn_sz = up_size_next
  hi, wi_sz = up_size_input
  whn = bilinear_matrix(hn, h);  wwn = bilinear_matrix(wn_sz, w)
  whi = bilinear_matrix(hi, h);  wwi = bilinear_matrix(wi_sz, w)

  # ---- kernel-form operands: fused / channel- & lane-padded / bf16 for the MXU ----
  cpn = -(-cn // 8) * 8
  cpi = -(-ci // 8) * 8
  cin_pad = -(-cin // 8) * 8
  upi_lanes = -(-(hi * wi_sz) // 128) * 128

  wcat = jnp.concatenate([
      jnp.pad(wn, ((0, cpn - cn), (0, 0), (0, 0), (0, 0))),
      jnp.pad(wi, ((0, cpi - ci), (0, 0), (0, 0), (0, 0)))], axis=0)
  wcat = jnp.pad(wcat, ((0, 0), (0, 0), (0, 0), (0, cin_pad - cin)))
  k_wtaps = jnp.transpose(wcat, (1, 2, 0, 3)).reshape(
      9, cpn + cpi, cin_pad).astype(jnp.bfloat16)                    # (9, C2, Cin_p)
  k_scale = jnp.concatenate([sn, jnp.zeros(cpn - cn), si,
                             jnp.zeros(cpi - ci)]).reshape(-1, 1)
  k_bias = jnp.concatenate([bn, jnp.zeros(cpn - cn), bi,
                            jnp.zeros(cpi - ci)]).reshape(-1, 1)
  k_upn = jnp.kron(whn, wwn).T.astype(jnp.bfloat16)                  # (h*w, Hn*Wn)
  upi_m = jnp.kron(whi, wwi).T                                       # (h*w, Hi*Wi)
  k_upi = jnp.pad(upi_m,
                  ((0, 0), (0, upi_lanes - upi_m.shape[1]))).astype(jnp.bfloat16)
  k_w1t = jnp.pad(wfc1.T, ((0, cpn - cn), (0, 0)))                   # (Cn_p, Cr)
  k_b1 = bfc1.reshape(1, cr)
  k_w2t = jnp.pad(wfc2, ((0, cpn - cn), (0, 0)))                     # (Cn_p, Cr)
  k_b2 = jnp.pad(bfc2.reshape(cn, 1), ((0, cpn - cn), (0, 0)))
  k_wsse = jnp.pad(wsse.reshape(cn, 1), ((0, cpn - cn), (0, 0)))
  k_bsse = bsse.reshape(1, 1)

  return dict(wn=wn, sn=sn, bn=bn, wi=wi, si=si, bi=bi,
              wfc1=wfc1, bfc1=bfc1, wfc2=wfc2, bfc2=bfc2, wsse=wsse, bsse=bsse,
              whn=whn, wwn=wwn, whi=whi, wwi=wwi,
              k_wtaps=k_wtaps, k_scale=k_scale, k_bias=k_bias,
              k_upn=k_upn, k_upi=k_upi,
              k_w1t=k_w1t, k_b1=k_b1, k_w2t=k_w2t, k_b2=k_b2,
              k_wsse=k_wsse, k_bsse=k_bsse,
              cpn=cpn, cpi=cpi, cin_pad=cin_pad, upi_lanes=upi_lanes,
              up_size_next=up_size_next, up_size_input=up_size_input)


# ----------------------------------------------------------------------------
# pallas_call wrapper.
# ----------------------------------------------------------------------------
def decoder_block_forward(x_nchw, p, batch_tile=None):
  N, cin, H, W = x_nchw.shape
  Hn, Wn = p['up_size_next']
  Hi, Wi = p['up_size_input']
  cn = p['wn'].shape[0]
  ci = p['wi'].shape[0]
  cpn, cpi = p['cpn'], p['cpi']
  cin_p = p['cin_pad']
  upi_lanes = p['upi_lanes']
  lpad = _LANE_PAD
  assert lpad >= W + 1

  if batch_tile is None:
    # 2 grid steps keeps both v7x TensorCores busy; batch folds into each step.
    batch_tile = N // 2 if (N >= 2 and N % 2 == 0) else 1
  assert N % batch_tile == 0, (N, batch_tile)
  steps = N // batch_tile

  # single cheap wrapper transform: cast + zero-pad channels (->8) and the flattened
  # spatial lane axis (zero halo); all 9 im2col taps are built in-kernel from this.
  x_k = jnp.pad(x_nchw.reshape(N, cin, H * W).astype(jnp.bfloat16),
                ((0, 0), (0, cin_p - cin), (lpad, lpad)))

  weights = [p['k_wtaps'], p['k_scale'], p['k_bias'], p['k_upn'], p['k_upi'],
             p['k_w1t'], p['k_b1'], p['k_w2t'], p['k_b2'], p['k_wsse'], p['k_bsse']]

  def full_spec(a):
    return pl.BlockSpec(a.shape, lambda n, _nd=a.ndim: (0,) * _nd)

  in_specs = ([pl.BlockSpec((batch_tile, cin_p, H * W + 2 * lpad),
                            lambda n: (n, 0, 0))]
              + [full_spec(a) for a in weights])
  out_specs = [pl.BlockSpec((batch_tile, cpn, Hn * Wn), lambda n: (n, 0, 0)),
               pl.BlockSpec((batch_tile, cpi, upi_lanes), lambda n: (n, 0, 0))]
  out_shape = (jax.ShapeDtypeStruct((N, cpn, Hn * Wn), jnp.float32),
               jax.ShapeDtypeStruct((N, cpi, upi_lanes), jnp.float32))

  kernel = functools.partial(_decoder_kernel, h=H, w=W, lpad=lpad)

  x_next, x_up = pl.pallas_call(
      kernel,
      out_shape=out_shape,
      grid_spec=pltpu.PrefetchScalarGridSpec(
          num_scalar_prefetch=0,
          grid=(steps,),
          in_specs=in_specs,
          out_specs=out_specs),
      compiler_params=pltpu.CompilerParams(
          dimension_semantics=("parallel",)),
  )(x_k, *weights)

  # outputs are NCHW-flat and lane/sublane padded -> slice padding + reshape only.
  x_next = x_next[:, :cn, :].reshape(N, cn, Hn, Wn)
  x_up = x_up[:, :ci, :Hi * Wi].reshape(N, ci, Hi, Wi)
  return x_next, x_up


# ----------------------------------------------------------------------------
# Pure-JAX f32 reference (independent code path, same math) for validation.
# ----------------------------------------------------------------------------
def reference_forward(x_nchw, p):
  x = jnp.transpose(x_nchw, (0, 2, 3, 1)).astype(jnp.float32)   # NHWC

  def cbr(w_ohwi, s, b):
    w_hwio = jnp.transpose(w_ohwi, (1, 2, 3, 0))
    y = jax.lax.conv_general_dilated(
        x, w_hwio, window_strides=(1, 1), padding='SAME',
        dimension_numbers=('NHWC', 'HWIO', 'NHWC'))
    return jnp.maximum(y * s.reshape(1, 1, 1, -1) + b.reshape(1, 1, 1, -1), 0.0)

  def up(y, wh, ww):
    t = jnp.einsum('oh,nhwc->nowc', wh, y)
    return jnp.einsum('pw,nowc->nopc', ww, t)

  yn = cbr(p['wn'], p['sn'], p['bn'])
  zn = up(yn, p['whn'], p['wwn'])                               # (N, Hn, Wn, Cn)
  pooled = jnp.mean(zn, axis=(1, 2))                            # (N, Cn)
  h1 = jnp.maximum(jnp.einsum('rc,nc->nr', p['wfc1'], pooled) + p['bfc1'], 0.0)
  cse = jax.nn.sigmoid(jnp.einsum('cr,nr->nc', p['wfc2'], h1) + p['bfc2'])
  sse = jax.nn.sigmoid(jnp.einsum('nhwc,c->nhw', zn, p['wsse']) + p['bsse'])
  x_next = zn * cse[:, None, None, :] + zn * sse[..., None]
  yi = cbr(p['wi'], p['si'], p['bi'])
  x_up = up(yi, p['whi'], p['wwi'])
  return (jnp.transpose(x_next, (0, 3, 1, 2)),
          jnp.transpose(x_up, (0, 3, 1, 2)))


if __name__ == "__main__":
  key = jax.random.PRNGKey(0)
  kx, kp = jax.random.split(key)

  # in_channels=4, out_channels_next=8, up_size_next=(32,32),
  # out_channels_input=6, up_size_input=(24,24); batch=4 -> 2 grid steps x B_tile=2.
  x = jax.random.normal(kx, (4, 4, 16, 16), dtype=jnp.float32)   # NCHW input
  params = init_params(kp, cin=4, cn=8, ci=6, h=16, w=16,
                       up_size_next=(32, 32), up_size_input=(24, 24))

  x_next, x_up = decoder_block_forward(x, params)
  jax.block_until_ready((x_next, x_up))

  assert x_next.shape == (4, 8, 32, 32), x_next.shape
  assert x_up.shape == (4, 6, 24, 24), x_up.shape

  # kernel uses bf16 MXU operands (f32 accumulation) -> loose tolerance vs all-f32 ref.
  ref_next, ref_up = reference_forward(x, params)
  assert jnp.allclose(x_next, ref_next, atol=5e-2, rtol=5e-2)
  assert jnp.allclose(x_up, ref_up, atol=5e-2, rtol=5e-2)

  print("KERNEL_OK")
</pallas_src>

<mosaic_0001>
module attributes {stable_mosaic.version = 11 : i64} {
  func.func @_decoder_kernel(%arg0: i32, %arg1: memref<2x8x384xbf16, #tpu.memory_space<vmem>>, %arg2: memref<9x16x8xbf16, #tpu.memory_space<vmem>>, %arg3: memref<16x1xf32, #tpu.memory_space<vmem>>, %arg4: memref<16x1xf32, #tpu.memory_space<vmem>>, %arg5: memref<256x1024xbf16, #tpu.memory_space<vmem>>, %arg6: memref<256x640xbf16, #tpu.memory_space<vmem>>, %arg7: memref<8x4xf32, #tpu.memory_space<vmem>>, %arg8: memref<1x4xf32, #tpu.memory_space<vmem>>, %arg9: memref<8x4xf32, #tpu.memory_space<vmem>>, %arg10: memref<8x1xf32, #tpu.memory_space<vmem>>, %arg11: memref<8x1xf32, #tpu.memory_space<vmem>>, %arg12: memref<1x1xf32, #tpu.memory_space<vmem>>, %arg13: memref<2x8x1024xf32, #tpu.memory_space<vmem>>, %arg14: memref<2x8x640xf32, #tpu.memory_space<vmem>>) attributes {dimension_semantics = [#tpu.dimension_semantics<parallel>], iteration_bounds = array<i64: 2>, scalar_prefetch = 0 : i64, scratch_operands = 0 : i64, tpu.core_type = #tpu.core_type<tc>, window_params = [{transform_indices = @transform_0, window_bounds = array<i64: 2, 8, 384>}, {pipeline_mode = #tpu.pipeline_mode<synchronous>, transform_indices = @transform_1, window_bounds = array<i64: 9, 16, 8>}, {pipeline_mode = #tpu.pipeline_mode<synchronous>, transform_indices = @transform_2, window_bounds = array<i64: 16, 1>}, {pipeline_mode = #tpu.pipeline_mode<synchronous>, transform_indices = @transform_3, window_bounds = array<i64: 16, 1>}, {pipeline_mode = #tpu.pipeline_mode<synchronous>, transform_indices = @transform_4, window_bounds = array<i64: 256, 1024>}, {pipeline_mode = #tpu.pipeline_mode<synchronous>, transform_indices = @transform_5, window_bounds = array<i64: 256, 640>}, {pipeline_mode = #tpu.pipeline_mode<synchronous>, transform_indices = @transform_6, window_bounds = array<i64: 8, 4>}, {pipeline_mode = #tpu.pipeline_mode<synchronous>, transform_indices = @transform_7, window_bounds = array<i64: 1, 4>}, {pipeline_mode = #tpu.pipeline_mode<synchronous>, transform_indices = @transform_8, window_bounds = array<i64: 8, 4>}, {pipeline_mode = #tpu.pipeline_mode<synchronous>, transform_indices = @transform_9, window_bounds = array<i64: 8, 1>}, {pipeline_mode = #tpu.pipeline_mode<synchronous>, transform_indices = @transform_10, window_bounds = array<i64: 8, 1>}, {pipeline_mode = #tpu.pipeline_mode<synchronous>, transform_indices = @transform_11, window_bounds = array<i64: 1, 1>}, {transform_indices = @transform_12, window_bounds = array<i64: 2, 8, 1024>}, {transform_indices = @transform_13, window_bounds = array<i64: 2, 8, 640>}]} {
    %c0 = arith.constant 0 : index
    %c0_0 = arith.constant 0 : index
    %c0_1 = arith.constant 0 : index
    %0 = vector.load %arg1[%c0, %c0_0, %c0_1] : memref<2x8x384xbf16, #tpu.memory_space<vmem>>, vector<2x8x384xbf16>
    %1 = tpu.iota {dimensions = array<i32: 2>} : vector<1x1x256xi32>
    %c16_i32 = arith.constant 16 : i32
    %c0_i32 = arith.constant 0 : i32
    %2 = arith.cmpi eq, %c16_i32, %c0_i32 : i32
    %c1_i32 = arith.constant 1 : i32
    %3 = arith.select %2, %c1_i32, %c16_i32 : i32
    %4 = vector.broadcast %3 : i32 to vector<1x1x256xi32>
    %5 = arith.remsi %1, %4 : vector<1x1x256xi32>
    %c0_i32_2 = arith.constant 0 : i32
    %6 = vector.broadcast %c0_i32_2 : i32 to vector<1x1x256xi32>
    %7 = arith.cmpi ne, %5, %6 : vector<1x1x256xi32>
    %c0_i32_3 = arith.constant 0 : i32
    %8 = vector.broadcast %c0_i32_3 : i32 to vector<1x1x256xi32>
    %9 = arith.cmpi slt, %5, %8 : vector<1x1x256xi32>
    %c0_i32_4 = arith.constant 0 : i32
    %10 = arith.cmpi slt, %3, %c0_i32_4 : i32
    %11 = vector.broadcast %10 : i1 to vector<1x1x256xi1>
    %12 = vector.broadcast %11 : vector<1x1x256xi1> to vector<1x1x256xi1>
    %13 = arith.xori %9, %12 : vector<1x1x256xi1>
    %14 = arith.andi %13, %7 : vector<1x1x256xi1>
    %15 = vector.broadcast %3 : i32 to vector<1x1x256xi32>
    %16 = arith.addi %5, %15 : vector<1x1x256xi32>
    %17 = arith.select %14, %16, %5 : vector<1x1x256xi1>, vector<1x1x256xi32>
    %c0_i32_5 = arith.constant 0 : i32
    %18 = vector.broadcast %c0_i32_5 : i32 to vector<1x1x256xi32>
    %19 = arith.cmpi sgt, %17, %18 : vector<1x1x256xi32>
    %c15_i32 = arith.constant 15 : i32
    %20 = vector.broadcast %c15_i32 : i32 to vector<1x1x256xi32>
    %21 = arith.cmpi slt, %17, %20 : vector<1x1x256xi32>
    %cst = arith.constant 0.000000e+00 : f32
    %22 = vector.broadcast %cst : f32 to vector<2x16x256xf32>
    %23 = vector.extract_strided_slice %0 {offsets = [0, 0, 47], sizes = [2, 8, 256], strides = [1, 1, 1]} : vector<2x8x384xbf16> to vector<2x8x256xbf16>
    %cst_6 = arith.constant 0.000000e+00 : f32
    %24 = arith.truncf %cst_6 : f32 to bf16
    %25 = vector.shape_cast %19 : vector<1x1x256xi1> to vector<1x1x256xi1>
    %26 = vector.broadcast %25 : vector<1x1x256xi1> to vector<2x8x256xi1>
    %27 = vector.broadcast %24 : bf16 to vector<2x8x256xbf16>
    %28 = arith.select %26, %23, %27 : vector<2x8x256xi1>, vector<2x8x256xbf16>
    %c0_7 = arith.constant 0 : index
    %c0_8 = arith.constant 0 : index
    %c0_9 = arith.constant 0 : index
    %29 = vector.load %arg2[%c0_7, %c0_8, %c0_9] : memref<9x16x8xbf16, #tpu.memory_space<vmem>>, vector<1x16x8xbf16>
    %30 = vector.shape_cast %29 : vector<1x16x8xbf16> to vector<16x8xbf16>
    %31 = vector.shape_cast %30 : vector<16x8xbf16> to vector<1x16x8xbf16>
    %32 = vector.shape_cast %31 : vector<1x16x8xbf16> to vector<1x16x8xbf16>
    %33 = vector.broadcast %32 : vector<1x16x8xbf16> to vector<2x16x8xbf16>
    "tpu.trace_start"() <{level = 10 : i32, message = "bck,bks->bcs"}> : () -> ()
    %cst_10 = arith.constant dense<0.000000e+00> : vector<2x16x256xf32>
    %34 = tpu.matmul %33, %28, %cst_10 {dimension_numbers = #tpu.dot_dimension_numbers<[2], [1], [1], [2], [0, 0, 0, 1, 1, 2], [0], [0]>} : vector<2x16x8xbf16>, vector<2x8x256xbf16>, vector<2x16x256xf32> -> vector<2x16x256xf32>
    "tpu.trace_stop"() : () -> ()
    %35 = arith.addf %22, %34 : vector<2x16x256xf32>
    %36 = vector.extract_strided_slice %0 {offsets = [0, 0, 48], sizes = [2, 8, 256], strides = [1, 1, 1]} : vector<2x8x384xbf16> to vector<2x8x256xbf16>
    %c1 = arith.constant 1 : index
    %c0_11 = arith.constant 0 : index
    %c0_12 = arith.constant 0 : index
    %37 = vector.load %arg2[%c1, %c0_11, %c0_12] : memref<9x16x8xbf16, #tpu.memory_space<vmem>>, vector<1x16x8xbf16>
    %38 = vector.shape_cast %37 : vector<1x16x8xbf16> to vector<16x8xbf16>
    %39 = vector.shape_cast %38 : vector<16x8xbf16> to vector<1x16x8xbf16>
    %40 = vector.shape_cast %39 : vector<1x16x8xbf16> to vector<1x16x8xbf16>
    %41 = vector.broadcast %40 : vector<1x16x8xbf16> to vector<2x16x8xbf16>
    "tpu.trace_start"() <{level = 10 : i32, message = "bck,bks->bcs"}> : () -> ()
    %cst_13 = arith.constant dense<0.000000e+00> : vector<2x16x256xf32>
    %42 = tpu.matmul %41, %36, %cst_13 {dimension_numbers = #tpu.dot_dimension_numbers<[2], [1], [1], [2], [0, 0, 0, 1, 1, 2], [0], [0]>} : vector<2x16x8xbf16>, vector<2x8x256xbf16>, vector<2x16x256xf32> -> vector<2x16x256xf32>
    "tpu.trace_stop"() : () -> ()
    %43 = arith.addf %35, %42 : vector<2x16x256xf32>
    %44 = vector.extract_strided_slice %0 {offsets = [0, 0, 49], sizes = [2, 8, 256], strides = [1, 1, 1]} : vector<2x8x384xbf16> to vector<2x8x256xbf16>
    %cst_14 = arith.constant 0.000000e+00 : f32
    %45 = arith.truncf %cst_14 : f32 to bf16
    %46 = vector.shape_cast %21 : vector<1x1x256xi1> to vector<1x1x256xi1>
    %47 = vector.broadcast %46 : vector<1x1x256xi1> to vector<2x8x256xi1>
    %48 = vector.broadcast %45 : bf16 to vector<2x8x256xbf16>
    %49 = arith.select %47, %44, %48 : vector<2x8x256xi1>, vector<2x8x256xbf16>
    %c2 = arith.constant 2 : index
    %c0_15 = arith.constant 0 : index
    %c0_16 = arith.constant 0 : index
    %50 = vector.load %arg2[%c2, %c0_15, %c0_16] : memref<9x16x8xbf16, #tpu.memory_space<vmem>>, vector<1x16x8xbf16>
    %51 = vector.shape_cast %50 : vector<1x16x8xbf16> to vector<16x8xbf16>
    %52 = vector.shape_cast %51 : vector<16x8xbf16> to vector<1x16x8xbf16>
    %53 = vector.shape_cast %52 : vector<1x16x8xbf16> to vector<1x16x8xbf16>
    %54 = vector.broadcast %53 : vector<1x16x8xbf16> to vector<2x16x8xbf16>
    "tpu.trace_start"() <{level = 10 : i32, message = "bck,bks->bcs"}> : () -> ()
    %cst_17 = arith.constant dense<0.000000e+00> : vector<2x16x256xf32>
    %55 = tpu.matmul %54, %49, %cst_17 {dimension_numbers = #tpu.dot_dimension_numbers<[2], [1], [1], [2], [0, 0, 0, 1, 1, 2], [0], [0]>} : vector<2x16x8xbf16>, vector<2x8x256xbf16>, vector<2x16x256xf32> -> vector<2x16x256xf32>
    "tpu.trace_stop"() : () -> ()
    %56 = arith.addf %43, %55 : vector<2x16x256xf32>
    %57 = vector.extract_strided_slice %0 {offsets = [0, 0, 63], sizes = [2, 8, 256], strides = [1, 1, 1]} : vector<2x8x384xbf16> to vector<2x8x256xbf16>
    %cst_18 = arith.constant 0.000000e+00 : f32
    %58 = arith.truncf %cst_18 : f32 to bf16
    %59 = vector.shape_cast %19 : vector<1x1x256xi1> to vector<1x1x256xi1>
    %60 = vector.broadcast %59 : vector<1x1x256xi1> to vector<2x8x256xi1>
    %61 = vector.broadcast %58 : bf16 to vector<2x8x256xbf16>
    %62 = arith.select %60, %57, %61 : vector<2x8x256xi1>, vector<2x8x256xbf16>
    %c3 = arith.constant 3 : index
    %c0_19 = arith.constant 0 : index
    %c0_20 = arith.constant 0 : index
    %63 = vector.load %arg2[%c3, %c0_19, %c0_20] : memref<9x16x8xbf16, #tpu.memory_space<vmem>>, vector<1x16x8xbf16>
    %64 = vector.shape_cast %63 : vector<1x16x8xbf16> to vector<16x8xbf16>
    %65 = vector.shape_cast %64 : vector<16x8xbf16> to vector<1x16x8xbf16>
    %66 = vector.shape_cast %65 : vector<1x16x8xbf16> to vector<1x16x8xbf16>
    %67 = vector.broadcast %66 : vector<1x16x8xbf16> to vector<2x16x8xbf16>
    "tpu.trace_start"() <{level = 10 : i32, message = "bck,bks->bcs"}> : () -> ()
    %cst_21 = arith.constant dense<0.000000e+00> : vector<2x16x256xf32>
    %68 = tpu.matmul %67, %62, %cst_21 {dimension_numbers = #tpu.dot_dimension_numbers<[2], [1], [1], [2], [0, 0, 0, 1, 1, 2], [0], [0]>} : vector<2x16x8xbf16>, vector<2x8x256xbf16>, vector<2x16x256xf32> -> vector<2x16x256xf32>
    "tpu.trace_stop"() : () -> ()
    %69 = arith.addf %56, %68 : vector<2x16x256xf32>
    %70 = vector.extract_strided_slice %0 {offsets = [0, 0, 64], sizes = [2, 8, 256], strides = [1, 1, 1]} : vector<2x8x384xbf16> to vector<2x8x256xbf16>
    %c4 = arith.constant 4 : index
    %c0_22 = arith.constant 0 : index
    %c0_23 = arith.constant 0 : index
    %71 = vector.load %arg2[%c4, %c0_22, %c0_23] : memref<9x16x8xbf16, #tpu.memory_space<vmem>>, vector<1x16x8xbf16>
    %72 = vector.shape_cast %71 : vector<1x16x8xbf16> to vector<16x8xbf16>
    %73 = vector.shape_cast %72 : vector<16x8xbf16> to vector<1x16x8xbf16>
    %74 = vector.shape_cast %73 : vector<1x16x8xbf16> to vector<1x16x8xbf16>
    %75 = vector.broadcast %74 : vector<1x16x8xbf16> to vector<2x16x8xbf16>
    "tpu.trace_start"() <{level = 10 : i32, message = "bck,bks->bcs"}> : () -> ()
    %cst_24 = arith.constant dense<0.000000e+00> : vector<2x16x256xf32>
    %76 = tpu.matmul %75, %70, %cst_24 {dimension_numbers = #tpu.dot_dimension_numbers<[2], [1], [1], [2], [0, 0, 0, 1, 1, 2], [0], [0]>} : vector<2x16x8xbf16>, vector<2x8x256xbf16>, vector<2x16x256xf32> -> vector<2x16x256xf32>
    "tpu.trace_stop"() : () -> ()
    %77 = arith.addf %69, %76 : vector<2x16x256xf32>
    %78 = vector.extract_strided_slice %0 {offsets = [0, 0, 65], sizes = [2, 8, 256], strides = [1, 1, 1]} : vector<2x8x384xbf16> to vector<2x8x256xbf16>
    %cst_25 = arith.constant 0.000000e+00 : f32
    %79 = arith.truncf %cst_25 : f32 to bf16
    %80 = vector.shape_cast %21 : vector<1x1x256xi1> to vector<1x1x256xi1>
    %81 = vector.broadcast %80 : vector<1x1x256xi1> to vector<2x8x256xi1>
    %82 = vector.broadcast %79 : bf16 to vector<2x8x256xbf16>
    %83 = arith.select %81, %78, %82 : vector<2x8x256xi1>, vector<2x8x256xbf16>
    %c5 = arith.constant 5 : index
    %c0_26 = arith.constant 0 : index
    %c0_27 = arith.constant 0 : index
    %84 = vector.load %arg2[%c5, %c0_26, %c0_27] : memref<9x16x8xbf16, #tpu.memory_space<vmem>>, vector<1x16x8xbf16>
    %85 = vector.shape_cast %84 : vector<1x16x8xbf16> to vector<16x8xbf16>
    %86 = vector.shape_cast %85 : vector<16x8xbf16> to vector<1x16x8xbf16>
    %87 = vector.shape_cast %86 : vector<1x16x8xbf16> to vector<1x16x8xbf16>
    %88 = vector.broadcast %87 : vector<1x16x8xbf16> to vector<2x16x8xbf16>
    "tpu.trace_start"() <{level = 10 : i32, message = "bck,bks->bcs"}> : () -> ()
    %cst_28 = arith.constant dense<0.000000e+00> : vector<2x16x256xf32>
    %89 = tpu.matmul %88, %83, %cst_28 {dimension_numbers = #tpu.dot_dimension_numbers<[2], [1], [1], [2], [0, 0, 0, 1, 1, 2], [0], [0]>} : vector<2x16x8xbf16>, vector<2x8x256xbf16>, vector<2x16x256xf32> -> vector<2x16x256xf32>
    "tpu.trace_stop"() : () -> ()
    %90 = arith.addf %77, %89 : vector<2x16x256xf32>
    %91 = vector.extract_strided_slice %0 {offsets = [0, 0, 79], sizes = [2, 8, 256], strides = [1, 1, 1]} : vector<2x8x384xbf16> to vector<2x8x256xbf16>
    %cst_29 = arith.constant 0.000000e+00 : f32
    %92 = arith.truncf %cst_29 : f32 to bf16
    %93 = vector.shape_cast %19 : vector<1x1x256xi1> to vector<1x1x256xi1>
    %94 = vector.broadcast %93 : vector<1x1x256xi1> to vector<2x8x256xi1>
    %95 = vector.broadcast %92 : bf16 to vector<2x8x256xbf16>
    %96 = arith.select %94, %91, %95 : vector<2x8x256xi1>, vector<2x8x256xbf16>
    %c6 = arith.constant 6 : index
    %c0_30 = arith.constant 0 : index
    %c0_31 = arith.constant 0 : index
    %97 = vector.load %arg2[%c6, %c0_30, %c0_31] : memref<9x16x8xbf16, #tpu.memory_space<vmem>>, vector<1x16x8xbf16>
    %98 = vector.shape_cast %97 : vector<1x16x8xbf16> to vector<16x8xbf16>
    %99 = vector.shape_cast %98 : vector<16x8xbf16> to vector<1x16x8xbf16>
    %100 = vector.shape_cast %99 : vector<1x16x8xbf16> to vector<1x16x8xbf16>
    %101 = vector.broadcast %100 : vector<1x16x8xbf16> to vector<2x16x8xbf16>
    "tpu.trace_start"() <{level = 10 : i32, message = "bck,bks->bcs"}> : () -> ()
    %cst_32 = arith.constant dense<0.000000e+00> : vector<2x16x256xf32>
    %102 = tpu.matmul %101, %96, %cst_32 {dimension_numbers = #tpu.dot_dimension_numbers<[2], [1], [1], [2], [0, 0, 0, 1, 1, 2], [0], [0]>} : vector<2x16x8xbf16>, vector<2x8x256xbf16>, vector<2x16x256xf32> -> vector<2x16x256xf32>
    "tpu.trace_stop"() : () -> ()
    %103 = arith.addf %90, %102 : vector<2x16x256xf32>
    %104 = vector.extract_strided_slice %0 {offsets = [0, 0, 80], sizes = [2, 8, 256], strides = [1, 1, 1]} : vector<2x8x384xbf16> to vector<2x8x256xbf16>
    %c7 = arith.constant 7 : index
    %c0_33 = arith.constant 0 : index
    %c0_34 = arith.constant 0 : index
    %105 = vector.load %arg2[%c7, %c0_33, %c0_34] : memref<9x16x8xbf16, #tpu.memory_space<vmem>>, vector<1x16x8xbf16>
    %106 = vector.shape_cast %105 : vector<1x16x8xbf16> to vector<16x8xbf16>
    %107 = vector.shape_cast %106 : vector<16x8xbf16> to vector<1x16x8xbf16>
    %108 = vector.shape_cast %107 : vector<1x16x8xbf16> to vector<1x16x8xbf16>
    %109 = vector.broadcast %108 : vector<1x16x8xbf16> to vector<2x16x8xbf16>
    "tpu.trace_start"() <{level = 10 : i32, message = "bck,bks->bcs"}> : () -> ()
    %cst_35 = arith.constant dense<0.000000e+00> : vector<2x16x256xf32>
    %110 = tpu.matmul %109, %104, %cst_35 {dimension_numbers = #tpu.dot_dimension_numbers<[2], [1], [1], [2], [0, 0, 0, 1, 1, 2], [0], [0]>} : vector<2x16x8xbf16>, vector<2x8x256xbf16>, vector<2x16x256xf32> -> vector<2x16x256xf32>
    "tpu.trace_stop"() : () -> ()
    %111 = arith.addf %103, %110 : vector<2x16x256xf32>
    %112 = vector.extract_strided_slice %0 {offsets = [0, 0, 81], sizes = [2, 8, 256], strides = [1, 1, 1]} : vector<2x8x384xbf16> to vector<2x8x256xbf16>
    %cst_36 = arith.constant 0.000000e+00 : f32
    %113 = arith.truncf %cst_36 : f32 to bf16
    %114 = vector.shape_cast %21 : vector<1x1x256xi1> to vector<1x1x256xi1>
    %115 = vector.broadcast %114 : vector<1x1x256xi1> to vector<2x8x256xi1>
    %116 = vector.broadcast %113 : bf16 to vector<2x8x256xbf16>
    %117 = arith.select %115, %112, %116 : vector<2x8x256xi1>, vector<2x8x256xbf16>
    %c8 = arith.constant 8 : index
    %c0_37 = arith.constant 0 : index
    %c0_38 = arith.constant 0 : index
    %118 = vector.load %arg2[%c8, %c0_37, %c0_38] : memref<9x16x8xbf16, #tpu.memory_space<vmem>>, vector<1x16x8xbf16>
    %119 = vector.shape_cast %118 : vector<1x16x8xbf16> to vector<16x8xbf16>
    %120 = vector.shape_cast %119 : vector<16x8xbf16> to vector<1x16x8xbf16>
    %121 = vector.shape_cast %120 : vector<1x16x8xbf16> to vector<1x16x8xbf16>
    %122 = vector.broadcast %121 : vector<1x16x8xbf16> to vector<2x16x8xbf16>
    "tpu.trace_start"() <{level = 10 : i32, message = "bck,bks->bcs"}> : () -> ()
    %cst_39 = arith.constant dense<0.000000e+00> : vector<2x16x256xf32>
    %123 = tpu.matmul %122, %117, %cst_39 {dimension_numbers = #tpu.dot_dimension_numbers<[2], [1], [1], [2], [0, 0, 0, 1, 1, 2], [0], [0]>} : vector<2x16x8xbf16>, vector<2x8x256xbf16>, vector<2x16x256xf32> -> vector<2x16x256xf32>
    "tpu.trace_stop"() : () -> ()
    %124 = arith.addf %111, %123 : vector<2x16x256xf32>
    %c0_40 = arith.constant 0 : index
    %c0_41 = arith.constant 0 : index
    %125 = vector.load %arg3[%c0_40, %c0_41] : memref<16x1xf32, #tpu.memory_space<vmem>>, vector<16x1xf32>
    %126 = vector.shape_cast %125 : vector<16x1xf32> to vector<1x16x1xf32>
    %127 = vector.broadcast %126 : vector<1x16x1xf32> to vector<2x16x256xf32>
    %128 = arith.mulf %124, %127 : vector<2x16x256xf32>
    %c0_42 = arith.constant 0 : index
    %c0_43 = arith.constant 0 : index
    %129 = vector.load %arg4[%c0_42, %c0_43] : memref<16x1xf32, #tpu.memory_space<vmem>>, vector<16x1xf32>
    %130 = vector.shape_cast %129 : vector<16x1xf32> to vector<1x16x1xf32>
    %131 = vector.broadcast %130 : vector<1x16x1xf32> to vector<2x16x256xf32>
    %132 = arith.addf %128, %131 : vector<2x16x256xf32>
    %cst_44 = arith.constant 0.000000e+00 : f32
    %133 = vector.broadcast %cst_44 : f32 to vector<2x16x256xf32>
    %134 = arith.maximumf %132, %133 : vector<2x16x256xf32>
    %135 = vector.extract_strided_slice %134 {offsets = [0, 0, 0], sizes = [2, 8, 256], strides = [1, 1, 1]} : vector<2x16x256xf32> to vector<2x8x256xf32>
    %136 = vector.shape_cast %135 : vector<2x8x256xf32> to vector<16x256xf32>
    %137 = arith.truncf %136 : vector<16x256xf32> to vector<16x256xbf16>
    %138 = vector.extract_strided_slice %134 {offsets = [0, 8, 0], sizes = [2, 8, 256], strides = [1, 1, 1]} : vector<2x16x256xf32> to vector<2x8x256xf32>
    %139 = vector.shape_cast %138 : vector<2x8x256xf32> to vector<16x256xf32>
    %140 = arith.truncf %139 : vector<16x256xf32> to vector<16x256xbf16>
    %c0_45 = arith.constant 0 : index
    %c0_46 = arith.constant 0 : index
    %141 = vector.load %arg5[%c0_45, %c0_46] : memref<256x1024xbf16, #tpu.memory_space<vmem>>, vector<256x1024xbf16>
    %cst_47 = arith.constant dense<0.000000e+00> : vector<16x1024xf32>
    %142 = tpu.matmul %137, %141, %cst_47 {dimension_numbers = #tpu.dot_dimension_numbers<[1], [0], [0], [1], [0, 0, 1, 1], [], []>} : vector<16x256xbf16>, vector<256x1024xbf16>, vector<16x1024xf32> -> vector<16x1024xf32>
    %c0_48 = arith.constant 0 : index
    %c0_49 = arith.constant 0 : index
    %143 = vector.load %arg6[%c0_48, %c0_49] : memref<256x640xbf16, #tpu.memory_space<vmem>>, vector<256x640xbf16>
    %cst_50 = arith.constant dense<0.000000e+00> : vector<16x640xf32>
    %144 = tpu.matmul %140, %143, %cst_50 {dimension_numbers = #tpu.dot_dimension_numbers<[1], [0], [0], [1], [0, 0, 1, 1], [], []>} : vector<16x256xbf16>, vector<256x640xbf16>, vector<16x640xf32> -> vector<16x640xf32>
    %145 = vector.shape_cast %142 : vector<16x1024xf32> to vector<2x8x1024xf32>
    %146 = vector.shape_cast %144 : vector<16x640xf32> to vector<2x8x640xf32>
    %cst_51 = arith.constant dense<0.000000e+00> : vector<2x8xf32>
    %147 = vector.multi_reduction <add>, %145, %cst_51 [2] : vector<2x8x1024xf32> to vector<2x8xf32>
    %148 = vector.shape_cast %147 : vector<2x8xf32> to vector<2x8x1xf32>
    %cst_52 = arith.constant 1.024000e+03 : f32
    %149 = vector.broadcast %cst_52 : f32 to vector<2x8x1xf32>
    %150 = arith.divf %148, %149 : vector<2x8x1xf32>
    %c0_53 = arith.constant 0 : index
    %c0_54 = arith.constant 0 : index
    %151 = vector.load %arg7[%c0_53, %c0_54] : memref<8x4xf32, #tpu.memory_space<vmem>>, vector<8x4xf32>
    %152 = vector.shape_cast %151 : vector<8x4xf32> to vector<1x8x4xf32>
    %153 = vector.broadcast %150 : vector<2x8x1xf32> to vector<2x8x4xf32>
    %154 = vector.broadcast %152 : vector<1x8x4xf32> to vector<2x8x4xf32>
    %155 = arith.mulf %153, %154 : vector<2x8x4xf32>
    %cst_55 = arith.constant dense<0.000000e+00> : vector<2x4xf32>
    %156 = vector.multi_reduction <add>, %155, %cst_55 [1] : vector<2x8x4xf32> to vector<2x4xf32>
    %157 = vector.shape_cast %156 : vector<2x4xf32> to vector<2x1x4xf32>
    %c0_56 = arith.constant 0 : index
    %c0_57 = arith.constant 0 : index
    %158 = vector.load %arg8[%c0_56, %c0_57] : memref<1x4xf32, #tpu.memory_space<vmem>>, vector<1x4xf32>
    %159 = vector.shape_cast %158 : vector<1x4xf32> to vector<1x1x4xf32>
    %160 = vector.broadcast %159 : vector<1x1x4xf32> to vector<2x1x4xf32>
    %161 = arith.addf %157, %160 : vector<2x1x4xf32>
    %cst_58 = arith.constant 0.000000e+00 : f32
    %162 = vector.broadcast %cst_58 : f32 to vector<2x1x4xf32>
    %163 = arith.maximumf %161, %162 : vector<2x1x4xf32>
    %c0_59 = arith.constant 0 : index
    %c0_60 = arith.constant 0 : index
    %164 = vector.load %arg9[%c0_59, %c0_60] : memref<8x4xf32, #tpu.memory_space<vmem>>, vector<8x4xf32>
    %165 = vector.shape_cast %164 : vector<8x4xf32> to vector<1x8x4xf32>
    %166 = vector.broadcast %163 : vector<2x1x4xf32> to vector<2x8x4xf32>
    %167 = vector.broadcast %165 : vector<1x8x4xf32> to vector<2x8x4xf32>
    %168 = arith.mulf %166, %167 : vector<2x8x4xf32>
    %cst_61 = arith.constant dense<0.000000e+00> : vector<2x8xf32>
    %169 = vector.multi_reduction <add>, %168, %cst_61 [2] : vector<2x8x4xf32> to vector<2x8xf32>
    %170 = vector.shape_cast %169 : vector<2x8xf32> to vector<2x8x1xf32>
    %c0_62 = arith.constant 0 : index
    %c0_63 = arith.constant 0 : index
    %171 = vector.load %arg10[%c0_62, %c0_63] : memref<8x1xf32, #tpu.memory_space<vmem>>, vector<8x1xf32>
    %172 = vector.shape_cast %171 : vector<8x1xf32> to vector<1x8x1xf32>
    %173 = vector.broadcast %172 : vector<1x8x1xf32> to vector<2x8x1xf32>
    %174 = arith.addf %170, %173 : vector<2x8x1xf32>
    %175 = arith.negf %174 : vector<2x8x1xf32>
    %176 = math.exp %175 : vector<2x8x1xf32>
    %cst_64 = arith.constant 1.000000e+00 : f32
    %177 = vector.broadcast %cst_64 : f32 to vector<2x8x1xf32>
    %178 = arith.addf %177, %176 : vector<2x8x1xf32>
    %179 = arith.divf %177, %178 : vector<2x8x1xf32>
    %c0_65 = arith.constant 0 : index
    %c0_66 = arith.constant 0 : index
    %180 = vector.load %arg11[%c0_65, %c0_66] : memref<8x1xf32, #tpu.memory_space<vmem>>, vector<8x1xf32>
    %181 = vector.shape_cast %180 : vector<8x1xf32> to vector<1x8x1xf32>
    %182 = vector.broadcast %181 : vector<1x8x1xf32> to vector<2x8x1024xf32>
    %183 = arith.mulf %145, %182 : vector<2x8x1024xf32>
    %cst_67 = arith.constant dense<0.000000e+00> : vector<2x1024xf32>
    %184 = vector.multi_reduction <add>, %183, %cst_67 [1] : vector<2x8x1024xf32> to vector<2x1024xf32>
    %185 = vector.shape_cast %184 : vector<2x1024xf32> to vector<2x1x1024xf32>
    %c0_68 = arith.constant 0 : index
    %c0_69 = arith.constant 0 : index
    %186 = vector.load %arg12[%c0_68, %c0_69] : memref<1x1xf32, #tpu.memory_space<vmem>>, vector<1x1xf32>
    %187 = vector.shape_cast %186 : vector<1x1xf32> to vector<1x1x1xf32>
    %188 = vector.broadcast %187 : vector<1x1x1xf32> to vector<2x1x1024xf32>
    %189 = arith.addf %185, %188 : vector<2x1x1024xf32>
    %190 = arith.negf %189 : vector<2x1x1024xf32>
    %191 = math.exp %190 : vector<2x1x1024xf32>
    %cst_70 = arith.constant 1.000000e+00 : f32
    %192 = vector.broadcast %cst_70 : f32 to vector<2x1x1024xf32>
    %193 = arith.addf %192, %191 : vector<2x1x1024xf32>
    %194 = arith.divf %192, %193 : vector<2x1x1024xf32>
    %195 = vector.broadcast %179 : vector<2x8x1xf32> to vector<2x8x1024xf32>
    %196 = vector.broadcast %194 : vector<2x1x1024xf32> to vector<2x8x1024xf32>
    %197 = arith.addf %195, %196 : vector<2x8x1024xf32>
    %198 = arith.mulf %145, %197 : vector<2x8x1024xf32>
    %c0_71 = arith.constant 0 : index
    %c0_72 = arith.constant 0 : index
    %c0_73 = arith.constant 0 : index
    %199 = vector.load %arg13[%c0_71, %c0_72, %c0_73] : memref<2x8x1024xf32, #tpu.memory_space<vmem>>, vector<2x8x1024xf32>
    tpu.vector_store %arg13[%c0_71, %c0_72, %c0_73], %198 {strides = array<i32>} : memref<2x8x1024xf32, #tpu.memory_space<vmem>>, vector<2x8x1024xf32>,
    %c0_74 = arith.constant 0 : index
    %c0_75 = arith.constant 0 : index
    %c0_76 = arith.constant 0 : index
    %200 = vector.load %arg14[%c0_74, %c0_75, %c0_76] : memref<2x8x640xf32, #tpu.memory_space<vmem>>, vector<2x8x640xf32>
    tpu.vector_store %arg14[%c0_74, %c0_75, %c0_76], %146 {strides = array<i32>} : memref<2x8x640xf32, #tpu.memory_space<vmem>>, vector<2x8x640xf32>,
    return
  }
  func.func @transform_0(%arg0: i32) -> (i32, i32, i32) {
    %c0_i32 = arith.constant 0 : i32
    %c0_i32_0 = arith.constant 0 : i32
    %c0_i32_1 = arith.constant 0 : i32
    return %arg0, %c0_i32, %c0_i32_0 : i32, i32, i32
  }
  func.func @transform_1(%arg0: i32) -> (i32, i32, i32) {
    %c0_i32 = arith.constant 0 : i32
    %c0_i32_0 = arith.constant 0 : i32
    %c0_i32_1 = arith.constant 0 : i32
    %c0_i32_2 = arith.constant 0 : i32
    return %c0_i32, %c0_i32_0, %c0_i32_1 : i32, i32, i32
  }
  func.func @transform_2(%arg0: i32) -> (i32, i32) {
    %c0_i32 = arith.constant 0 : i32
    %c0_i32_0 = arith.constant 0 : i32
    %c0_i32_1 = arith.constant 0 : i32
    return %c0_i32, %c0_i32_0 : i32, i32
  }
  func.func @transform_3(%arg0: i32) -> (i32, i32) {
    %c0_i32 = arith.constant 0 : i32
    %c0_i32_0 = arith.constant 0 : i32
    %c0_i32_1 = arith.constant 0 : i32
    return %c0_i32, %c0_i32_0 : i32, i32
  }
  func.func @transform_4(%arg0: i32) -> (i32, i32) {
    %c0_i32 = arith.constant 0 : i32
    %c0_i32_0 = arith.constant 0 : i32
    %c0_i32_1 = arith.constant 0 : i32
    return %c0_i32, %c0_i32_0 : i32, i32
  }
  func.func @transform_5(%arg0: i32) -> (i32, i32) {
    %c0_i32 = arith.constant 0 : i32
    %c0_i32_0 = arith.constant 0 : i32
    %c0_i32_1 = arith.constant 0 : i32
    return %c0_i32, %c0_i32_0 : i32, i32
  }
  func.func @transform_6(%arg0: i32) -> (i32, i32) {
    %c0_i32 = arith.constant 0 : i32
    %c0_i32_0 = arith.constant 0 : i32
    %c0_i32_1 = arith.constant 0 : i32
    return %c0_i32, %c0_i32_0 : i32, i32
  }
  func.func @transform_7(%arg0: i32) -> (i32, i32) {
    %c0_i32 = arith.constant 0 : i32
    %c0_i32_0 = arith.constant 0 : i32
    %c0_i32_1 = arith.constant 0 : i32
    return %c0_i32, %c0_i32_0 : i32, i32
  }
  func.func @transform_8(%arg0: i32) -> (i32, i32) {
    %c0_i32 = arith.constant 0 : i32
    %c0_i32_0 = arith.constant 0 : i32
    %c0_i32_1 = arith.constant 0 : i32
    return %c0_i32, %c0_i32_0 : i32, i32
  }
  func.func @transform_9(%arg0: i32) -> (i32, i32) {
    %c0_i32 = arith.constant 0 : i32
    %c0_i32_0 = arith.constant 0 : i32
    %c0_i32_1 = arith.constant 0 : i32
    return %c0_i32, %c0_i32_0 : i32, i32
  }
  func.func @transform_10(%arg0: i32) -> (i32, i32) {
    %c0_i32 = arith.constant 0 : i32
    %c0_i32_0 = arith.constant 0 : i32
    %c0_i32_1 = arith.constant 0 : i32
    return %c0_i32, %c0_i32_0 : i32, i32
  }
  func.func @transform_11(%arg0: i32) -> (i32, i32) {
    %c0_i32 = arith.constant 0 : i32
    %c0_i32_0 = arith.constant 0 : i32
    %c0_i32_1 = arith.constant 0 : i32
    return %c0_i32, %c0_i32_0 : i32, i32
  }
  func.func @transform_12(%arg0: i32) -> (i32, i32, i32) {
    %c0_i32 = arith.constant 0 : i32
    %c0_i32_0 = arith.constant 0 : i32
    %c0_i32_1 = arith.constant 0 : i32
    return %arg0, %c0_i32, %c0_i32_0 : i32, i32, i32
  }
  func.func @transform_13(%arg0: i32) -> (i32, i32, i32) {
    %c0_i32 = arith.constant 0 : i32
    %c0_i32_0 = arith.constant 0 : i32
    %c0_i32_1 = arith.constant 0 : i32
    return %arg0, %c0_i32, %c0_i32_0 : i32, i32, i32
  }
}

</mosaic_0001>

<bundles_post_ra>
// kernel: tpu_custom_call.1
= control target key start
LH: loop header
LB: loop body
LE: loop exit
PB: predicated region body
PF: predicated region fallthrough
CT: control target
= control target key end

     0   :  { %s5766_s0 = inlined_call_operand.vmem [shape: bf16[4,8,384], index: 0, kind: input, shape index: {}]   ;;  %s5767_s1 = inlined_call_operand.vmem [shape: bf16[9,16,8], index: 1, kind: input, shape index: {}]   ;;  %s5768_s2 = inlined_call_operand.vmem [shape: f32[16,1], index: 2, kind: input, shape index: {}]   ;;  %s5769_s3 = inlined_call_operand.vmem [shape: f32[16,1], index: 3, kind: input, shape index: {}]   ;;  %s5770_s4 = inlined_call_operand.hbm [shape: bf16[256,1024], index: 4, kind: input, shape index: {}]   ;;  %s5771_s5 = inlined_call_operand.hbm [shape: bf16[256,640], index: 5, kind: input, shape index: {}]   ;;  %s5772_s6 = inlined_call_operand.vmem [shape: f32[8,4], index: 6, kind: input, shape index: {}]   ;;  %s5773_s7 = inlined_call_operand.vmem [shape: f32[1,4], index: 7, kind: input, shape index: {}]   ;;  %s5774_s8 = inlined_call_operand.vmem [shape: f32[8,4], index: 8, kind: input, shape index: {}]   ;;  %s5775_s9 = inlined_call_operand.vmem [shape: f32[8,1], index: 9, kind: input, shape index: {}]   ;;  %s5776_s10 = inlined_call_operand.vmem [shape: f32[8,1], index: 10, kind: input, shape index: {}]   ;;  %s5777_s11 = inlined_call_operand.<no memory space> [shape: f32[1,1], index: 11, kind: input, shape index: {}]   ;;  %s5778_s12 = inlined_call_operand.hbm [shape: f32[4,8,1024], index: 12, kind: output, shape index: {0}]   ;;  %s5779_s13 = inlined_call_operand.hbm [shape: f32[4,8,640], index: 13, kind: output, shape index: {1}]  }
   0x1   :  { %v19_v0 = vstv %s5777_s11 }
   0x2   :  { %20 = vst [vmem:[#allocation2] sm:$0x1] %v19_v0 }
   0x3   :  { %21 = vsyncpa [#allocation4], 0 }
   0x4   :  { %22 = vsyncpa [#allocation7], 0 }
   0x5   :  { %23 = vsyncpa [#allocation5], 0 }
   0x6   :  { %25 = vsyncpa [#allocation5 + $0x1], 0 }
   0x7   :  { %26 = vsyncpa [#allocation10], 0 }
   0x8   :  { %28 = vsyncpa [#allocation10 + $0x1], 0  ;;  %s5047_s27 = smov 0   ;;  %s5049_s28 = smov 0  }
   0x9   :  { %s5051_s29 = smov 0   ;;  %s5053_s30 = smov 0  }
   0xa LB: > { %5789 = sst [smem:[#allocation15_spill]] %s4939_s27  ;;  %s5068_s11 = sadd.s32 4294967295, %s4951_s30   ;;  %s4951_s30 = sphi %s5053_s30, %s5815_s30   ;;  %s4947_s29 = sphi %s5051_s29, %s5817_s29   ;;  %s4943_s28 = sphi %s5049_s28, %s5819_s28   ;;  %s4939_s27 = sphi %s5047_s27, %s5818_s27  }
   0xb   : > { %5790 = sst [smem:[#allocation16_spill]] %s4947_s29  ;;  %s4070_s14 = sadd.s32 4294967294, %s4951_s30  }
   0xc   : > { %5791 = sst [smem:[#allocation17_spill]] %s4951_s30  ;;  %s5072_s15 = sadd.s32 1, %s4951_s30  }
   0xd   : > { %5792 = sst [smem:[#allocation18_spill]] %s5072_s15  ;;  %s298_s16 = sadd.s32 1, %s4947_s29 }
   0xe   : > { %s295_s17 = ssub.s32 %s4951_s30, %s5072_s15  ;;  %p308_p0 = scmp.ne.s32.totalorder %s4947_s29, %s4943_s28 }
   0xf   : > { %p296_p1 = scmp.eq.s32.totalorder %s295_s17, 0  ;;  %p309_p2 = scmp.eq.s32.totalorder %s5068_s11, 1 }
  0x10   : > { %p314_p3 = scmp.ne.s32.totalorder %s4943_s28, %s4939_s27  ;;  %p315_p4 = scmp.eq.s32.totalorder %s4070_s14, 1 }
  0x11   : > { %s5083_s18 = scalar_select %p296_p1, %s4947_s29, %s298_s16  }
  0x12   : > { %p5085_p5 = por %p309_p2, %p308_p0  ;;  %p5089_p6 = por %p315_p4, %p314_p3 }
  0x13   : > { %5793 = sst [smem:[#allocation19_spill]] %s5083_s18  ;;  %p4071_p7 = scmp.ge.s32.totalorder %s4951_s30, 1 }
  0x14   : > { %s5794_s19 = scalar_select %p5085_p5, 1, 0 }
  0x15   : > { %s5795_s20 = scalar_select %p5089_p6, 1, 0 }
  0x16   : > { %p348_p8 = scmp.lt.s32.totalorder %s4951_s30, 3  ;;  %p5783_p9 = scmp.eq.s32.totalorder %s5068_s11, 0 }
  0x17   : > { %5796 = sst [smem:[#allocation20_spill]] %s5795_s20  ;;  %s4953_s22 = smov [#allocation3]  }
  0x18   : > { %p5096_p10 = pnand %p4071_p7, %p348_p8  ;;  %s369_s23 = sshll.u32 %s4953_s22, 4  ;;  %s370_s23 = int_to_ptr.vmem [resolvable:$true] %s369_s23 }
  0x19   : > { %s4954_s25 = smov [#allocation6]   ;;  %s4793_s17 = scalar_lea.hbm %s5770_s4, 16384 }
  0x1a   : > { %s5797_s21 = scalar_select %p5096_p10, 1, 0 }
  0x1b   : > { %p4522_p11 = pneg %p5096_p10  ;;  %s382_s26 = sshll.u32 %s4954_s25, 4  ;;  %s5108_s26 = int_to_ptr.vmem [resolvable:$true] %s382_s26 }
  0x1c   : > { %p4794_p13 = scmp.ne.s32.totalorder %s5770_s4, %s4793_s17  ;;  %p4800_p3 = scmp.lt.u32.totalorder %s4793_s17, %s5770_s4 }
  0x1d   : > { %p5104_p12 = pnand %p5783_p9, %p4522_p11 }
  0x1f   : > { %p4795_p0 = pneg %p5104_p12 }
  0x21   : > { %p4796_p1 = pnand %p4795_p0, %p4794_p13 }
  0x23   : > { %p4797_p2 = pneg %p4796_p1 }
  0x25   : > { %p4802_p4 = pnand %p4800_p3, %p4797_p2 }
  0x27   : > { %4805 = shalt.err (!%p4802_p4)
}
  0x28   : > { %s4806_s25 = scalar_lea.vmem %s370_s23, 16384  ;;  %p4814_p9 = scmp.lt.s32.totalorder %s370_s23, %s370_s23 }
  0x29   : > { %p4807_p7 = scmp.ne.s32.totalorder %s370_s23, %s4806_s25  ;;  %p4815_p6 = scmp.lt.s32.totalorder %s4806_s25, %s4806_s25 }
  0x2b   : > { %p4809_p8 = pnand %p4807_p7, %p4795_p0  ;;  %p4816_p5 = por %p4815_p6, %p4814_p9 }
  0x2d   : > { %p4810_p11 = pneg %p4809_p8 }
  0x2f   : > { %p4817_p10 = pnand %p4816_p5, %p4810_p11 }
  0x31   : > { %4820 = shalt.err (!%p4817_p10)
}
  0x32   : > { %s4955_s18 = smov 512   ;;  %s4956_s14 = smov 32  }
  0x33   : > { %4525 = dma.hbm_to_vmem [thread:$0]  (!%p5104_p12), %s5770_s4, 16384, %s370_s23, [#allocation4], %s4955_s18, %s4955_s18, %s4956_s14  }
  0x34   : > { %s4821_s22 = scalar_lea.hbm %s5771_s5, 10240 }
  0x35   : > { %p4822_p13 = scmp.ne.s32.totalorder %s5771_s5, %s4821_s22  ;;  %p4828_p9 = scmp.lt.u32.totalorder %s4821_s22, %s5771_s5 }
  0x37   : > { %p4824_p5 = pnand %p4822_p13, %p4795_p0 }
  0x39   : > { %p4825_p6 = pneg %p4824_p5 }
  0x3b   : > { %p4830_p10 = pnand %p4828_p9, %p4825_p6 }
  0x3d   : > { %4833 = shalt.err (!%p4830_p10)
}
  0x3e   : > { %s4834_s23 = scalar_lea.vmem %s5108_s26, 10240  ;;  %p4842_p4 = scmp.lt.s32.totalorder %s5108_s26, %s5108_s26 }
  0x3f   : > { %p4835_p1 = scmp.ne.s32.totalorder %s5108_s26, %s4834_s23  ;;  %p4843_p7 = scmp.lt.s32.totalorder %s4834_s23, %s4834_s23 }
  0x41   : > { %p4837_p2 = pnand %p4835_p1, %p4795_p0  ;;  %p4844_p8 = por %p4843_p7, %p4842_p4 }
  0x43   : > { %p4838_p3 = pneg %p4837_p2 }
  0x45   : > { %p4845_p11 = pnand %p4844_p8, %p4838_p3 }
  0x47   : > { %4848 = shalt.err (!%p4845_p11)
}
  0x48   : > { %s4957_s27 = smov 320   ;;  %s4958_s30 = smov 20  }
  0x49   : > { %4528 = dma.hbm_to_vmem [thread:$0]  (!%p5104_p12), %s5771_s5, 10240, %s5108_s26, [#allocation7], %s4957_s27, %s4957_s27, %s4958_s30  }
  0x4a   : > { %p5799_p13 = scmp.ne.s32.totalorder %s5797_s21, 0 }
  0x4b   : > { %p5800_p0 = scmp.eq.s32.totalorder (!%p5799_p13), %s5068_s11, 0 }
  0x4c   : > { %426 = sbr.rel (%p5799_p13) target bundleno = 1479 (0x5c7), region = 68 }
  0x53   : > { %4922 = dma.done.wait (%p5800_p0), [#allocation4], 16384   ;;  %p5801_p5 = pmov %p5800_p0 }
  0x54   : > { %v496_v1 = vlaneseq  ;;  %p5802_p6 = pmov %p5800_p0 }
  0x55   : > { %4924 = vsyncadd (%p5801_p5), [#allocation4], 4294950912 }
  0x56   : > { %4926 = dma.done.wait (%p5802_p6), [#allocation7], 10240   ;;  %p5803_p9 = pmov %p5800_p0 }
  0x57   : > { %s4079_s24 = sshll.u32 %s5068_s11, 1  ;;  %v4959_v2 = vmov 0   ;;  %v497_v3 = vand.u32 127, %v496_v1  ;;  %s4960_s15 = smov 47   ;;  %vm536_vm6 = vcmask 384000   ;;  %vm838_vm10 = vcmask 400384  }
  0x58   : > { %4928 = vsyncadd (%p5803_p9), [#allocation7], 4294957056  ;;  %614 = vmatprep.mubr.bf16.mxu1 %v4959_v2  ;;  %912 = vmatprep.mubr.bf16.mxu0 %v4959_v2  ;;  %p481_p12 = scmp.lt.s32.totalorder %s4079_s24, 3  ;;  %s4961_s16 = smov 63   ;;  %vm568_vm11 = vcmask 654336   ;;  %vm575_vm12 = vcmask 1043456  }
  0x59   : > { %4593 = vset.pattern.permute.xlu1 %v4959_v2  ;;  %4592 = vset.pattern.permute.xlu0 %v4959_v2  ;;  %v498_v4 = vadd.s32 128, %v497_v3  ;;  %v503_v5 = vand.u32 15, %v497_v3  ;;  %s4962_s17 = smov 49   ;;  %s4963_s22 = smov 80   ;;  %v4600_v47 = vld [vmem:[%s5767_s1 + $0x8] sm:$0xff]   ;;  %vm571_vm13 = vcmask 64512  }
  0x5a   : > { %s5821_s24 = smov (!%p481_p12, %s4079_s24), 3  ;;  %s4964_s25 = smov 65   ;;  %vm999_vm15 = vcmask 515072  }
  0x5b   : > { %v510_v6 = vand.u32 15, %v498_v4  ;;  %vm523_vm0 = vcmp.gt.s32.totalorder %v503_v5, 0  ;;  %vm525_vm1 = vcmp.lt.s32.totalorder %v503_v5, 15  ;;  %s4508_s21 = smul.u32 12, %s5821_s24  ;;  %s4965_s23 = smov 79  }
  0x5c   : > { %s4966_s27 = smov 81   ;;  %s4967_s18 = smov 64  }
  0x5d   : > { %vm524_vm2 = vcmp.gt.s32.totalorder %v510_v6, 0  ;;  %vm526_vm3 = vcmp.lt.s32.totalorder %v510_v6, 15  ;;  %s485_s29 = scalar_lea.vmem %s5766_s0, %s4508_s21  ;;  %s4968_s24 = smov 48  }
  0x5e   : > { %vm531_vm4 = vmpackc.low %vm524_vm2, %vm523_vm0  ;;  %v5176_v7 = vld [vmem:[%s485_s29] sm:$0xff]  ;;  %v5179_v9 = vld [vmem:[%s485_s29 + $0x8] sm:$0xf]  ;;  %vm1029_vm2 = vcmask 531456   ;;  %p5810_p1 = scmp.ne.s32.totalorder %s5794_s19, 0 }
  0x5f   : > { %v532_v8 = vsel %vm531_vm4, 65537, %v4959_v2  ;;  %vm833_vm5 = vmpackc.low %vm526_vm3, %vm525_vm1  ;;  %v5188_v11 = vcombine.low %v5176_v7, %v5176_v7  ;;  %v5190_v12 = vld [vmem:[%s485_s29 + $0xc] sm:$0xff]  ;;  %v5196_v13 = vcombine.high %v5176_v7, %v5176_v7  ;;  %v5201_v14 = vcombine.low %v5179_v9, %v5179_v9  ;;  %v5203_v15 = vld [vmem:[%s485_s29 + $0x14] sm:$0xf] }
  0x60   : > { %533 = vrot.lane.b32.xlu0 %v532_v8, %s4960_s15  ;;  %v5183_v10 = vsel %vm833_vm5, 65537, %v4959_v2  ;;  %996 = vrot.lane.b32.xlu1 %v532_v8, %s4961_s16  ;;  %v5209_v16 = vcombine.low %v5190_v12, %v5190_v12  ;;  %v5216_v17 = vcombine.low %v5203_v15, %v5203_v15  ;;  %v5220_v18 = vcombine.high %v5190_v12, %v5190_v12 }
  0x61   : > { %vm868_vm5 = vcmask 646144  }
  0x64   : > { %835 = vrot.lane.b32.xlu0 %v5183_v10, %s4962_s17  ;;  %562 = vrot.lane.b32.xlu1 %v5188_v11, %s4963_s22 }
  0x68   : > { %564 = vrot.lane.b32.xlu0 %v5196_v13, %s4963_s22  ;;  %566 = vrot.lane.b32.xlu1 %v5201_v14, %s4963_s22 }
  0x6c   : > { %1291 = vrot.lane.b32.xlu0 %v5183_v10, %s4964_s25  ;;  %633 = vrot.lane.b32.xlu1 %v5209_v16, %s4963_s22 }
  0x70   : > { %637 = vrot.lane.b32.xlu1 %v5216_v17, %s4963_s22  ;;  %635 = vrot.lane.b32.xlu0 %v5220_v18, %s4963_s22 }
  0x74   : > { %1450 = vrot.lane.b32.xlu1 %v532_v8, %s4965_s23 }
  0xd2   : > { %v534_v19 = vpop.permute.xlu0 %533  ;;  %v5225_v20 = vpop.permute.xlu1 %996 }
  0xd3   : > { %v535_v21 = vrot.slane %v534_v19, 4  ;;  %v998_v52 = vrot.slane %v5225_v20, 4 }
  0xd5   : > { %v537_v22 = vsel %vm536_vm6, %v535_v21, %v534_v19  ;;  %vm5228_vm7 = vcmp.ne.s16.totalorder %v535_v21, 0  ;;  %vm1002_vm0 = vcmp.ne.s16.totalorder %v998_v52, 0  ;;  %v1000_v60 = vsel %vm999_vm15, %v998_v52, %v5225_v20 }
  0xd6   : > { %vm538_vm8 = vcmp.ne.s16.totalorder %v537_v22, 0  ;;  %v836_v24 = vpop.permute.xlu0 %835  ;;  %v541_v25 = vsel %vm5228_vm7, %v5179_v9, 0  ;;  %v563_v26 = vpop.permute.xlu1 %562  ;;  %v543_v37 = vsel %vm5228_vm7, %v5203_v15, 0  ;;  %v1006_v62 = vsel %vm1002_vm0, %v5203_v15, 0 }
  0xd7   : > { %v540_v27 = vsel %vm538_vm8, %v5176_v7, 0  ;;  %v837_v28 = vrot.slane %v836_v24, 4  ;;  %v4097_v29 = vcombine.low %v541_v25, %v541_v25  ;;  %v542_v38 = vsel %vm538_vm8, %v5190_v12, 0 }
  0xd8   : > { %v4096_v30 = vcombine.high %v540_v27, %v540_v27  ;;  %v4095_v35 = vcombine.low %v540_v27, %v540_v27  ;;  %v4102_v42 = vcombine.low %v543_v37, %v543_v37  ;;  %v4101_v45 = vcombine.high %v542_v38, %v542_v38 }
  0xd9   : > { %vm5237_vm9 = vcmp.ne.s16.totalorder %v837_v28, 0  ;;  %707 = vrot.lane.b32.xlu0 %v4097_v29, %s4966_s27  ;;  %v839_v41 = vsel %vm838_vm10, %v837_v28, %v836_v24  ;;  %v4100_v49 = vcombine.low %v542_v38, %v542_v38  ;;  %vm1001_vm1 = vcmp.ne.s16.totalorder %v1000_v60, 0 }
  0xda   : > { %705 = vrot.lane.b32.xlu1 %v4096_v30, %s4966_s27  ;;  %v843_v32 = vsel %vm5237_vm9, %v5179_v9, 0  ;;  %v565_v33 = vpop.permute.xlu0 %564  ;;  %v567_v34 = vpop.permute.xlu1 %566  ;;  %vm840_vm14 = vcmp.ne.s16.totalorder %v839_v41, 0  ;;  %v845_v51 = vsel %vm5237_vm9, %v5203_v15, 0  ;;  %v4128_v0 = vcombine.low %v1006_v62, %v1006_v62 }
  0xdb   : > { %v4110_v36 = vcombine.low %v843_v32, %v843_v32  ;;  %v570_v43 = vsel %vm568_vm11, %v565_v33, %v567_v34  ;;  %v569_v44 = vsel %vm568_vm11, %v563_v26, %v565_v33  ;;  %v842_v55 = vsel %vm840_vm14, %v5176_v7, 0 }
  0xdc   : > { %4087 = vmatprep.subr.msk.bf16.mxu1 %vm575_vm12, %v570_v43  ;;  %v577_v46 = vsel %vm575_vm12, %v569_v44, 0  ;;  %v4115_v57 = vcombine.low %v845_v51, %v845_v51  ;;  %v4108_v58 = vcombine.low %v842_v55, %v842_v55  ;;  %v844_v59 = vsel %vm840_vm14, %v5190_v12, 0 }
  0xdd   : > { %703 = vrot.lane.b32.xlu0 %v4095_v35, %s4966_s27  ;;  %583 = vmatpush1.bf16.msra.mxu1 %v577_v46  ;;  %v4109_v61 = vcombine.high %v842_v55, %v842_v55  ;;  %v4114_v63 = vcombine.high %v844_v59, %v844_v59  ;;  %v1004_v3 = vsel %vm1002_vm0, %v5179_v9, 0  ;;  %v4113_v4 = vcombine.low %v844_v59, %v844_v59 }
  0xde   : > { %866 = vrot.lane.b32.xlu1 %v4110_v36, %s4965_s23  ;;  %v5253_v39 = vpop.permute.xlu0 %1291  ;;  %v634_v40 = vpop.permute.xlu1 %633  ;;  %v1003_v5 = vsel %vm1001_vm1, %v5176_v7, 0  ;;  %v4123_v6 = vcombine.low %v1004_v3, %v1004_v3  ;;  %vm709_vm9 = vcmask 662528   ;;  %vm1171_vm0 = vcmask 523264  }
  0xdf   : > { %v4122_v8 = vcombine.high %v1003_v5, %v1003_v5  ;;  %v4121_v19 = vcombine.low %v1003_v5, %v1003_v5  ;;  %v1293_v22 = vrot.slane %v5253_v39, 4 }
  0xe0   : > { %4088 = vmatmul.mubr.msk.bf16.vlgmr.msra.gmra.mrb[0].mxu1 %vm571_vm13, %v4600_v47 }
  0xe1   : > { %776 = vrot.lane.b32.xlu0 %v4102_v42, %s4966_s27  ;;  %679 = vmatprep.mubr.bf16.mxu1 %v4959_v2  ;;  %vm1296_vm3 = vcmp.ne.s16.totalorder %v1293_v22, 0  ;;  %v1294_v23 = vsel %vm1029_vm2, %v1293_v22, %v5253_v39 }
  0xe2   : > { %774 = vrot.lane.b32.xlu1 %v4101_v45, %s4966_s27  ;;  %v636_v48 = vpop.permute.xlu0 %635  ;;  %v638_v50 = vpop.permute.xlu1 %637  ;;  %v1300_v24 = vsel %vm1296_vm3, %v5203_v15, 0  ;;  %vm1295_vm4 = vcmp.ne.s16.totalorder %v1294_v23, 0  ;;  %v1298_v27 = vsel %vm1296_vm3, %v5179_v9, 0 }
  0xe3   : > { %v639_v53 = vsel %vm568_vm11, %v634_v40, %v636_v48  ;;  %v640_v54 = vsel %vm568_vm11, %v636_v48, %v638_v50  ;;  %v4148_v26 = vcombine.low %v1300_v24, %v1300_v24  ;;  %v1297_v28 = vsel %vm1295_vm4, %v5176_v7, 0 }
  0xe4   : > { %v642_v56 = vsel %vm575_vm12, %v639_v53, 0  ;;  %4092 = vmatprep.subr.msk.bf16.mxu1 %vm575_vm12, %v640_v54  ;;  %v4143_v30 = vcombine.low %v1298_v27, %v1298_v27  ;;  %v4142_v31 = vcombine.high %v1297_v28, %v1297_v28  ;;  %v1299_v32 = vsel %vm1295_vm4, %v5190_v12, 0 }
  0xe5   : > { %772 = vrot.lane.b32.xlu0 %v4100_v49, %s4966_s27  ;;  %648 = vmatpush1.bf16.msra.mxu1 %v642_v56  ;;  %v4141_v33 = vcombine.low %v1297_v28, %v1297_v28  ;;  %v4146_v35 = vcombine.low %v1299_v32, %v1299_v32  ;;  %v4147_v37 = vcombine.high %v1299_v32, %v1299_v32  ;;  %v1902_v28 = vld [vmem:[%s5768_s2] sm:$0xff] }
  0xe6   : > { %1743 = vrot.lane.b32.xlu1 %v5183_v10, %s4966_s27  ;;  %v1005_v10 = vsel %vm1001_vm1, %v5190_v12, 0  ;;  %v1451_v25 = vpop.permute.xlu1 %1450  ;;  %s5573_s27 = sand.u32 1, %s4943_s28  }
  0xe7   : > { %v4126_v20 = vcombine.low %v1005_v10, %v1005_v10  ;;  %v4127_v21 = vcombine.high %v1005_v10, %v1005_v10  ;;  %v1452_v29 = vrot.slane %v1451_v25, 4  ;;  %s4507_s30 = smul.u32 80, %s5573_s27  ;;  %s3923_s14 = scalar_lea.sflag [#allocation10], %s5573_s27 }
  0xe8   : > { %4093 = vmatmul.mubr.msk.bf16.vlgmr.msra.gmra.mrb[4].mxu1 %vm571_vm13, %v4600_v47 }
  0xe9   : > { %935 = vrot.lane.b32.xlu0 %v4115_v57, %s4965_s23  ;;  %753 = vmatprep.mubr.bf16.mxu1 %v4959_v2  ;;  %vm1455_vm7 = vcmp.ne.s16.totalorder %v1452_v29, 0  ;;  %v1453_v34 = vsel %vm868_vm5, %v1452_v29, %v1451_v25  ;;  %s5576_s20 = scalar_lea.vmem [#allocation9], %s4507_s30  ;;  %s4509_s30 = smul.u32 1280, %s5068_s11 }
  0xea   : > { %862 = vrot.lane.b32.xlu1 %v4108_v58, %s4965_s23  ;;  %v1459_v36 = vsel %vm1455_vm7, %v5203_v15, 0  ;;  %vm1454_vm8 = vcmp.ne.s16.totalorder %v1453_v34, 0  ;;  %v1457_v39 = vsel %vm1455_vm7, %v5179_v9, 0  ;;  %v1923_v34 = vld [vmem:[%s5769_s3 + $0x8] sm:$0xff] }
  0xeb   : > { %v4161_v38 = vcombine.low %v1459_v36, %v1459_v36  ;;  %v1456_v40 = vsel %vm1454_vm8, %v5176_v7, 0  ;;  %v4156_v41 = vcombine.low %v1457_v39, %v1457_v39  ;;  %v1458_v43 = vsel %vm1454_vm8, %v5190_v12, 0  ;;  %v4603_v36 = vld [vmem:[%s5767_s1 + $0x18] sm:$0xff]   ;;  %s5619_s26 = scalar_lea.hbm %s5779_s13, %s4509_s30 }
  0xec   : > { %v4155_v42 = vcombine.high %v1456_v40, %v1456_v40  ;;  %v4154_v44 = vcombine.low %v1456_v40, %v1456_v40  ;;  %v4159_v45 = vcombine.low %v1458_v43, %v1458_v43  ;;  %v4160_v46 = vcombine.high %v1458_v43, %v1458_v43 }
  0xed   : > { %864 = vrot.lane.b32.xlu0 %v4109_v61, %s4965_s23 }
  0xee   : > { %933 = vrot.lane.b32.xlu1 %v4114_v63, %s4965_s23 }
  0xf1   : > { %931 = vrot.lane.b32.xlu0 %v4113_v4, %s4965_s23  ;;  %s3954_s23 = sshll.u32 %s5576_s20, 4  ;;  %s5613_s23 = int_to_ptr.vmem [resolvable:$true] %s3954_s23 }
  0xf2   : > { %1096 = vrot.lane.b32.xlu1 %v4128_v0, %s4964_s25  ;;  %s4849_s29 = scalar_lea.vmem %s5613_s23, 1280 }
  0xf3   : > { %p4850_p10 = scmp.ne.s32.totalorder %s5613_s23, %s4849_s29 }
  0xf5   : > { %1027 = vrot.lane.b32.xlu0 %v4123_v6, %s4964_s25  ;;  %p4851_p2 = pnand %p4850_p10, %p5810_p1 }
  0xf6   : > { %1025 = vrot.lane.b32.xlu1 %v4122_v8, %s4964_s25 }
  0xf7   : > { %p4852_p3 = pneg %p4851_p2 }
  0xf9   : > { %1023 = vrot.lane.b32.xlu0 %v4121_v19, %s4964_s25 }
  0xfa   : > { %1092 = vrot.lane.b32.xlu1 %v4126_v20, %s4964_s25 }
  0xfd   : > { %1094 = vrot.lane.b32.xlu0 %v4127_v21, %s4964_s25 }
  0xfe   : > { %1167 = vrot.lane.b32.xlu1 %v5196_v13, %s4967_s18 }
 0x101   : > { %1165 = vrot.lane.b32.xlu0 %v5188_v11, %s4967_s18 }
 0x102   : > { %1226 = vrot.lane.b32.xlu1 %v5209_v16, %s4967_s18 }
 0x105   : > { %1169 = vrot.lane.b32.xlu0 %v5201_v14, %s4967_s18 }
 0x106   : > { %1230 = vrot.lane.b32.xlu1 %v5216_v17, %s4967_s18 }
 0x109   : > { %1228 = vrot.lane.b32.xlu0 %v5220_v18, %s4967_s18 }
 0x10a   : > { %1389 = vrot.lane.b32.xlu1 %v4148_v26, %s4961_s16 }
 0x10d   : > { %1321 = vrot.lane.b32.xlu0 %v4143_v30, %s4961_s16  ;;  %v1922_v30 = vld [vmem:[%s5769_s3] sm:$0xff] }
 0x10e   : > { %1319 = vrot.lane.b32.xlu1 %v4142_v31, %s4961_s16 }
 0x111   : > { %1317 = vrot.lane.b32.xlu0 %v4141_v33, %s4961_s16 }
 0x112   : > { %1385 = vrot.lane.b32.xlu1 %v4146_v35, %s4961_s16 }
 0x115   : > { %1387 = vrot.lane.b32.xlu0 %v4147_v37, %s4961_s16  ;;  %v1903_v37 = vld [vmem:[%s5768_s2 + $0x8] sm:$0xff]  ;;  %s4969_s16 = smov [#allocation9]  }
 0x116   : > { %1548 = vrot.lane.b32.xlu1 %v4161_v38, %s4962_s17 }
 0x119   : > { %1480 = vrot.lane.b32.xlu0 %v4156_v41, %s4962_s17 }
 0x11a   : > { %1478 = vrot.lane.b32.xlu1 %v4155_v42, %s4962_s17 }
 0x11d   : > { %1476 = vrot.lane.b32.xlu0 %v4154_v44, %s4962_s17 }
 0x11e   : > { %1544 = vrot.lane.b32.xlu1 %v4159_v45, %s4962_s17 }
 0x121   : > { %1546 = vrot.lane.b32.xlu0 %v4160_v46, %s4962_s17  ;;  %s4853_s17 = sshll.u32 %s4969_s16, 4  ;;  %s4854_s17 = int_to_ptr.vmem [resolvable:$false] %s4853_s17 }
 0x122   : > { %1619 = vrot.lane.b32.xlu1 %v5196_v13, %s4968_s24  ;;  %p4856_p4 = scmp.lt.s32.totalorder %s5613_s23, %s4854_s17 }
 0x125   : > { %1617 = vrot.lane.b32.xlu0 %v5188_v11, %s4968_s24 }
 0x126   : > { %1678 = vrot.lane.b32.xlu1 %v5209_v16, %s4968_s24 }
 0x129   : > { %1621 = vrot.lane.b32.xlu0 %v5201_v14, %s4968_s24  ;;  %v4601_v14 = vld [vmem:[%s5767_s1] sm:$0xff]  }
 0x12a   : > { %1682 = vrot.lane.b32.xlu1 %v5216_v17, %s4968_s24 }
 0x12d   : > { %1680 = vrot.lane.b32.xlu0 %v5220_v18, %s4968_s24 }
 0x14b   : > { %v708_v47 = vpop.permute.xlu0 %707 }
 0x14c   : > { %v706_v48 = vpop.permute.xlu1 %705 }
 0x14d   : > { %v711_v49 = vsel %vm709_vm9, %v706_v48, %v708_v47 }
 0x14e   : > { %4098 = vmatprep.subr.msk.bf16.mxu1 %vm575_vm12, %v711_v49 }
 0x14f   : > { %v704_v50 = vpop.permute.xlu0 %703 }
 0x150   : > { %v710_v13 = vsel %vm709_vm9, %v704_v50, %v706_v48  ;;  %v867_v51 = vpop.permute.xlu1 %866  ;;  %v4604_v50 = vld [vmem:[%s5767_s1 + $0x20] sm:$0xff]  }
 0x151   : > { %v716_v11 = vsel %vm575_vm12, %v710_v13, 0 }
 0x152   : > { %722 = vmatpush1.bf16.msra.mxu1 %v716_v11 }
 0x153   : > { %v777_v16 = vpop.permute.xlu0 %776 }
 0x154   : > { %v775_v17 = vpop.permute.xlu1 %774 }
 0x155   : > { %v779_v18 = vsel %vm709_vm9, %v775_v17, %v777_v16  ;;  %4099 = vmatmul.mubr.msk.bf16.vlgmr.msra.gmra.mrb[0].mxu1 %vm571_vm13, %v4601_v14 }
 0x156   : > { %4103 = vmatprep.subr.msk.bf16.mxu1 %vm575_vm12, %v779_v18  ;;  %818 = vmatprep.mubr.bf16.mxu1 %v4959_v2 }
 0x157   : > { %v773_v52 = vpop.permute.xlu0 %772 }
 0x158   : > { %v778_v53 = vsel %vm709_vm9, %v773_v52, %v775_v17  ;;  %v1744_v54 = vpop.permute.xlu1 %1743 }
 0x159   : > { %v781_v55 = vsel %vm575_vm12, %v778_v53, 0  ;;  %v1745_v56 = vrot.slane %v1744_v54, 4 }
 0x15a   : > { %787 = vmatpush1.bf16.msra.mxu1 %v781_v55 }
 0x15b   : > { %v1746_v57 = vsel %vm709_vm9, %v1745_v56, %v1744_v54  ;;  %vm5357_vm11 = vcmp.ne.s16.totalorder %v1745_v56, 0  ;;  %v936_v59 = vpop.permute.xlu0 %935 }
 0x15c   : > { %vm1747_vm14 = vcmp.ne.s16.totalorder %v1746_v57, 0  ;;  %v863_v60 = vpop.permute.xlu1 %862  ;;  %v1750_v61 = vsel %vm5357_vm11, %v5179_v9, 0  ;;  %v1752_v21 = vsel %vm5357_vm11, %v5203_v15, 0  ;;  %v4605_v57 = vld [vmem:[%s5767_s1 + $0x28] sm:$0xff]  }
 0x15d   : > { %v1749_v62 = vsel %vm1747_vm14, %v5176_v7, 0  ;;  %v4176_v63 = vcombine.low %v1750_v61, %v1750_v61  ;;  %4104 = vmatmul.mubr.msk.bf16.vlgmr.msra.gmra.mrb[4].mxu1 %vm571_vm13, %v4601_v14  ;;  %v1751_v3 = vsel %vm1747_vm14, %v5190_v12, 0  ;;  %v4602_v12 = vld [vmem:[%s5767_s1 + $0x10] sm:$0xff]   ;;  %v4181_v26 = vcombine.low %v1752_v21, %v1752_v21 }
 0x15e   : > { %v4175_v0 = vcombine.high %v1749_v62, %v1749_v62  ;;  %977 = vmatprep.mubr.bf16.mxu1 %v4959_v2  ;;  %v4174_v10 = vcombine.low %v1749_v62, %v1749_v62  ;;  %v4179_v19 = vcombine.low %v1751_v3, %v1751_v3  ;;  %v4180_v25 = vcombine.high %v1751_v3, %v1751_v3 }
 0x15f   : > { %1773 = vrot.lane.b32.xlu0 %v4176_v63, %s4960_s15  ;;  %v865_v4 = vpop.permute.xlu0 %864 }
 0x160   : > { %1771 = vrot.lane.b32.xlu1 %v4175_v0, %s4960_s15  ;;  %v934_v5 = vpop.permute.xlu1 %933  ;;  %v870_v6 = vsel %vm868_vm5, %v865_v4, %v867_v51  ;;  %v869_v9 = vsel %vm868_vm5, %v863_v60, %v865_v4 }
 0x161   : > { %v938_v7 = vsel %vm868_vm5, %v934_v5, %v936_v59  ;;  %4111 = vmatprep.subr.msk.bf16.mxu0 %vm575_vm12, %v870_v6  ;;  %v875_v8 = vsel %vm575_vm12, %v869_v9, 0 }
 0x162   : > { %881 = vmatpush1.bf16.msra.mxu0 %v875_v8  ;;  %4116 = vmatprep.subr.msk.bf16.mxu1 %vm575_vm12, %v938_v7  ;;  %v4606_v7 = vld [vmem:[%s5767_s1 + $0x30] sm:$0xff]  }
 0x163   : > { %1769 = vrot.lane.b32.xlu0 %v4174_v10, %s4960_s15  ;;  %v932_v20 = vpop.permute.xlu0 %931 }
 0x164   : > { %v937_v22 = vsel %vm868_vm5, %v932_v20, %v934_v5  ;;  %1837 = vrot.lane.b32.xlu1 %v4179_v19, %s4960_s15  ;;  %v1097_v23 = vpop.permute.xlu1 %1096 }
 0x165   : > { %v940_v24 = vsel %vm575_vm12, %v937_v22, 0  ;;  %4112 = vmatmul.mubr.msk.bf16.vlgmr.msra.gmra.mrb[0].mxu0 %vm571_vm13, %v4602_v12 }
 0x166   : > { %946 = vmatpush1.bf16.msra.mxu1 %v940_v24  ;;  %1073 = vmatprep.mubr.bf16.mxu0 %v4959_v2 }
 0x167   : > { %1839 = vrot.lane.b32.xlu0 %v4180_v25, %s4960_s15  ;;  %v1028_v27 = vpop.permute.xlu0 %1027 }
 0x168   : > { %1841 = vrot.lane.b32.xlu1 %v4181_v26, %s4960_s15  ;;  %v1026_v15 = vpop.permute.xlu1 %1025 }
 0x169   : > { %v1031_v29 = vsel %vm1029_vm2, %v1026_v15, %v1028_v27  ;;  %4117 = vmatmul.mubr.msk.bf16.vlgmr.msra.gmra.mrb[4].mxu1 %vm571_vm13, %v4602_v12 }
 0x16a   : > { %4124 = vmatprep.subr.msk.bf16.mxu0 %vm575_vm12, %v1031_v29  ;;  %1138 = vmatprep.mubr.bf16.mxu1 %v4959_v2 }
 0x16b   : > { %v1024_v31 = vpop.permute.xlu0 %1023  ;;  %1906 = vperm.xlu0 %4592, %v1902_v28  }
 0x16c   : > { %v1030_v32 = vsel %vm1029_vm2, %v1024_v31, %v1026_v15  ;;  %v1093_v33 = vpop.permute.xlu1 %1092  ;;  %1926 = vperm.xlu1 %4593, %v1922_v30   ;;  %v4607_v15 = vld [vmem:[%s5767_s1 + $0x38] sm:$0xff]  }
 0x16d   : > { %v1036_v35 = vsel %vm575_vm12, %v1030_v32, 0 }
 0x16e   : > { %1042 = vmatpush1.bf16.msra.mxu0 %v1036_v35  ;;  %v1958_v35 = vld [vmem:[#allocation3 + $0x20] sm:$0xff] }
 0x16f   : > { %v1095_v38 = vpop.permute.xlu0 %1094  ;;  %1931 = vperm.xlu0 %4592, %v1923_v34   ;;  %v1954_v34 = vld [vmem:[#allocation3] sm:$0xff] }
 0x170   : > { %v1098_v39 = vsel %vm1029_vm2, %v1093_v33, %v1095_v38  ;;  %v1099_v40 = vsel %vm1029_vm2, %v1095_v38, %v1097_v23  ;;  %v1168_v41 = vpop.permute.xlu1 %1167  ;;  %1911 = vperm.xlu1 %4593, %v1903_v37   ;;  %v4185_v38 = vcombine.high %v1954_v34, %v1958_v35 }
 0x171   : > { %v1101_v42 = vsel %vm575_vm12, %v1098_v39, 0  ;;  %4129 = vmatprep.subr.msk.bf16.mxu1 %vm575_vm12, %v1099_v40  ;;  %4125 = vmatmul.mubr.msk.bf16.vlgmr.msra.gmra.mrb[0].mxu0 %vm571_vm13, %v4603_v36 }
 0x172   : > { %1107 = vmatpush1.bf16.msra.mxu1 %v1101_v42  ;;  %1215 = vmatprep.mubr.bf16.mxu0 %v4959_v2  ;;  %v1966_v42 = vld [vmem:[#allocation3 + $0x60] sm:$0xff] }
 0x173   : > { %v1166_v43 = vpop.permute.xlu0 %1165 }
 0x174   : > { %v1172_v44 = vsel %vm1171_vm0, %v1166_v43, %v1168_v41  ;;  %v1227_v45 = vpop.permute.xlu1 %1226 }
 0x175   : > { %4130 = vmatmul.mubr.msk.bf16.vlgmr.msra.gmra.mrb[4].mxu1 %vm571_vm13, %v4603_v36  ;;  %v1178_v46 = vsel %vm575_vm12, %v1172_v44, 0  ;;  %v1955_v44 = vld [vmem:[#allocation3 + $0x8] sm:$0xff] }
 0x176   : > { %1272 = vmatprep.mubr.bf16.mxu1 %v4959_v2 }
 0x177   : > { %v1170_v47 = vpop.permute.xlu0 %1169 }
 0x178   : > { %v1173_v48 = vsel %vm1171_vm0, %v1168_v41, %v1170_v47  ;;  %v1231_v49 = vpop.permute.xlu1 %1230  ;;  %v1962_v41 = vld [vmem:[#allocation3 + $0x40] sm:$0xff] }
 0x179   : > { %4134 = vmatprep.subr.msk.bf16.mxu0 %vm575_vm12, %v1173_v48  ;;  %v4193_v48 = vcombine.high %v1962_v41, %v1966_v42 }
 0x17a   : > { %1184 = vmatpush1.bf16.msra.mxu0 %v1178_v46  ;;  %v4184_v46 = vcombine.low %v1954_v34, %v1958_v35  ;;  %v2003_v34 = vld [vmem:[#allocation3 + $0x188] sm:$0xff] }
 0x17b   : > { %v1229_v13 = vpop.permute.xlu0 %1228  ;;  %v2007_v35 = vld [vmem:[#allocation3 + $0x1a8] sm:$0xff] }
 0x17c   : > { %v1232_v51 = vsel %vm1171_vm0, %v1227_v45, %v1229_v13  ;;  %v1233_v11 = vsel %vm1171_vm0, %v1229_v13, %v1231_v49  ;;  %v1390_v14 = vpop.permute.xlu1 %1389  ;;  %v1959_v45 = vld [vmem:[#allocation3 + $0x28] sm:$0xff] }
 0x17d   : > { %v1235_v16 = vsel %vm575_vm12, %v1232_v51, 0  ;;  %4136 = vmatprep.subr.msk.bf16.mxu1 %vm575_vm12, %v1233_v11  ;;  %4135 = vmatmul.mubr.msk.bf16.vlgmr.msra.gmra.mrb[0].mxu0 %vm571_vm13, %v4604_v50  ;;  %v4187_v13 = vcombine.high %v1955_v44, %v1959_v45  ;;  %v1970_v51 = vld [vmem:[#allocation3 + $0x80] sm:$0xff] }
 0x17e   : > { %1241 = vmatpush1.bf16.msra.mxu1 %v1235_v16  ;;  %1366 = vmatprep.mubr.bf16.mxu0 %v4959_v2  ;;  %v1974_v11 = vld [vmem:[#allocation3 + $0xa0] sm:$0xff] }
 0x17f   : > { %v1322_v17 = vpop.permute.xlu0 %1321 }
 0x180   : > { %v1320_v18 = vpop.permute.xlu1 %1319 }
 0x181   : > { %v1324_v52 = vsel %vm999_vm15, %v1320_v18, %v1322_v17  ;;  %4137 = vmatmul.mubr.msk.bf16.vlgmr.msra.gmra.mrb[4].mxu1 %vm571_vm13, %v4604_v50  ;;  %v1963_v17 = vld [vmem:[#allocation3 + $0x48] sm:$0xff] }
 0x182   : > { %4144 = vmatprep.subr.msk.bf16.mxu0 %vm575_vm12, %v1324_v52  ;;  %1431 = vmatprep.mubr.bf16.mxu1 %v4959_v2  ;;  %v4192_v52 = vcombine.low %v1962_v41, %v1966_v42  ;;  %v2022_v41 = vld [vmem:[#allocation3 + $0x220] sm:$0xff]  ;;  %v2011_v42 = vld [vmem:[#allocation3 + $0x1c8] sm:$0xff] }
 0x183   : > { %v1318_v53 = vpop.permute.xlu0 %1317 }
 0x184   : > { %v1323_v54 = vsel %vm999_vm15, %v1318_v53, %v1320_v18  ;;  %v1386_v55 = vpop.permute.xlu1 %1385  ;;  %v1967_v18 = vld [vmem:[#allocation3 + $0x68] sm:$0xff]  ;;  %v4186_v53 = vcombine.low %v1955_v44, %v1959_v45  ;;  %v4234_v44 = vcombine.low %v2003_v34, %v2007_v35 }
 0x185   : > { %v1329_v56 = vsel %vm575_vm12, %v1323_v54, 0  ;;  %v4201_v54 = vcombine.high %v1970_v51, %v1974_v11 }
 0x186   : > { %1335 = vmatpush1.bf16.msra.mxu0 %v1329_v56  ;;  %v1978_v56 = vld [vmem:[#allocation3 + $0xc0] sm:$0xff] }
 0x187   : > { %v1388_v58 = vpop.permute.xlu0 %1387 }
 0x188   : > { %v1391_v59 = vsel %vm999_vm15, %v1386_v55, %v1388_v58  ;;  %v1392_v60 = vsel %vm999_vm15, %v1388_v58, %v1390_v14  ;;  %v1549_v61 = vpop.permute.xlu1 %1548  ;;  %vm1623_vm15 = vcmask 392192   ;;  %v4195_v55 = vcombine.high %v1963_v17, %v1967_v18  ;;  %v1971_v58 = vld [vmem:[#allocation3 + $0x88] sm:$0xff] }
 0x189   : > { %v1394_v62 = vsel %vm575_vm12, %v1391_v59, 0  ;;  %4149 = vmatprep.subr.msk.bf16.mxu1 %vm575_vm12, %v1392_v60  ;;  %4145 = vmatmul.mubr.msk.bf16.vlgmr.msra.gmra.mrb[0].mxu0 %vm571_vm13, %v4605_v57  ;;  %v1975_v59 = vld [vmem:[#allocation3 + $0xa8] sm:$0xff]  ;;  %v4200_v60 = vcombine.low %v1970_v51, %v1974_v11 }
 0x18a   : > { %1400 = vmatpush1.bf16.msra.mxu1 %v1394_v62  ;;  %1525 = vmatprep.mubr.bf16.mxu0 %v4959_v2 }
 0x18b   : > { %v1481_v63 = vpop.permute.xlu0 %1480 }
 0x18c   : > { %v1479_v0 = vpop.permute.xlu1 %1478 }
 0x18d   : > { %v1483_v3 = vsel %vm838_vm10, %v1479_v0, %v1481_v63  ;;  %4150 = vmatmul.mubr.msk.bf16.vlgmr.msra.gmra.mrb[4].mxu1 %vm571_vm13, %v4605_v57  ;;  %v1982_v57 = vld [vmem:[#allocation3 + $0xe0] sm:$0xff]  ;;  %v4203_v63 = vcombine.high %v1971_v58, %v1975_v59 }
 0x18e   : > { %4157 = vmatprep.subr.msk.bf16.mxu0 %vm575_vm12, %v1483_v3  ;;  %1590 = vmatprep.mubr.bf16.mxu1 %v4959_v2  ;;  %v4209_v62 = vcombine.high %v1978_v56, %v1982_v57  ;;  %v1990_v3 = vld [vmem:[#allocation3 + $0x120] sm:$0xff] }
 0x18f   : > { %v1477_v4 = vpop.permute.xlu0 %1476 }
 0x190   : > { %v1482_v5 = vsel %vm838_vm10, %v1477_v4, %v1479_v0  ;;  %v1545_v6 = vpop.permute.xlu1 %1544  ;;  %v1986_v0 = vld [vmem:[#allocation3 + $0x100] sm:$0xff]  ;;  %v1979_v4 = vld [vmem:[#allocation3 + $0xc8] sm:$0xff] }
 0x191   : > { %v1488_v9 = vsel %vm575_vm12, %v1482_v5, 0  ;;  %v1983_v5 = vld [vmem:[#allocation3 + $0xe8] sm:$0xff] }
 0x192   : > { %1494 = vmatpush1.bf16.msra.mxu0 %v1488_v9  ;;  %v4202_v9 = vcombine.low %v1971_v58, %v1975_v59  ;;  %v2046_v58 = vld [vmem:[#allocation3 + $0x2e0] sm:$0xff]  ;;  %v2035_v59 = vld [vmem:[#allocation3 + $0x288] sm:$0xff] }
 0x193   : > { %v1547_v8 = vpop.permute.xlu0 %1546 }
 0x194   : > { %v1550_v10 = vsel %vm838_vm10, %v1545_v6, %v1547_v8  ;;  %v1551_v12 = vsel %vm838_vm10, %v1547_v8, %v1549_v61  ;;  %v1620_v19 = vpop.permute.xlu1 %1619  ;;  %v4194_v61 = vcombine.low %v1963_v17, %v1967_v18  ;;  %v4208_v6 = vcombine.low %v1978_v56, %v1982_v57  ;;  %v2038_v17 = vld [vmem:[#allocation3 + $0x2a0] sm:$0xff]  ;;  %v2027_v18 = vld [vmem:[#allocation3 + $0x248] sm:$0xff] }
 0x195   : > { %v1553_v20 = vsel %vm575_vm12, %v1550_v10, 0  ;;  %4162 = vmatprep.subr.msk.bf16.mxu1 %vm575_vm12, %v1551_v12  ;;  %4158 = vmatmul.mubr.msk.bf16.vlgmr.msra.gmra.mrb[0].mxu0 %vm571_vm13, %v4606_v7  ;;  %v4211_v8 = vcombine.high %v1979_v4, %v1983_v5  ;;  %v1994_v10 = vld [vmem:[#allocation3 + $0x140] sm:$0xff] }
 0x196   : > { %1559 = vmatpush1.bf16.msra.mxu1 %v1553_v20  ;;  %1667 = vmatprep.mubr.bf16.mxu0 %v4959_v2  ;;  %v1998_v12 = vld [vmem:[#allocation3 + $0x160] sm:$0xff]  ;;  %v1991_v20 = vld [vmem:[#allocation3 + $0x128] sm:$0xff] }
 0x197   : > { %v1618_v21 = vpop.permute.xlu0 %1617  ;;  %v2042_v57 = vld [vmem:[#allocation3 + $0x2c0] sm:$0xff] }
 0x198   : > { %v1624_v22 = vsel %vm1623_vm15, %v1618_v21, %v1620_v19  ;;  %v1679_v23 = vpop.permute.xlu1 %1678  ;;  %v4216_v21 = vcombine.low %v1986_v0, %v1990_v3 }
 0x199   : > { %4163 = vmatmul.mubr.msk.bf16.vlgmr.msra.gmra.mrb[4].mxu1 %vm571_vm13, %v4606_v7  ;;  %v1630_v24 = vsel %vm575_vm12, %v1624_v22, 0  ;;  %v4217_v7 = vcombine.high %v1986_v0, %v1990_v3  ;;  %v4210_v22 = vcombine.low %v1979_v4, %v1983_v5  ;;  %v2050_v3 = vld [vmem:[#allocation3 + $0x300] sm:$0xff]  ;;  %v2043_v5 = vld [vmem:[#allocation3 + $0x2c8] sm:$0xff] }
 0x19a   : > { %1724 = vmatprep.mubr.bf16.mxu1 %v4959_v2  ;;  %v2054_v4 = vld [vmem:[#allocation3 + $0x320] sm:$0xff] }
 0x19b   : > { %v1622_v25 = vpop.permute.xlu0 %1621 }
 0x19c   : > { %v1625_v26 = vsel %vm1623_vm15, %v1620_v19, %v1622_v25  ;;  %v1683_v27 = vpop.permute.xlu1 %1682  ;;  %v1987_v19 = vld [vmem:[#allocation3 + $0x108] sm:$0xff]  ;;  %v2002_v25 = vld [vmem:[#allocation3 + $0x180] sm:$0xff] }
 0x19d   : > { %4167 = vmatprep.subr.msk.bf16.mxu0 %vm575_vm12, %v1625_v26  ;;  %v2006_v26 = vld [vmem:[#allocation3 + $0x1a0] sm:$0xff] }
 0x19e   : > { %1636 = vmatpush1.bf16.msra.mxu0 %v1630_v24  ;;  %v4219_v24 = vcombine.high %v1987_v19, %v1991_v20 }
 0x19f   : > { %v1681_v28 = vpop.permute.xlu0 %1680 }
 0x1a0   : > { %v1684_v29 = vsel %vm1623_vm15, %v1679_v23, %v1681_v28  ;;  %v1685_v30 = vsel %vm1623_vm15, %v1681_v28, %v1683_v27  ;;  %v4225_v23 = vcombine.high %v1994_v10, %v1998_v12  ;;  %v1995_v27 = vld [vmem:[#allocation3 + $0x148] sm:$0xff]  ;;  %v4224_v28 = vcombine.low %v1994_v10, %v1998_v12 }
 0x1a1   : > { %v1687_v31 = vsel %vm575_vm12, %v1684_v29, 0  ;;  %4169 = vmatprep.subr.msk.bf16.mxu1 %vm575_vm12, %v1685_v30  ;;  %4168 = vmatmul.mubr.msk.bf16.vlgmr.msra.gmra.mrb[0].mxu0 %vm571_vm13, %v4607_v15  ;;  %v4218_v29 = vcombine.low %v1987_v19, %v1991_v20  ;;  %v4233_v30 = vcombine.high %v2002_v25, %v2006_v26  ;;  %v2051_v12 = vld [vmem:[#allocation3 + $0x308] sm:$0xff]  ;;  %v4280_v20 = vcombine.low %v2050_v3, %v2054_v4 }
 0x1a2   : > { %1693 = vmatpush1.bf16.msra.mxu1 %v1687_v31  ;;  %1818 = vmatprep.mubr.bf16.mxu0 %v4959_v2  ;;  %v2055_v19 = vld [vmem:[#allocation3 + $0x328] sm:$0xff] }
 0x1a5   : > { %4170 = vmatmul.mubr.msk.bf16.vlgmr.msra.gmra.mrb[4].mxu1 %vm571_vm13, %v4607_v15  ;;  %v1999_v15 = vld [vmem:[#allocation3 + $0x168] sm:$0xff] }
 0x1a6   : > { %1883 = vmatprep.mubr.bf16.mxu1 %v4959_v2  ;;  %v4608_v2 = vld [vmem:[%s5767_s1 + $0x40] sm:$0xff]   ;;  %v4227_v31 = vcombine.high %v1995_v27, %v1999_v15 }
 0x1d1   : > { %v1774_v32 = vpop.permute.xlu0 %1773 }
 0x1d2   : > { %v1772_v33 = vpop.permute.xlu1 %1771 }
 0x1d3   : > { %v1776_v36 = vsel %vm536_vm6, %v1772_v33, %v1774_v32  ;;  %v2010_v32 = vld [vmem:[#allocation3 + $0x1c0] sm:$0xff] }
 0x1d4   : > { %4177 = vmatprep.subr.msk.bf16.mxu0 %vm575_vm12, %v1776_v36  ;;  %v4232_v36 = vcombine.low %v2002_v25, %v2006_v26 }
 0x1d5   : > { %v1770_v37 = vpop.permute.xlu0 %1769 }
 0x1d6   : > { %v1775_v39 = vsel %vm536_vm6, %v1770_v37, %v1772_v33  ;;  %v1838_v40 = vpop.permute.xlu1 %1837  ;;  %v2014_v33 = vld [vmem:[#allocation3 + $0x1e0] sm:$0xff]  ;;  %v4226_v37 = vcombine.low %v1995_v27, %v1999_v15 }
 0x1d7   : > { %v1781_v43 = vsel %vm575_vm12, %v1775_v39, 0  ;;  %v4235_v39 = vcombine.high %v2003_v34, %v2007_v35  ;;  %v2058_v15 = vld [vmem:[#allocation3 + $0x340] sm:$0xff] }
 0x1d8   : > { %1787 = vmatpush1.bf16.msra.mxu0 %v1781_v43  ;;  %v2015_v43 = vld [vmem:[#allocation3 + $0x1e8] sm:$0xff]  ;;  %v2066_v35 = vld [vmem:[#allocation3 + $0x380] sm:$0xff] }
 0x1d9   : > { %v1840_v47 = vpop.permute.xlu0 %1839  ;;  %2722 = vmatprep.subr.bf16.mxu0 %v4185_v38  ;;  %v4241_v38 = vcombine.high %v2010_v32, %v2014_v33  ;;  %v4242_v51 = vcombine.low %v2011_v42, %v2015_v43 }
 0x1da   : > { %v1843_v49 = vsel %vm536_vm6, %v1838_v40, %v1840_v47  ;;  %v1842_v50 = vpop.permute.xlu1 %1841  ;;  %v2018_v40 = vld [vmem:[#allocation3 + $0x200] sm:$0xff] }
 0x1db   : > { %v1846_v14 = vsel %vm575_vm12, %v1843_v49, 0  ;;  %v1844_v16 = vsel %vm536_vm6, %v1840_v47, %v1842_v50  ;;  %4178 = vmatmul.mubr.msk.bf16.vlgmr.msra.gmra.mrb[0].mxu0 %vm571_vm13, %v4608_v2  ;;  %v4249_v45 = vcombine.high %v2018_v40, %v2022_v41  ;;  %v2026_v47 = vld [vmem:[#allocation3 + $0x240] sm:$0xff]  ;;  %v2019_v49 = vld [vmem:[#allocation3 + $0x208] sm:$0xff]  ;;  %vm3557_vm6 = vcmask 31744  }
 0x1dc   : > { %4182 = vmatprep.subr.msk.bf16.mxu1 %vm575_vm12, %v1844_v16  ;;  %2723 = vmatpush1.bf16.msra.mxu0 %v4184_v46  ;;  %v4243_v46 = vcombine.high %v2011_v42, %v2015_v43  ;;  %v2023_v50 = vld [vmem:[#allocation3 + $0x228] sm:$0xff]  ;;  %v2034_v16 = vld [vmem:[#allocation3 + $0x280] sm:$0xff] }
 0x1dd   : > { %1852 = vmatpush1.bf16.msra.mxu1 %v1846_v14  ;;  %2724 = vmatprep.subr.bf16.mxu0 %v4193_v48  ;;  %v2030_v48 = vld [vmem:[#allocation3 + $0x260] sm:$0xff]  ;;  %v4251_v14 = vcombine.high %v2019_v49, %v2023_v50 }
 0x1de   : > { %2765 = vmatprep.subr.bf16.mxu1 %v4187_v13  ;;  %v4248_v13 = vcombine.low %v2018_v40, %v2022_v41  ;;  %v4257_v11 = vcombine.high %v2026_v47, %v2030_v48  ;;  %v2074_v43 = vld [vmem:[#allocation3 + $0x3c0] sm:$0xff] }
 0x1e0   : > { %4183 = vmatmul.mubr.msk.bf16.vlgmr.msra.gmra.mrb[4].mxu1 %vm571_vm13, %v4608_v2  ;;  %2725 = vmatpush1.bf16.msra.mxu0 %v4192_v52  ;;  %v4240_v2 = vcombine.low %v2010_v32, %v2014_v33  ;;  %v2031_v52 = vld [vmem:[#allocation3 + $0x268] sm:$0xff] }
 0x1e1   : > { %2766 = vmatpush1.bf16.msra.mxu1 %v4186_v53  ;;  %2726 = vmatprep.subr.bf16.mxu0 %v4201_v54  ;;  %v4256_v53 = vcombine.low %v2026_v47, %v2030_v48  ;;  %v4250_v54 = vcombine.low %v2019_v49, %v2023_v50  ;;  %v4259_v56 = vcombine.high %v2027_v18, %v2031_v52  ;;  %v5492_v50 = vld [vmem:[#allocation3 + $0x10] sm:$0xff] }
 0x1e2   : > { %2767 = vmatprep.subr.bf16.mxu1 %v4195_v55  ;;  %v4265_v55 = vcombine.high %v2034_v16, %v2038_v17 }
 0x1e4   : > { %2727 = vmatpush1.bf16.msra.mxu0 %v4200_v60  ;;  %v2039_v60 = vld [vmem:[#allocation3 + $0x2a8] sm:$0xff] }
 0x1e5   : > { %2768 = vmatpush1.bf16.msra.mxu1 %v4194_v61  ;;  %2728 = vmatprep.subr.bf16.mxu0 %v4209_v62  ;;  %v4264_v61 = vcombine.low %v2034_v16, %v2038_v17  ;;  %v4258_v62 = vcombine.low %v2027_v18, %v2031_v52  ;;  %v4267_v0 = vcombine.high %v2035_v59, %v2039_v60 }
 0x1e6   : > { %2769 = vmatprep.subr.bf16.mxu1 %v4203_v63  ;;  %v4273_v63 = vcombine.high %v2042_v57, %v2046_v58 }
 0x1e8   : > { %2729 = vmatpush1.bf16.msra.mxu0 %v4208_v6  ;;  %v2047_v6 = vld [vmem:[#allocation3 + $0x2e8] sm:$0xff] }
 0x1e9   : > { %2770 = vmatpush1.bf16.msra.mxu1 %v4202_v9  ;;  %2730 = vmatprep.subr.bf16.mxu0 %v4217_v7  ;;  %v4272_v9 = vcombine.low %v2042_v57, %v2046_v58  ;;  %v4266_v7 = vcombine.low %v2035_v59, %v2039_v60  ;;  %v4275_v10 = vcombine.high %v2043_v5, %v2047_v6 }
 0x1ea   : > { %2771 = vmatprep.subr.bf16.mxu1 %v4211_v8  ;;  %v4281_v8 = vcombine.high %v2050_v3, %v2054_v4 }
 0x1eb   : > { %v1927_v52 = vpop.permute.xlu1 %1926 }
 0x1ec   : > { %2731 = vmatpush1.bf16.msra.mxu0 %v4216_v21  ;;  %v4274_v21 = vcombine.low %v2043_v5, %v2047_v6 }
 0x1ed   : > { %2772 = vmatpush1.bf16.msra.mxu1 %v4210_v22  ;;  %2732 = vmatprep.subr.bf16.mxu0 %v4225_v23  ;;  %v4283_v22 = vcombine.high %v2051_v12, %v2055_v19  ;;  %v4282_v23 = vcombine.low %v2051_v12, %v2055_v19 }
 0x1ee   : > { %2773 = vmatprep.subr.bf16.mxu1 %v4219_v24 }
 0x1ef   : > { %v1912_v59 = vpop.permute.xlu1 %1911 }
 0x1f0   : > { %2733 = vmatpush1.bf16.msra.mxu0 %v4224_v28  ;;  %v2062_v28 = vld [vmem:[#allocation3 + $0x360] sm:$0xff] }
 0x1f1   : > { %2774 = vmatpush1.bf16.msra.mxu1 %v4218_v29  ;;  %2734 = vmatprep.subr.bf16.mxu0 %v4233_v30  ;;  %v2059_v29 = vld [vmem:[#allocation3 + $0x348] sm:$0xff]  ;;  %v4289_v30 = vcombine.high %v2058_v15, %v2062_v28  ;;  %v4288_v32 = vcombine.low %v2058_v15, %v2062_v28 }
 0x1f2   : > { %2775 = vmatprep.subr.bf16.mxu1 %v4227_v31  ;;  %v2063_v31 = vld [vmem:[#allocation3 + $0x368] sm:$0xff] }
 0x1f3   : > { %v4290_v33 = vcombine.low %v2059_v29, %v2063_v31  ;;  %v4291_v34 = vcombine.high %v2059_v29, %v2063_v31 }
 0x1f4   : > { %2735 = vmatpush1.bf16.msra.mxu0 %v4232_v36  ;;  %v2070_v36 = vld [vmem:[#allocation3 + $0x3a0] sm:$0xff] }
 0x1f5   : > { %2776 = vmatpush1.bf16.msra.mxu1 %v4226_v37  ;;  %2736 = vmatprep.subr.bf16.mxu0 %v4241_v38  ;;  %v2067_v37 = vld [vmem:[#allocation3 + $0x388] sm:$0xff]  ;;  %v4297_v38 = vcombine.high %v2066_v35, %v2070_v36  ;;  %v4296_v40 = vcombine.low %v2066_v35, %v2070_v36  ;;  %v1968_v36 = vld [vmem:[#allocation3 + $0x70] sm:$0xff] }
 0x1f6   : > { %2777 = vmatprep.subr.bf16.mxu1 %v4235_v39  ;;  %v2071_v39 = vld [vmem:[#allocation3 + $0x3a8] sm:$0xff] }
 0x1f7   : > { %v4298_v41 = vcombine.low %v2067_v37, %v2071_v39  ;;  %v4299_v42 = vcombine.high %v2067_v37, %v2071_v39  ;;  %v1965_v37 = vld [vmem:[#allocation3 + $0x58] sm:$0xff] }
 0x1f8   : > { %2737 = vmatpush1.bf16.msra.mxu0 %v4240_v2  ;;  %v2078_v2 = vld [vmem:[#allocation3 + $0x3e0] sm:$0xff] }
 0x1f9   : > { %2778 = vmatpush1.bf16.msra.mxu1 %v4234_v44  ;;  %2738 = vmatprep.subr.bf16.mxu0 %v4249_v45  ;;  %v2075_v44 = vld [vmem:[#allocation3 + $0x3c8] sm:$0xff]  ;;  %v4305_v45 = vcombine.high %v2074_v43, %v2078_v2  ;;  %v4304_v47 = vcombine.low %v2074_v43, %v2078_v2  ;;  %v1972_v43 = vld [vmem:[#allocation3 + $0x90] sm:$0xff] }
 0x1fa   : > { %2779 = vmatprep.subr.bf16.mxu1 %v4243_v46  ;;  %v2079_v46 = vld [vmem:[#allocation3 + $0x3e8] sm:$0xff] }
 0x1fb   : > { %v4306_v48 = vcombine.low %v2075_v44, %v2079_v46  ;;  %v4307_v49 = vcombine.high %v2075_v44, %v2079_v46  ;;  %v1973_v46 = vld [vmem:[#allocation3 + $0x98] sm:$0xff] }
 0x1fc   : > { %2739 = vmatpush1.bf16.msra.mxu0 %v4248_v13  ;;  %v5494_v13 = vld [vmem:[#allocation3 + $0x30] sm:$0xff] }
 0x1fd   : > { %2780 = vmatpush1.bf16.msra.mxu1 %v4242_v51  ;;  %2740 = vmatprep.subr.bf16.mxu0 %v4257_v11  ;;  %v5496_v51 = vld [vmem:[#allocation3 + $0x18] sm:$0xff]  ;;  %v4189_v11 = vcombine.high %v5492_v50, %v5494_v13  ;;  %v4188_v16 = vcombine.low %v5492_v50, %v5494_v13 }
 0x1fe   : > { %2781 = vmatprep.subr.bf16.mxu1 %v4251_v14  ;;  %v5500_v14 = vld [vmem:[#allocation3 + $0x38] sm:$0xff] }
 0x1ff   : > { %v4190_v17 = vcombine.low %v5496_v51, %v5500_v14  ;;  %v4191_v18 = vcombine.high %v5496_v51, %v5500_v14  ;;  %v1984_v14 = vld [vmem:[#allocation3 + $0xf0] sm:$0xff] }
 0x200   : > { %2741 = vmatpush1.bf16.msra.mxu0 %v4256_v53  ;;  %v1907_v53 = vpop.permute.xlu0 %1906 }
 0x201   : > { %2782 = vmatpush1.bf16.msra.mxu1 %v4250_v54  ;;  %2742 = vmatprep.subr.bf16.mxu0 %v4265_v55 }
 0x202   : > { %2783 = vmatprep.subr.bf16.mxu1 %v4259_v56 }
 0x204   : > { %2743 = vmatpush1.bf16.msra.mxu0 %v4264_v61  ;;  %v1932_v5 = vpop.permute.xlu0 %1931 }
 0x205   : > { %2784 = vmatpush1.bf16.msra.mxu1 %v4258_v62  ;;  %2744 = vmatprep.subr.bf16.mxu0 %v4273_v63 }
 0x206   : > { %2785 = vmatprep.subr.bf16.mxu1 %v4267_v0 }
 0x208   : > { %2745 = vmatpush1.bf16.msra.mxu0 %v4272_v9 }
 0x209   : > { %2786 = vmatpush1.bf16.msra.mxu1 %v4266_v7  ;;  %2746 = vmatprep.subr.bf16.mxu0 %v4281_v8 }
 0x20a   : > { %2787 = vmatprep.subr.bf16.mxu1 %v4275_v10 }
 0x20c   : > { %2747 = vmatpush1.bf16.msra.mxu0 %v4280_v20 }
 0x20d   : > { %2788 = vmatpush1.bf16.msra.mxu1 %v4274_v21  ;;  %2748 = vmatprep.subr.bf16.mxu0 %v4289_v30 }
 0x20e   : > { %2789 = vmatprep.subr.bf16.mxu1 %v4283_v22 }
 0x210   : > { %2749 = vmatpush1.bf16.msra.mxu0 %v4288_v32  ;;  %v1964_v32 = vld [vmem:[#allocation3 + $0x50] sm:$0xff] }
 0x211   : > { %2790 = vmatpush1.bf16.msra.mxu1 %v4282_v23  ;;  %2750 = vmatprep.subr.bf16.mxu0 %v4297_v38  ;;  %v1969_v38 = vld [vmem:[#allocation3 + $0x78] sm:$0xff]  ;;  %v4197_v2 = vcombine.high %v1964_v32, %v1968_v36 }
 0x212   : > { %2791 = vmatprep.subr.bf16.mxu1 %v4291_v34  ;;  %v4199_v44 = vcombine.high %v1965_v37, %v1969_v38  ;;  %v4198_v50 = vcombine.low %v1965_v37, %v1969_v38 }
 0x214   : > { %2751 = vmatpush1.bf16.msra.mxu0 %v4296_v40 }
 0x215   : > { %2792 = vmatpush1.bf16.msra.mxu1 %v4290_v33  ;;  %2752 = vmatprep.subr.bf16.mxu0 %v4305_v45  ;;  %v1976_v45 = vld [vmem:[#allocation3 + $0xb0] sm:$0xff] }
 0x216   : > { %2793 = vmatprep.subr.bf16.mxu1 %v4299_v42  ;;  %v4205_v13 = vcombine.high %v1972_v43, %v1976_v45 }
 0x218   : > { %2753 = vmatpush1.bf16.msra.mxu0 %v4304_v47  ;;  %v1977_v47 = vld [vmem:[#allocation3 + $0xb8] sm:$0xff] }
 0x219   : > { %2794 = vmatpush1.bf16.msra.mxu1 %v4298_v41  ;;  %2808 = vmatprep.subr.bf16.mxu0 %v4189_v11  ;;  %v4207_v51 = vcombine.high %v1973_v46, %v1977_v47  ;;  %v1980_v11 = vld [vmem:[#allocation3 + $0xd0] sm:$0xff] }
 0x21a   : > { %2795 = vmatprep.subr.bf16.mxu1 %v4307_v49  ;;  %v4196_v49 = vcombine.low %v1964_v32, %v1968_v36  ;;  %v2024_v32 = vld [vmem:[#allocation3 + $0x230] sm:$0xff] }
 0x21d   : > { %2796 = vmatpush1.bf16.msra.mxu1 %v4306_v48 }
 0x21e   : > { %2851 = vmatprep.subr.bf16.mxu1 %v4191_v18  ;;  %v1981_v18 = vld [vmem:[#allocation3 + $0xd8] sm:$0xff] }
 0x228   : > { %v755_v24 = vpop.f32.mrb[0].mxu1 }
 0x229   : > { %v757_v25 = vpop.f32.mrb[1].mxu1 }
 0x22a   : > { %v759_v26 = vpop.f32.mrb[2].mxu1 }
 0x22b   : > { %v761_v27 = vpop.f32.mrb[3].mxu1 }
 0x2ae   : > { %v1820_v54 = vpop.f32.mrb[0].mxu0 }
 0x2af   : > { %v4443_v55 = vadd.f32 %v1820_v54, %v755_v24  ;;  %v1822_v56 = vpop.f32.mrb[1].mxu0  ;;  %v4206_v54 = vcombine.low %v1973_v46, %v1977_v47 }
 0x2b0   : > { %v4444_v57 = vadd.f32 %v1822_v56, %v757_v25  ;;  %v1824_v58 = vpop.f32.mrb[2].mxu0  ;;  %v1992_v56 = vld [vmem:[#allocation3 + $0x130] sm:$0xff] }
 0x2b1   : > { %v4445_v60 = vadd.f32 %v1824_v58, %v759_v26  ;;  %v1914_v61 = vmul.f32 %v4443_v55, %v1907_v53  ;;  %v1826_v62 = vpop.f32.mrb[3].mxu0  ;;  %v1988_v55 = vld [vmem:[#allocation3 + $0x110] sm:$0xff]  ;;  %v1993_v58 = vld [vmem:[#allocation3 + $0x138] sm:$0xff] }
 0x2b2   : > { %v1915_v63 = vmul.f32 %v4444_v57, %v1907_v53  ;;  %v4446_v0 = vadd.f32 %v1826_v62, %v761_v27  ;;  %v1989_v57 = vld [vmem:[#allocation3 + $0x118] sm:$0xff] }
 0x2b3   : > { %v1916_v3 = vmul.f32 %v4445_v60, %v1912_v59  ;;  %v1885_v4 = vpop.f32.mrb[4].mxu1  ;;  %v1934_v7 = vadd.f32 %v1927_v52, %v1914_v61  ;;  %v4221_v61 = vcombine.high %v1988_v55, %v1992_v56  ;;  %v4223_v62 = vcombine.high %v1989_v57, %v1993_v58 }
 0x2b4   : > { %v1917_v6 = vmul.f32 %v4446_v0, %v1912_v59  ;;  %v1918_v9 = vmul.f32 %v1907_v53, %v1885_v4  ;;  %v1887_v8 = vpop.f32.mrb[5].mxu1  ;;  %v1935_v12 = vadd.f32 %v1927_v52, %v1915_v63  ;;  %v1996_v63 = vld [vmem:[#allocation3 + $0x150] sm:$0xff]  ;;  %v2001_v4 = vld [vmem:[#allocation3 + $0x178] sm:$0xff] }
 0x2b5   : > { %v1919_v10 = vmul.f32 %v1907_v53, %v1887_v8  ;;  %v1889_v19 = vpop.f32.mrb[6].mxu1  ;;  %v1936_v21 = vadd.f32 %v1932_v5, %v1916_v3  ;;  %v1942_v15 = vmax.f32 %v1934_v7, 0.0  ;;  %v4204_v53 = vcombine.low %v1972_v43, %v1976_v45  ;;  %v2000_v0 = vld [vmem:[#allocation3 + $0x170] sm:$0xff]  ;;  %v1997_v3 = vld [vmem:[#allocation3 + $0x158] sm:$0xff] }
 0x2b6   : > { %v1938_v20 = vadd.f32 %v1927_v52, %v1918_v9  ;;  %v1920_v22 = vmul.f32 %v1912_v59, %v1889_v19  ;;  %v1891_v23 = vpop.f32.mrb[7].mxu1  ;;  %v1937_v25 = vadd.f32 %v1932_v5, %v1917_v6  ;;  %v1943_v29 = vmax.f32 %v1935_v12, 0.0  ;;  %v2004_v8 = vld [vmem:[#allocation3 + $0x190] sm:$0xff]  ;;  %v2005_v12 = vld [vmem:[#allocation3 + $0x198] sm:$0xff] }
 0x2b7   : > { %v1939_v24 = vadd.f32 %v1927_v52, %v1919_v10  ;;  %v1921_v26 = vmul.f32 %v1912_v59, %v1891_v23  ;;  %v1944_v34 = vmax.f32 %v1936_v21, 0.0  ;;  %v1985_v52 = vld [vmem:[#allocation3 + $0xf8] sm:$0xff]  ;;  %v4212_v59 = vcombine.low %v1980_v11, %v1984_v14  ;;  %v2008_v10 = vld [vmem:[#allocation3 + $0x1b0] sm:$0xff] }
 0x2b8   : > { %v1946_v28 = vmax.f32 %v1938_v20, 0.0  ;;  %v1940_v27 = vadd.f32 %v1932_v5, %v1920_v22  ;;  %v1945_v41 = vmax.f32 %v1937_v25, 0.0  ;;  %v4214_v60 = vcombine.low %v1981_v18, %v1985_v52  ;;  %v2009_v19 = vld [vmem:[#allocation3 + $0x1b8] sm:$0xff]  ;;  %v2016_v25 = vld [vmem:[#allocation3 + $0x1f0] sm:$0xff] }
 0x2b9   : > { %v1947_v30 = vmax.f32 %v1939_v24, 0.0  ;;  %v1941_v31 = vadd.f32 %v1932_v5, %v1921_v26  ;;  %v4220_v5 = vcombine.low %v1988_v55, %v1992_v56  ;;  %v4222_v6 = vcombine.low %v1989_v57, %v1993_v58  ;;  %v2012_v24 = vld [vmem:[#allocation3 + $0x1d0] sm:$0xff]  ;;  %v2013_v26 = vld [vmem:[#allocation3 + $0x1d8] sm:$0xff] }
 0x2ba   : > { %v5508_v33 = vpack.c.bf16 %v1946_v28, %v1942_v15  ;;  %v1948_v35 = vmax.f32 %v1940_v27, 0.0  ;;  %v4229_v9 = vcombine.high %v1996_v63, %v2000_v0  ;;  %v4231_v7 = vcombine.high %v1997_v3, %v2001_v4  ;;  %v2017_v15 = vld [vmem:[#allocation3 + $0x1f8] sm:$0xff] }
 0x2bb   : > { %v1951_v39 = vpack.c.bf16 %v1947_v30, %v1943_v29  ;;  %v1949_v40 = vmax.f32 %v1941_v31, 0.0  ;;  %v4228_v20 = vcombine.low %v1996_v63, %v2000_v0  ;;  %v4230_v21 = vcombine.low %v1997_v3, %v2001_v4  ;;  %v2020_v31 = vld [vmem:[#allocation3 + $0x210] sm:$0xff]  ;;  %v2029_v43 = vld [vmem:[#allocation3 + $0x258] sm:$0xff] }
 0x2bc   : > { %v5510_v42 = vpack.c.bf16 %v1948_v35, %v1944_v34  ;;  %v4237_v22 = vcombine.high %v2004_v8, %v2008_v10  ;;  %v4239_v23 = vcombine.high %v2005_v12, %v2009_v19  ;;  %v4236_v28 = vcombine.low %v2004_v8, %v2008_v10  ;;  %v2021_v34 = vld [vmem:[#allocation3 + $0x218] sm:$0xff] }
 0x2bd   : > { %2754 = vmatprep.mubr.bf16.mxu0 %v1951_v39  ;;  %2797 = vmatprep.mubr.bf16.mxu1 %v1951_v39  ;;  %v5512_v48 = vpack.c.bf16 %v1949_v40, %v1945_v41  ;;  %v4238_v27 = vcombine.low %v2005_v12, %v2009_v19  ;;  %v4245_v29 = vcombine.high %v2012_v24, %v2016_v25  ;;  %v2025_v35 = vld [vmem:[#allocation3 + $0x238] sm:$0xff]  ;;  %v2028_v40 = vld [vmem:[#allocation3 + $0x250] sm:$0xff] }
 0x2be   : > { %2755 = vmatmul.mubr.bf16.vlgmr.msra.gmra.mrb[4].mxu0 %v5508_v33  ;;  %2798 = vmatmul.mubr.bf16.vlgmr.msra.gmra.mrb[8].mxu1 %v5508_v33  ;;  %v4247_v30 = vcombine.high %v2013_v26, %v2017_v15  ;;  %v4244_v36 = vcombine.low %v2012_v24, %v2016_v25  ;;  %v4246_v37 = vcombine.low %v2013_v26, %v2017_v15  ;;  %v2032_v41 = vld [vmem:[#allocation3 + $0x270] sm:$0xff] }
 0x2bf   : > { %2809 = vmatpush1.bf16.msra.mxu0 %v4188_v16  ;;  %2852 = vmatpush1.bf16.msra.mxu1 %v4190_v17  ;;  %v4213_v16 = vcombine.high %v1980_v11, %v1984_v14  ;;  %v4215_v17 = vcombine.high %v1981_v18, %v1985_v52  ;;  %v4253_v38 = vcombine.high %v2020_v31, %v2024_v32 }
 0x2c0   : > { %2840 = vmatprep.mubr.bf16.mxu0 %v1951_v39  ;;  %2883 = vmatprep.mubr.bf16.mxu1 %v1951_v39  ;;  %v4255_v39 = vcombine.high %v2021_v34, %v2025_v35  ;;  %v4254_v45 = vcombine.low %v2021_v34, %v2025_v35  ;;  %v4261_v46 = vcombine.high %v2028_v40, %v2032_v41 }
 0x2c1   : > { %2810 = vmatprep.subr.bf16.mxu0 %v4197_v2  ;;  %2853 = vmatprep.subr.bf16.mxu1 %v4199_v44  ;;  %v2033_v2 = vld [vmem:[#allocation3 + $0x278] sm:$0xff]  ;;  %v4252_v44 = vcombine.low %v2020_v31, %v2024_v32  ;;  %v4260_v11 = vcombine.low %v2028_v40, %v2032_v41  ;;  %v4609_v40 = vld [vmem:[#allocation6] ss:$20 sps:$4 sm:$0xff]  }
 0x2c2   : > { %v4263_v47 = vcombine.high %v2029_v43, %v2033_v2  ;;  %v4262_v14 = vcombine.low %v2029_v43, %v2033_v2  ;;  %v4612_v41 = vld [vmem:[#allocation6 + $0x8] ss:$20 sps:$4 sm:$0xff]   ;;  %v4617_v43 = vld [vmem:[#allocation6 + $0x2c] ss:$20 sps:$4 sm:$0xff]  }
 0x2c3   : > { %2811 = vmatpush1.bf16.msra.mxu0 %v4196_v49  ;;  %2854 = vmatpush1.bf16.msra.mxu1 %v4198_v50  ;;  %v2036_v49 = vld [vmem:[#allocation3 + $0x290] sm:$0xff] }
 0x2c4   : > { %2812 = vmatprep.subr.bf16.mxu0 %v4205_v13  ;;  %2855 = vmatprep.subr.bf16.mxu1 %v4207_v51  ;;  %v2040_v50 = vld [vmem:[#allocation3 + $0x2b0] sm:$0xff]  ;;  %v2037_v13 = vld [vmem:[#allocation3 + $0x298] sm:$0xff] }
 0x2c5   : > { %v2041_v51 = vld [vmem:[#allocation3 + $0x2b8] sm:$0xff]  ;;  %v4269_v18 = vcombine.high %v2036_v49, %v2040_v50  ;;  %v4268_v55 = vcombine.low %v2036_v49, %v2040_v50  ;;  %v4620_v2 = vld [vmem:[#allocation6 + $0x34] ss:$20 sps:$4 sm:$0xff]   ;;  %v4621_v49 = vld [vmem:[#allocation6 + $0x50] ss:$20 sps:$4 sm:$0xff]  }
 0x2c6   : > { %v4271_v52 = vcombine.high %v2037_v13, %v2041_v51  ;;  %v4270_v56 = vcombine.low %v2037_v13, %v2041_v51  ;;  %v4624_v50 = vld [vmem:[#allocation6 + $0x58] ss:$20 sps:$4 sm:$0xff]   ;;  %v4629_v13 = vld [vmem:[#allocation6 + $0x7c] ss:$20 sps:$4 sm:$0xff]  }
 0x2c7   : > { %2813 = vmatpush1.bf16.msra.mxu0 %v4204_v53  ;;  %2856 = vmatpush1.bf16.msra.mxu1 %v4206_v54  ;;  %v2044_v53 = vld [vmem:[#allocation3 + $0x2d0] sm:$0xff]  ;;  %v4627_v51 = vld [vmem:[#allocation6 + $0x78] ss:$20 sps:$4 sm:$0xff]  }
 0x2c8   : > { %2814 = vmatprep.subr.bf16.mxu0 %v4213_v16  ;;  %2857 = vmatprep.subr.bf16.mxu1 %v4215_v17  ;;  %v2048_v54 = vld [vmem:[#allocation3 + $0x2f0] sm:$0xff]  ;;  %v2045_v16 = vld [vmem:[#allocation3 + $0x2d8] sm:$0xff] }
 0x2c9   : > { %v2049_v17 = vld [vmem:[#allocation3 + $0x2f8] sm:$0xff]  ;;  %v4277_v57 = vcombine.high %v2044_v53, %v2048_v54  ;;  %v4276_v63 = vcombine.low %v2044_v53, %v2048_v54  ;;  %v4641_v54 = vld [vmem:[#allocation6 + $0xcc] ss:$20 sps:$4 sm:$0xff]  }
 0x2ca   : > { %v4279_v58 = vcombine.high %v2045_v16, %v2049_v17  ;;  %v4278_v0 = vcombine.low %v2045_v16, %v2049_v17  ;;  %v4636_v53 = vld [vmem:[#allocation6 + $0xa8] ss:$20 sps:$4 sm:$0xff]  }
 0x2cb   : > { %2815 = vmatpush1.bf16.msra.mxu0 %v4212_v59  ;;  %2858 = vmatpush1.bf16.msra.mxu1 %v4214_v60  ;;  %v2052_v59 = vld [vmem:[#allocation3 + $0x310] sm:$0xff]  ;;  %v4639_v17 = vld [vmem:[#allocation6 + $0xc8] ss:$20 sps:$4 sm:$0xff]  }
 0x2cc   : > { %2816 = vmatprep.subr.bf16.mxu0 %v4221_v61  ;;  %2859 = vmatprep.subr.bf16.mxu1 %v4223_v62  ;;  %v2056_v60 = vld [vmem:[#allocation3 + $0x330] sm:$0xff]  ;;  %v2053_v61 = vld [vmem:[#allocation3 + $0x318] sm:$0xff] }
 0x2cd   : > { %v2057_v62 = vld [vmem:[#allocation3 + $0x338] sm:$0xff]  ;;  %v4285_v3 = vcombine.high %v2052_v59, %v2056_v60  ;;  %v4284_v8 = vcombine.low %v2052_v59, %v2056_v60  ;;  %v4644_v16 = vld [vmem:[#allocation6 + $0xd4] ss:$20 sps:$4 sm:$0xff]  }
 0x2ce   : > { %v4287_v4 = vcombine.high %v2053_v61, %v2057_v62  ;;  %v4286_v10 = vcombine.low %v2053_v61, %v2057_v62  ;;  %v4648_v59 = vld [vmem:[#allocation6 + $0xf8] ss:$20 sps:$4 sm:$0xff]   ;;  %v4653_v60 = vld [vmem:[#allocation6 + $0x11c] ss:$20 sps:$4 sm:$0xff]  }
 0x2cf   : > { %2817 = vmatpush1.bf16.msra.mxu0 %v4220_v5  ;;  %2860 = vmatpush1.bf16.msra.mxu1 %v4222_v6  ;;  %v2060_v5 = vld [vmem:[#allocation3 + $0x350] sm:$0xff]  ;;  %v4656_v61 = vld [vmem:[#allocation6 + $0x124] ss:$20 sps:$4 sm:$0xff]  }
 0x2d0   : > { %2818 = vmatprep.subr.bf16.mxu0 %v4229_v9  ;;  %2861 = vmatprep.subr.bf16.mxu1 %v4231_v7  ;;  %v2064_v6 = vld [vmem:[#allocation3 + $0x370] sm:$0xff]  ;;  %v2061_v9 = vld [vmem:[#allocation3 + $0x358] sm:$0xff] }
 0x2d1   : > { %v2065_v7 = vld [vmem:[#allocation3 + $0x378] sm:$0xff]  ;;  %v4293_v12 = vcombine.high %v2060_v5, %v2064_v6  ;;  %v4292_v24 = vcombine.low %v2060_v5, %v2064_v6  ;;  %v4665_v6 = vld [vmem:[#allocation6 + $0x16c] ss:$20 sps:$4 sm:$0xff]  }
 0x2d2   : > { %v4295_v19 = vcombine.high %v2061_v9, %v2065_v7  ;;  %v4294_v25 = vcombine.low %v2061_v9, %v2065_v7  ;;  %v4651_v62 = vld [vmem:[#allocation6 + $0x118] ss:$20 sps:$4 sm:$0xff]   ;;  %v4660_v5 = vld [vmem:[#allocation6 + $0x148] ss:$20 sps:$4 sm:$0xff]  }
 0x2d3   : > { %2819 = vmatpush1.bf16.msra.mxu0 %v4228_v20  ;;  %2862 = vmatpush1.bf16.msra.mxu1 %v4230_v21  ;;  %v2068_v20 = vld [vmem:[#allocation3 + $0x390] sm:$0xff]  ;;  %v4663_v7 = vld [vmem:[#allocation6 + $0x168] ss:$20 sps:$4 sm:$0xff]  }
 0x2d4   : > { %2820 = vmatprep.subr.bf16.mxu0 %v4237_v22  ;;  %2863 = vmatprep.subr.bf16.mxu1 %v4239_v23  ;;  %v2072_v21 = vld [vmem:[#allocation3 + $0x3b0] sm:$0xff]  ;;  %v2069_v22 = vld [vmem:[#allocation3 + $0x398] sm:$0xff] }
 0x2d5   : > { %v2073_v23 = vld [vmem:[#allocation3 + $0x3b8] sm:$0xff]  ;;  %v4301_v26 = vcombine.high %v2068_v20, %v2072_v21  ;;  %v4300_v31 = vcombine.low %v2068_v20, %v2072_v21  ;;  %v4668_v9 = vld [vmem:[#allocation6 + $0x174] ss:$20 sps:$4 sm:$0xff]  }
 0x2d6   : > { %v4303_v15 = vcombine.high %v2069_v22, %v2073_v23  ;;  %v4302_v32 = vcombine.low %v2069_v22, %v2073_v23  ;;  %v4672_v20 = vld [vmem:[#allocation6 + $0x198] ss:$20 sps:$4 sm:$0xff]   ;;  %v4677_v21 = vld [vmem:[#allocation6 + $0x1bc] ss:$20 sps:$4 sm:$0xff]  }
 0x2d7   : > { %2821 = vmatpush1.bf16.msra.mxu0 %v4236_v28  ;;  %2864 = vmatpush1.bf16.msra.mxu1 %v4238_v27  ;;  %v2076_v28 = vld [vmem:[#allocation3 + $0x3d0] sm:$0xff]  ;;  %v4680_v22 = vld [vmem:[#allocation6 + $0x1c4] ss:$20 sps:$4 sm:$0xff]  }
 0x2d8   : > { %2822 = vmatprep.subr.bf16.mxu0 %v4245_v29  ;;  %2865 = vmatprep.subr.bf16.mxu1 %v4247_v30  ;;  %v2080_v27 = vld [vmem:[#allocation3 + $0x3f0] sm:$0xff]  ;;  %v2077_v29 = vld [vmem:[#allocation3 + $0x3d8] sm:$0xff] }
 0x2d9   : > { %v2081_v30 = vld [vmem:[#allocation3 + $0x3f8] sm:$0xff]  ;;  %v4309_v34 = vcombine.high %v2076_v28, %v2080_v27 }
 0x2da   : > { %v4311_v35 = vcombine.high %v2077_v29, %v2081_v30  ;;  %v4675_v23 = vld [vmem:[#allocation6 + $0x1b8] ss:$20 sps:$4 sm:$0xff]  }
 0x2db   : > { %2823 = vmatpush1.bf16.msra.mxu0 %v4244_v36  ;;  %2866 = vmatpush1.bf16.msra.mxu1 %v4246_v37  ;;  %v4308_v36 = vcombine.low %v2076_v28, %v2080_v27  ;;  %v4310_v37 = vcombine.low %v2077_v29, %v2081_v30  ;;  %v4684_v28 = vld [vmem:[#allocation6 + $0x1e8] ss:$20 sps:$4 sm:$0xff]   ;;  %v4689_v27 = vld [vmem:[#allocation6 + $0x20c] ss:$20 sps:$4 sm:$0xff]  }
 0x2dc   : > { %2824 = vmatprep.subr.bf16.mxu0 %v4253_v38  ;;  %2867 = vmatprep.subr.bf16.mxu1 %v4255_v39  ;;  %v4611_v38 = vld [vmem:[#allocation6 + $0x4] ss:$20 sps:$4 sm:$0xff]   ;;  %v4614_v39 = vld [vmem:[#allocation6 + $0xc] ss:$20 sps:$4 sm:$0xff]   ;;  %v4692_v29 = vld [vmem:[#allocation6 + $0x214] ss:$20 sps:$4 sm:$0xff]  }
 0x2dd   : > { %v4687_v30 = vld [vmem:[#allocation6 + $0x208] ss:$20 sps:$4 sm:$0xff]  }
 0x2df   : > { %2825 = vmatpush1.bf16.msra.mxu0 %v4252_v44  ;;  %2868 = vmatpush1.bf16.msra.mxu1 %v4254_v45  ;;  %v4615_v44 = vld [vmem:[#allocation6 + $0x28] ss:$20 sps:$4 sm:$0xff]   ;;  %v4618_v45 = vld [vmem:[#allocation6 + $0x30] ss:$20 sps:$4 sm:$0xff]  }
 0x2e0   : > { %2826 = vmatprep.subr.bf16.mxu0 %v4261_v46  ;;  %2869 = vmatprep.subr.bf16.mxu1 %v4263_v47  ;;  %v4623_v46 = vld [vmem:[#allocation6 + $0x54] ss:$20 sps:$4 sm:$0xff]   ;;  %v4626_v47 = vld [vmem:[#allocation6 + $0x5c] ss:$20 sps:$4 sm:$0xff]  }
 0x2e3   : > { %2827 = vmatpush1.bf16.msra.mxu0 %v4260_v11  ;;  %2870 = vmatpush1.bf16.msra.mxu1 %v4262_v14  ;;  %v4630_v11 = vld [vmem:[#allocation6 + $0x80] ss:$20 sps:$4 sm:$0xff]   ;;  %v4635_v14 = vld [vmem:[#allocation6 + $0xa4] ss:$20 sps:$4 sm:$0xff]  }
 0x2e4   : > { %2828 = vmatprep.subr.bf16.mxu0 %v4269_v18  ;;  %2871 = vmatprep.subr.bf16.mxu1 %v4271_v52  ;;  %v4638_v18 = vld [vmem:[#allocation6 + $0xac] ss:$20 sps:$4 sm:$0xff]  }
 0x2e5   : > { %v4633_v52 = vld [vmem:[#allocation6 + $0xa0] ss:$20 sps:$4 sm:$0xff]  }
 0x2e7   : > { %2829 = vmatpush1.bf16.msra.mxu0 %v4268_v55  ;;  %2872 = vmatpush1.bf16.msra.mxu1 %v4270_v56  ;;  %v4642_v55 = vld [vmem:[#allocation6 + $0xd0] ss:$20 sps:$4 sm:$0xff]   ;;  %v4647_v56 = vld [vmem:[#allocation6 + $0xf4] ss:$20 sps:$4 sm:$0xff]  }
 0x2e8   : > { %2830 = vmatprep.subr.bf16.mxu0 %v4277_v57  ;;  %2873 = vmatprep.subr.bf16.mxu1 %v4279_v58  ;;  %v4650_v57 = vld [vmem:[#allocation6 + $0xfc] ss:$20 sps:$4 sm:$0xff]  }
 0x2e9   : > { %v4645_v58 = vld [vmem:[#allocation6 + $0xf0] ss:$20 sps:$4 sm:$0xff]  }
 0x2eb   : > { %2831 = vmatpush1.bf16.msra.mxu0 %v4276_v63  ;;  %2874 = vmatpush1.bf16.msra.mxu1 %v4278_v0  ;;  %v4654_v63 = vld [vmem:[#allocation6 + $0x120] ss:$20 sps:$4 sm:$0xff]   ;;  %v4659_v0 = vld [vmem:[#allocation6 + $0x144] ss:$20 sps:$4 sm:$0xff]  }
 0x2ec   : > { %2832 = vmatprep.subr.bf16.mxu0 %v4285_v3  ;;  %2875 = vmatprep.subr.bf16.mxu1 %v4287_v4  ;;  %v4662_v3 = vld [vmem:[#allocation6 + $0x14c] ss:$20 sps:$4 sm:$0xff]  }
 0x2ed   : > { %v4657_v4 = vld [vmem:[#allocation6 + $0x140] ss:$20 sps:$4 sm:$0xff]  }
 0x2ef   : > { %2833 = vmatpush1.bf16.msra.mxu0 %v4284_v8  ;;  %2876 = vmatpush1.bf16.msra.mxu1 %v4286_v10  ;;  %v4666_v8 = vld [vmem:[#allocation6 + $0x170] ss:$20 sps:$4 sm:$0xff]   ;;  %v4671_v10 = vld [vmem:[#allocation6 + $0x194] ss:$20 sps:$4 sm:$0xff]  }
 0x2f0   : > { %2834 = vmatprep.subr.bf16.mxu0 %v4293_v12  ;;  %2877 = vmatprep.subr.bf16.mxu1 %v4295_v19  ;;  %v4674_v12 = vld [vmem:[#allocation6 + $0x19c] ss:$20 sps:$4 sm:$0xff]  }
 0x2f1   : > { %v4669_v19 = vld [vmem:[#allocation6 + $0x190] ss:$20 sps:$4 sm:$0xff]  }
 0x2f3   : > { %2835 = vmatpush1.bf16.msra.mxu0 %v4292_v24  ;;  %2878 = vmatpush1.bf16.msra.mxu1 %v4294_v25  ;;  %v4678_v24 = vld [vmem:[#allocation6 + $0x1c0] ss:$20 sps:$4 sm:$0xff]   ;;  %v4683_v25 = vld [vmem:[#allocation6 + $0x1e4] ss:$20 sps:$4 sm:$0xff]  }
 0x2f4   : > { %2836 = vmatprep.subr.bf16.mxu0 %v4301_v26  ;;  %2879 = vmatprep.subr.bf16.mxu1 %v4303_v15  ;;  %v4686_v26 = vld [vmem:[#allocation6 + $0x1ec] ss:$20 sps:$4 sm:$0xff]  }
 0x2f5   : > { %v4681_v15 = vld [vmem:[#allocation6 + $0x1e0] ss:$20 sps:$4 sm:$0xff]  }
 0x2f7   : > { %2837 = vmatpush1.bf16.msra.mxu0 %v4300_v31  ;;  %2880 = vmatpush1.bf16.msra.mxu1 %v4302_v32  ;;  %v4690_v31 = vld [vmem:[#allocation6 + $0x210] ss:$20 sps:$4 sm:$0xff]   ;;  %v4695_v32 = vld [vmem:[#allocation6 + $0x234] ss:$20 sps:$4 sm:$0xff]  }
 0x2f8   : > { %2838 = vmatprep.subr.bf16.mxu0 %v4309_v34  ;;  %2881 = vmatprep.subr.bf16.mxu1 %v4311_v35  ;;  %v4698_v34 = vld [vmem:[#allocation6 + $0x23c] ss:$20 sps:$4 sm:$0xff]  }
 0x2f9   : > { %v4693_v35 = vld [vmem:[#allocation6 + $0x230] ss:$20 sps:$4 sm:$0xff]  }
 0x2fb   : > { %2839 = vmatpush1.bf16.msra.mxu0 %v4308_v36  ;;  %2882 = vmatpush1.bf16.msra.mxu1 %v4310_v37  ;;  %v4696_v36 = vld [vmem:[#allocation6 + $0x238] ss:$20 sps:$4 sm:$0xff]   ;;  %v4701_v37 = vld [vmem:[#allocation6 + $0x25c] ss:$20 sps:$4 sm:$0xff]  }
 0x2fc   : > { %3406 = vmatprep.subr.bf16.mxu0 %v4611_v38  ;;  %3449 = vmatprep.subr.bf16.mxu1 %v4614_v39  ;;  %v4704_v38 = vld [vmem:[#allocation6 + $0x264] ss:$20 sps:$4 sm:$0xff]  }
 0x2fd   : > { %v4699_v39 = vld [vmem:[#allocation6 + $0x258] ss:$20 sps:$4 sm:$0xff]  }
 0x2fe   : > { %2841 = vmatmul.mubr.bf16.vlgmr.msra.gmra.mrb[8].mxu0 %v5508_v33  ;;  %2884 = vmatmul.mubr.bf16.vlgmr.msra.gmra.mrb[12].mxu1 %v5508_v33  ;;  %v4632_v33 = vld [vmem:[#allocation6 + $0x84] ss:$20 sps:$4 sm:$0xff]  }
 0x2ff   : > { %3407 = vmatpush1.bf16.msra.mxu0 %v4609_v40  ;;  %3438 = vmatprep.mubr.bf16.mxu0 %v5512_v48  ;;  %v4702_v40 = vld [vmem:[#allocation6 + $0x260] ss:$20 sps:$4 sm:$0xff]  }
 0x300   : > { %3450 = vmatpush1.bf16.msra.mxu1 %v4612_v41  ;;  %3481 = vmatprep.mubr.bf16.mxu1 %v5512_v48  ;;  %v4705_v41 = vld [vmem:[#allocation6 + $0x150] ss:$20 sps:$4 sm:$0xff]  }
 0x301   : > { %3408 = vmatprep.subr.bf16.mxu0 %v4617_v43  ;;  %3451 = vmatprep.subr.bf16.mxu1 %v4620_v2  ;;  %v4706_v43 = vld [vmem:[#allocation6 + $0x10] ss:$20 sps:$4 sm:$0xff]   ;;  %v4707_v2 = vld [vmem:[#allocation6 + $0x178] ss:$20 sps:$4 sm:$0xff]  }
 0x303   : > { %3409 = vmatpush1.bf16.msra.mxu0 %v4615_v44  ;;  %v4708_v44 = vld [vmem:[#allocation6 + $0x38] ss:$20 sps:$4 sm:$0xff]  }
 0x304   : > { %3452 = vmatpush1.bf16.msra.mxu1 %v4618_v45  ;;  %3410 = vmatprep.subr.bf16.mxu0 %v4623_v46  ;;  %v4709_v45 = vld [vmem:[#allocation6 + $0x1a0] ss:$20 sps:$4 sm:$0xff]  }
 0x305   : > { %3453 = vmatprep.subr.bf16.mxu1 %v4626_v47  ;;  %v4710_v46 = vld [vmem:[#allocation6 + $0x60] ss:$20 sps:$4 sm:$0xff]   ;;  %v4711_v47 = vld [vmem:[#allocation6 + $0x1c8] ss:$20 sps:$4 sm:$0xff]  }
 0x307   : > { %3411 = vmatpush1.bf16.msra.mxu0 %v4621_v49  ;;  %v4712_v49 = vld [vmem:[#allocation6 + $0x88] ss:$20 sps:$4 sm:$0xff]  }
 0x308   : > { %3454 = vmatpush1.bf16.msra.mxu1 %v4624_v50  ;;  %3412 = vmatprep.subr.bf16.mxu0 %v4629_v13  ;;  %v4713_v50 = vld [vmem:[#allocation6 + $0x1f0] ss:$20 sps:$4 sm:$0xff]  }
 0x309   : > { %3455 = vmatprep.subr.bf16.mxu1 %v4632_v33  ;;  %v4714_v13 = vld [vmem:[#allocation6 + $0xb0] ss:$20 sps:$4 sm:$0xff]   ;;  %v4715_v33 = vld [vmem:[#allocation6 + $0x218] ss:$20 sps:$4 sm:$0xff]  }
 0x30b   : > { %3413 = vmatpush1.bf16.msra.mxu0 %v4627_v51  ;;  %v4716_v51 = vld [vmem:[#allocation6 + $0xd8] ss:$20 sps:$4 sm:$0xff]  }
 0x30c   : > { %3456 = vmatpush1.bf16.msra.mxu1 %v4630_v11  ;;  %3414 = vmatprep.subr.bf16.mxu0 %v4635_v14  ;;  %v4717_v11 = vld [vmem:[#allocation6 + $0x240] ss:$20 sps:$4 sm:$0xff]   ;;  %v4719_v14 = vld [vmem:[#allocation6 + $0x268] ss:$20 sps:$4 sm:$0xff]  }
 0x30d   : > { %3457 = vmatprep.subr.bf16.mxu1 %v4638_v18  ;;  %v4720_v18 = vld [vmem:[#allocation6 + $0x128] ss:$20 sps:$4 sm:$0xff]  }
 0x30f   : > { %3415 = vmatpush1.bf16.msra.mxu0 %v4633_v52 }
 0x310   : > { %3458 = vmatpush1.bf16.msra.mxu1 %v4636_v53  ;;  %3416 = vmatprep.subr.bf16.mxu0 %v4641_v54 }
 0x311   : > { %3459 = vmatprep.subr.bf16.mxu1 %v4644_v16 }
 0x313   : > { %3417 = vmatpush1.bf16.msra.mxu0 %v4639_v17 }
 0x314   : > { %3460 = vmatpush1.bf16.msra.mxu1 %v4642_v55  ;;  %3418 = vmatprep.subr.bf16.mxu0 %v4647_v56 }
 0x315   : > { %3461 = vmatprep.subr.bf16.mxu1 %v4650_v57 }
 0x317   : > { %3419 = vmatpush1.bf16.msra.mxu0 %v4645_v58 }
 0x318   : > { %3462 = vmatpush1.bf16.msra.mxu1 %v4648_v59  ;;  %3420 = vmatprep.subr.bf16.mxu0 %v4653_v60 }
 0x319   : > { %3463 = vmatprep.subr.bf16.mxu1 %v4656_v61 }
 0x31b   : > { %3421 = vmatpush1.bf16.msra.mxu0 %v4651_v62 }
 0x31c   : > { %3464 = vmatpush1.bf16.msra.mxu1 %v4654_v63  ;;  %3422 = vmatprep.subr.bf16.mxu0 %v4659_v0 }
 0x31d   : > { %3465 = vmatprep.subr.bf16.mxu1 %v4662_v3 }
 0x31f   : > { %3423 = vmatpush1.bf16.msra.mxu0 %v4657_v4 }
 0x320   : > { %3466 = vmatpush1.bf16.msra.mxu1 %v4660_v5  ;;  %3424 = vmatprep.subr.bf16.mxu0 %v4665_v6 }
 0x321   : > { %3467 = vmatprep.subr.bf16.mxu1 %v4668_v9 }
 0x323   : > { %3425 = vmatpush1.bf16.msra.mxu0 %v4663_v7 }
 0x324   : > { %3468 = vmatpush1.bf16.msra.mxu1 %v4666_v8  ;;  %3426 = vmatprep.subr.bf16.mxu0 %v4671_v10 }
 0x325   : > { %3469 = vmatprep.subr.bf16.mxu1 %v4674_v12 }
 0x327   : > { %3427 = vmatpush1.bf16.msra.mxu0 %v4669_v19 }
 0x328   : > { %3470 = vmatpush1.bf16.msra.mxu1 %v4672_v20  ;;  %3428 = vmatprep.subr.bf16.mxu0 %v4677_v21 }
 0x329   : > { %3471 = vmatprep.subr.bf16.mxu1 %v4680_v22 }
 0x32b   : > { %3429 = vmatpush1.bf16.msra.mxu0 %v4675_v23 }
 0x32c   : > { %3472 = vmatpush1.bf16.msra.mxu1 %v4678_v24  ;;  %3430 = vmatprep.subr.bf16.mxu0 %v4683_v25 }
 0x32d   : > { %3473 = vmatprep.subr.bf16.mxu1 %v4686_v26 }
 0x32f   : > { %3431 = vmatpush1.bf16.msra.mxu0 %v4681_v15 }
 0x330   : > { %3474 = vmatpush1.bf16.msra.mxu1 %v4684_v28  ;;  %3432 = vmatprep.subr.bf16.mxu0 %v4689_v27 }
 0x331   : > { %3475 = vmatprep.subr.bf16.mxu1 %v4692_v29 }
 0x333   : > { %3433 = vmatpush1.bf16.msra.mxu0 %v4687_v30 }
 0x334   : > { %3476 = vmatpush1.bf16.msra.mxu1 %v4690_v31  ;;  %3434 = vmatprep.subr.bf16.mxu0 %v4695_v32 }
 0x335   : > { %3477 = vmatprep.subr.bf16.mxu1 %v4698_v34 }
 0x337   : > { %3435 = vmatpush1.bf16.msra.mxu0 %v4693_v35 }
 0x338   : > { %3478 = vmatpush1.bf16.msra.mxu1 %v4696_v36  ;;  %3436 = vmatprep.subr.bf16.mxu0 %v4701_v37 }
 0x339   : > { %3479 = vmatprep.subr.bf16.mxu1 %v4704_v38  ;;  %v3554_v38 = vld [vmem:[%s5772_s6] sm:$0xff] }
 0x33b   : > { %3437 = vmatpush1.bf16.msra.mxu0 %v4699_v39 }
 0x33c   : > { %3480 = vmatpush1.bf16.msra.mxu1 %v4702_v40  ;;  %4421 = vmatprep.subr.bf16.mxu0 %v4705_v41 }
 0x33e   : > { %3439 = vmatmul.mubr.bf16.vlgmr.msra.gmra.mrb[12].mxu0 %v5510_v42 }
 0x33f   : > { %3482 = vmatmul.mubr.bf16.vlgmr.msra.gmra.mrb[16].mxu1 %v5510_v42  ;;  %4422 = vmatpush3.bf16.msra.mxu0 %v4706_v43 }
 0x340   : > { %3524 = vmatprep.mubr.bf16.mxu0 %v5512_v48  ;;  %4423 = vmatprep.subr.bf16.mxu0 %v4707_v2  ;;  %v4718_v48 = vld [vmem:[#allocation6 + $0x100] ss:$20 sps:$4 sm:$0xff]  }
 0x343   : > { %4424 = vmatpush3.bf16.msra.mxu0 %v4708_v44 }
 0x344   : > { %4425 = vmatprep.subr.bf16.mxu0 %v4709_v45 }
 0x347   : > { %4426 = vmatpush3.bf16.msra.mxu0 %v4710_v46 }
 0x348   : > { %4427 = vmatprep.subr.bf16.mxu0 %v4711_v47 }
 0x34b   : > { %4428 = vmatpush3.bf16.msra.mxu0 %v4712_v49 }
 0x34c   : > { %4429 = vmatprep.subr.bf16.mxu0 %v4713_v50 }
 0x34f   : > { %4430 = vmatpush3.bf16.msra.mxu0 %v4714_v13 }
 0x350   : > { %4431 = vmatprep.subr.bf16.mxu0 %v4715_v33 }
 0x353   : > { %4432 = vmatpush3.bf16.msra.mxu0 %v4716_v51 }
 0x354   : > { %4433 = vmatprep.subr.bf16.mxu0 %v4717_v11 }
 0x357   : > { %4434 = vmatpush3.bf16.msra.mxu0 %v4718_v48 }
 0x358   : > { %4435 = vmatprep.subr.bf16.mxu0 %v4719_v14 }
 0x35b   : > { %4436 = vmatpush3.bf16.msra.mxu0 %v4720_v18  ;;  %v3579_v18 = vshrl.u32 %v496_v1, 7 }
 0x35e   : > { %3525 = vmatmul.mubr.bf16.vlgmr.msra.gmra.mrb[16].mxu0 %v5510_v42 }
 0x391   : > { %v5524_v52 = vpop.f32.mrb[4].mxu0  ;;  %v5526_v53 = vpop.f32.mrb[8].mxu1 }
 0x392   : > { %v5528_v54 = vpop.f32.mrb[5].mxu0  ;;  %v5530_v16 = vpop.f32.mrb[9].mxu1 }
 0x393   : > { %v3533_v17 = vadd.f32 %v5528_v54, %v5524_v52  ;;  %v5534_v55 = vpop.f32.mrb[6].mxu0  ;;  %v5536_v56 = vpop.f32.mrb[10].mxu1 }
 0x394   : > { %v5538_v57 = vpop.f32.mrb[7].mxu0  ;;  %v5540_v58 = vpop.f32.mrb[11].mxu1 }
 0x395   : > { %v3534_v42 = vadd.f32 %v3533_v17, %v5526_v53  ;;  %v3542_v59 = vadd.f32 %v5538_v57, %v5534_v55  ;;  %v3572_v17 = vld [vmem:[%s5773_s7] sm:$0x1] }
 0x397   : > { %v3535_v60 = vadd.f32 %v3534_v42, %v5530_v16  ;;  %v3543_v61 = vadd.f32 %v3542_v59, %v5536_v56 }
 0x399   : > { %v3544_v62 = vadd.f32 %v3543_v61, %v5540_v58  ;;  %v5597_v61 = vsub.s32 0, %v3579_v18 }
 0x3d1   : > { %v5548_v63 = vpop.f32.mrb[8].mxu0  ;;  %v5550_v0 = vpop.f32.mrb[12].mxu1 }
 0x3d2   : > { %v3536_v3 = vadd.f32 %v3535_v60, %v5548_v63  ;;  %v5553_v4 = vpop.f32.mrb[9].mxu0  ;;  %v5555_v5 = vpop.f32.mrb[13].mxu1 }
 0x3d3   : > { %v5557_v6 = vpop.f32.mrb[10].mxu0  ;;  %v5559_v9 = vpop.f32.mrb[14].mxu1 }
 0x3d4   : > { %v3537_v7 = vadd.f32 %v3536_v3, %v5553_v4  ;;  %v3545_v8 = vadd.f32 %v3544_v62, %v5557_v6  ;;  %v5563_v10 = vpop.f32.mrb[11].mxu0  ;;  %v5565_v12 = vpop.f32.mrb[15].mxu1 }
 0x3d6   : > { %v3546_v19 = vadd.f32 %v3545_v8, %v5563_v10  ;;  %v3538_v20 = vadd.f32 %v3537_v7, %v5550_v0  ;;  %v3577_v8 = vld [vmem:[%s5774_s8] sm:$0xff] }
 0x3d8   : > { %v3539_v21 = vadd.f32 %v3538_v20, %v5555_v5  ;;  %v3547_v22 = vadd.f32 %v3546_v19, %v5559_v9 }
 0x3da   : > { %3540 = vadd.xlane.f32.xlu1 %v3539_v21  ;;  %v3548_v23 = vadd.f32 %v3547_v22, %v5565_v12 }
 0x3dc   : > { %3549 = vadd.xlane.f32.xlu0 %v3548_v23 }
 0x411   : > { %v3440_v24 = vpop.f32.mrb[12].mxu0 }
 0x412   : > { %3907 = vst [vmem:[%s5576_s20] sm:$0xff] %v3440_v24  ;;  %v3483_v25 = vpop.f32.mrb[16].mxu1  ;;  %v3442_v26 = vpop.f32.mrb[13].mxu0 }
 0x413   : > { %3909 = vst [vmem:[%s5576_s20 + $0x10] sm:$0xff] %v3483_v25  ;;  %3908 = vst [vmem:[%s5576_s20 + $0x8] sm:$0xff] %v3442_v26  ;;  %v3485_v15 = vpop.f32.mrb[17].mxu1  ;;  %v3444_v28 = vpop.f32.mrb[14].mxu0  ;;  %v3727_v25 = vld [vmem:[#allocation2] sm:$0x1] }
 0x414   : > { %3910 = vst [vmem:[%s5576_s20 + $0x18] sm:$0xff] %v3485_v15  ;;  %3912 = vst [vmem:[%s5576_s20 + $0x28] sm:$0xff] %v3444_v28  ;;  %v3487_v27 = vpop.f32.mrb[18].mxu1  ;;  %v3446_v29 = vpop.f32.mrb[15].mxu0  ;;  %v3609_v26 = vld [vmem:[%s5776_s10] sm:$0xff] }
 0x415   : > { %3914 = vst [vmem:[%s5576_s20 + $0x38] sm:$0xff] %v3487_v27  ;;  %3913 = vst [vmem:[%s5576_s20 + $0x30] sm:$0xff] %v3446_v29  ;;  %v3489_v30 = vpop.f32.mrb[19].mxu1  ;;  %v3594_v15 = vld [vmem:[%s5775_s9] sm:$0xff] }
 0x416   : > { %3915 = vst [vmem:[%s5576_s20 + $0x40] sm:$0xff] %v3489_v30 }
 0x431   : > { %v4437_v31 = vpop.f32.mrb[16].mxu0 }
 0x432   : > { %v4438_v32 = vpop.f32.mrb[17].mxu0 }
 0x433   : > { %v4439_v34 = vadd.f32 %v4438_v32, %v4437_v31  ;;  %v4440_v35 = vpop.f32.mrb[18].mxu0 }
 0x434   : > { %v4441_v36 = vpop.f32.mrb[19].mxu0 }
 0x435   : > { %3911 = vst [vmem:[%s5576_s20 + $0x20] sm:$0xff] %v4439_v34  ;;  %v4442_v37 = vadd.f32 %v4441_v36, %v4440_v35 }
 0x437   : > { %3916 = vst [vmem:[%s5576_s20 + $0x48] sm:$0xff] %v4442_v37  ;;  %s4855_s20 = scalar_lea.vmem %s4854_s17, 2560 }
 0x438   : > { %p4857_p7 = scmp.lt.s32.totalorder %s4855_s20, %s4849_s29 }
 0x43a   : > { %p4858_p8 = por %p4857_p7, %p4856_p4 }
 0x43c   : > { %p4859_p11 = pnand %p4858_p8, %p4852_p3 }
 0x467   : > { %v3541_v39 = vpop.xlane.xlu1 %3540 }
 0x468   : > { %v3552_v40 = vmul.f32 0.0009765625, %v3541_v39 }
 0x469   : > { %v3550_v41 = vpop.xlane.xlu0 %3549 }
 0x46a   : > { %v3555_v43 = vmul.f32 %v3554_v38, %v3552_v40  ;;  %v3553_v2 = vmul.f32 0.0009765625, %v3550_v41 }
 0x46c   : > { %v3558_v44 = vsel %vm3557_vm6, %v3555_v43, 0.0  ;;  %v3556_v45 = vmul.f32 %v3554_v38, %v3553_v2 }
 0x46d   : > { %v3559_v46 = vrot.slane %v3558_v44, 4 }
 0x46e   : > { %v3565_v47 = vsel %vm3557_vm6, %v3556_v45, 0.0 }
 0x46f   : > { %v3560_v49 = vadd.f32 %v3559_v46, %v3558_v44  ;;  %v3566_v50 = vrot.slane %v3565_v47, 4 }
 0x471   : > { %v3561_v13 = vrot.slane %v3560_v49, 2  ;;  %v3567_v33 = vadd.f32 %v3566_v50, %v3565_v47 }
 0x473   : > { %v3562_v51 = vadd.f32 %v3561_v13, %v3560_v49  ;;  %v3568_v11 = vrot.slane %v3567_v33, 2 }
 0x475   : > { %v3563_v48 = vrot.slane %v3562_v51, 1  ;;  %v3569_v14 = vadd.f32 %v3568_v11, %v3567_v33 }
 0x477   : > { %v3570_v42 = vrot.slane %v3569_v14, 1  ;;  %v3564_v59 = vadd.f32 %v3563_v48, %v3562_v51 }
 0x479   : > { %v3573_v60 = vadd.f32 %v3572_v17, %v3564_v59  ;;  %v3571_v62 = vadd.f32 %v3570_v42, %v3569_v14 }
 0x47b   : > { %v3575_v3 = vmax.f32 %v3573_v60, 0.0  ;;  %v3574_v7 = vadd.f32 %v3572_v17, %v3571_v62 }
 0x47d   : > { %v3581_v19 = vrot.slane %v3575_v3, %v5597_v61  ;;  %v3576_v20 = vmax.f32 %v3574_v7, 0.0 }
 0x47f   : > { %v3586_v1 = vmul.f32 %v3581_v19, %v3577_v8  ;;  %v3585_v21 = vrot.slane %v3576_v20, %v5597_v61 }
 0x481   : > { %v3588_v22 = vsel %vm3557_vm6, %v3586_v1, 0.0  ;;  %v3587_v23 = vmul.f32 %v3585_v21, %v3577_v8 }
 0x482   : > { %3589 = vadd.xlane.f32.xlu0 %v3588_v22 }
 0x483   : > { %v3591_v24 = vsel %vm3557_vm6, %v3587_v23, 0.0 }
 0x484   : > { %3592 = vadd.xlane.f32.xlu1 %v3591_v24 }
 0x495   : > { %3730 = vperm.xlu1 %4593, %v3727_v25  }
 0x498   : > { %3612 = vperm.xlu0 %4592, %v3609_v26  }
 0x50f   : > { %v3590_v28 = vpop.xlane.xlu0 %3589 }
 0x510   : > { %v3595_v27 = vadd.f32 %v3594_v15, %v3590_v28 }
 0x511   : > { %v3593_v29 = vpop.xlane.xlu1 %3592 }
 0x512   : > { %v4392_v30 = vmul.f32 -1.442695, %v3595_v27  ;;  %v3596_v31 = vadd.f32 %v3594_v15, %v3593_v29 }
 0x514   : > { %4721 = vpow2.f32 %v4392_v30  ;;  %v4393_v32 = vmul.f32 -1.442695, %v3596_v31 }
 0x516   : > { %4723 = vpow2.f32 %v4393_v32 }
 0x51e   : > { %v4722_v34 = vpop.eup %4721 }
 0x51f   : > { %v3603_v35 = vadd.f32 1.0, %v4722_v34 }
 0x520   : > { %v4724_v36 = vpop.eup %4723 }
 0x521   : > { %4725 = vrcp.f32 %v3603_v35  ;;  %v3604_v37 = vadd.f32 1.0, %v4724_v36 }
 0x523   : > { %4727 = vrcp.f32 %v3604_v37 }
 0x52b   : > { %v4726_v38 = vpop.eup %4725 }
 0x52c   : > { %3851 = vperm.xlu1 %4593, %v4726_v38  }
 0x52d   : > { %v4728_v39 = vpop.eup %4727 }
 0x52e   : > { %3856 = vperm.xlu0 %4592, %v4728_v39  }
 0x52f   : > { %4862 = shalt.err (!%p4859_p11)
}
 0x530   : > { %s4863_s22 = scalar_lea.hbm %s5619_s26, 1280  ;;  %s4867_s30 = scalar_lea.hbm %s5779_s13, 2560 }
 0x531   : > { %p4864_p13 = scmp.ne.s32.totalorder %s5619_s26, %s4863_s22  ;;  %p4868_p6 = scmp.lt.u32.totalorder %s5619_s26, %s5779_s13 }
 0x532   : > { %p4869_p9 = scmp.lt.u32.totalorder %s4867_s30, %s4863_s22  ;;  %p4871_p10 = scmp.lt.u32.totalorder %s4863_s22, %s5619_s26 }
 0x533   : > { %p4865_p0 = pnand %p4864_p13, %p5810_p1 }
 0x534   : > { %p4870_p12 = por %p4869_p9, %p4868_p6 }
 0x535   : > { %p4866_p5 = pneg %p4865_p0 }
 0x536   : > { %p4872_p2 = por %p4871_p10, %p4870_p12 }
 0x538   : > { %p4873_p3 = pnand %p4872_p2, %p4866_p5 }
 0x53a   : > { %4876 = shalt.err (!%p4873_p3)
}
 0x53b   : > { %s4970_s29 = smov 640   ;;  %s4971_s16 = smov 40   ;;  %v3613_v40 = vpop.permute.xlu0 %3612  ;;  %v3731_v11 = vpop.permute.xlu1 %3730 }
 0x53c   : > { %4519 = dma.vmem_to_hbm [thread:$0]  (%p5810_p1), %s5613_s23, 1280, %s5619_s26, %s3923_s14, %s4970_s29, %s4970_s29, %s4971_s16   ;;  %v3615_v41 = vmul.f32 %v3613_v40, %v5524_v52  ;;  %v3616_v43 = vmul.f32 %v3613_v40, %v5528_v54  ;;  %v3617_v2 = vmul.f32 %v3613_v40, %v5526_v53  ;;  %v3618_v44 = vmul.f32 %v3613_v40, %v5530_v16 }
 0x53d   : > { %v3619_v45 = vmul.f32 %v3613_v40, %v5548_v63  ;;  %v3620_v47 = vmul.f32 %v3613_v40, %v5553_v4  ;;  %v3621_v50 = vmul.f32 %v3613_v40, %v5550_v0  ;;  %v3622_v33 = vmul.f32 %v3613_v40, %v5555_v5  ;;  %s4078_s23 = sshll.u32 %s5573_s27, 7  ;;  %s4420_s26 = sshll.u32 %s5068_s11, 11 }
 0x53e   : > { %v3631_v46 = vrot.slane %v3615_v41, 4  ;;  %v3637_v49 = vrot.slane %v3616_v43, 4  ;;  %v3643_v13 = vrot.slane %v3617_v2, 4  ;;  %v3649_v51 = vrot.slane %v3618_v44, 4  ;;  %s5690_s14 = scalar_lea.vmem [#allocation8], %s4078_s23  ;;  %s5708_s22 = scalar_lea.hbm %s5778_s12, %s4420_s26 }
 0x53f   : > { %v3655_v14 = vrot.slane %v3619_v45, 4  ;;  %v3623_v18 = vmul.f32 %v3613_v40, %v5534_v55  ;;  %v3661_v42 = vrot.slane %v3620_v47, 4  ;;  %v3624_v59 = vmul.f32 %v3613_v40, %v5538_v57  ;;  %s3937_s11 = sshll.u32 %s5690_s14, 4  ;;  %s3918_s25 = scalar_lea.sflag [#allocation5], %s5573_s27  ;;  %s5714_s11 = int_to_ptr.vmem [resolvable:$true] %s3937_s11 }
 0x540   : > { %v3632_v48 = vadd.f32 %v3631_v46, %v3615_v41  ;;  %v3638_v17 = vadd.f32 %v3637_v49, %v3616_v43  ;;  %v3644_v60 = vadd.f32 %v3643_v13, %v3617_v2  ;;  %v3667_v62 = vrot.slane %v3621_v50, 4  ;;  %s4877_s15 = scalar_lea.vmem %s5714_s11, 2048  ;;  %s4972_s30 = smov [#allocation8]  }
 0x541   : > { %v3625_v3 = vmul.f32 %v3613_v40, %v5536_v56  ;;  %v5657_v7 = vrot.slane %v3731_v11, %v5597_v61  ;;  %v3650_v8 = vadd.f32 %v3649_v51, %v3618_v44  ;;  %v3673_v19 = vrot.slane %v3622_v33, 4  ;;  %p4878_p4 = scmp.ne.s32.totalorder %s5714_s11, %s4877_s15  ;;  %s4881_s24 = sshll.u32 %s4972_s30, 4  ;;  %s4882_s24 = int_to_ptr.vmem [resolvable:$false] %s4881_s24 }
 0x542   : > { %v3626_v20 = vmul.f32 %v3613_v40, %v5540_v58  ;;  %v3633_v1 = vrot.slane %v3632_v48, 2  ;;  %v3656_v21 = vadd.f32 %v3655_v14, %v3619_v45  ;;  %v3627_v22 = vmul.f32 %v3613_v40, %v5557_v6  ;;  %s4883_s21 = scalar_lea.vmem %s4882_s24, 4096  ;;  %p4884_p11 = scmp.lt.s32.totalorder %s5714_s11, %s4882_s24 }
 0x543   : > { %v3679_v23 = vrot.slane %v3623_v18, 4  ;;  %v3639_v24 = vrot.slane %v3638_v17, 2  ;;  %v3662_v25 = vadd.f32 %v3661_v42, %v3620_v47  ;;  %v3628_v26 = vmul.f32 %v3613_v40, %v5563_v10  ;;  %p4879_p7 = pnand %p4878_p4, %p5810_p1  ;;  %p4885_p13 = scmp.lt.s32.totalorder %s4883_s21, %s4877_s15 }
 0x544   : > { %v3685_v15 = vrot.slane %v3624_v59, 4  ;;  %v3645_v28 = vrot.slane %v3644_v60, 2  ;;  %v3668_v27 = vadd.f32 %v3667_v62, %v3621_v50  ;;  %v3629_v29 = vmul.f32 %v3613_v40, %v5559_v9 }
 0x545   : > { %v3691_v61 = vrot.slane %v3625_v3, 4  ;;  %v3651_v30 = vrot.slane %v3650_v8, 2  ;;  %v3674_v31 = vadd.f32 %v3673_v19, %v3622_v33  ;;  %v3630_v32 = vmul.f32 %v3613_v40, %v5565_v12  ;;  %p4880_p8 = pneg %p4879_p7  ;;  %p4886_p0 = por %p4885_p13, %p4884_p11 }
 0x546   : > { %v3697_v34 = vrot.slane %v3626_v20, 4  ;;  %v3634_v35 = vadd.f32 %v3633_v1, %v3632_v48  ;;  %v3657_v36 = vrot.slane %v3656_v21, 2  ;;  %v3680_v37 = vadd.f32 %v3679_v23, %v3623_v18 }
 0x547   : > { %v3703_v38 = vrot.slane %v3627_v22, 4  ;;  %v3640_v39 = vadd.f32 %v3639_v24, %v3638_v17  ;;  %v3663_v41 = vrot.slane %v3662_v25, 2  ;;  %v3686_v43 = vadd.f32 %v3685_v15, %v3624_v59  ;;  %p4887_p5 = pnand %p4886_p0, %p4880_p8 }
 0x548   : > { %v3709_v2 = vrot.slane %v3628_v26, 4  ;;  %v3646_v44 = vadd.f32 %v3645_v28, %v3644_v60  ;;  %v3669_v45 = vrot.slane %v3668_v27, 2  ;;  %v3692_v46 = vadd.f32 %v3691_v61, %v3625_v3 }
 0x549   : > { %v3715_v47 = vrot.slane %v3629_v29, 4  ;;  %v3652_v49 = vadd.f32 %v3651_v30, %v3650_v8  ;;  %v3675_v50 = vrot.slane %v3674_v31, 2  ;;  %v3698_v13 = vadd.f32 %v3697_v34, %v3626_v20 }
 0x54a   : > { %v3721_v51 = vrot.slane %v3630_v32, 4  ;;  %v3635_v33 = vrot.slane %v3634_v35, 1  ;;  %v3658_v11 = vadd.f32 %v3657_v36, %v3656_v21  ;;  %v3681_v40 = vrot.slane %v3680_v37, 2 }
 0x54b   : > { %v3704_v14 = vadd.f32 %v3703_v38, %v3627_v22  ;;  %v3641_v48 = vrot.slane %v3640_v39, 1  ;;  %v3664_v42 = vadd.f32 %v3663_v41, %v3662_v25  ;;  %v3687_v18 = vrot.slane %v3686_v43, 2 }
 0x54c   : > { %v3710_v62 = vadd.f32 %v3709_v2, %v3628_v26  ;;  %v3647_v17 = vrot.slane %v3646_v44, 1  ;;  %v3670_v19 = vadd.f32 %v3669_v45, %v3668_v27  ;;  %v3693_v59 = vrot.slane %v3692_v46, 2 }
 0x54d   : > { %v3716_v1 = vadd.f32 %v3715_v47, %v3629_v29  ;;  %v3653_v60 = vrot.slane %v3652_v49, 1  ;;  %v3676_v23 = vadd.f32 %v3675_v50, %v3674_v31  ;;  %v3699_v3 = vrot.slane %v3698_v13, 2 }
 0x54e   : > { %v3722_v24 = vadd.f32 %v3721_v51, %v3630_v32  ;;  %v3636_v8 = vadd.f32 %v3635_v33, %v3634_v35  ;;  %v3659_v15 = vrot.slane %v3658_v11, 1  ;;  %v3682_v20 = vadd.f32 %v3681_v40, %v3680_v37 }
 0x54f   : > { %v3705_v28 = vrot.slane %v3704_v14, 2  ;;  %v3642_v61 = vadd.f32 %v3641_v48, %v3640_v39  ;;  %v3665_v21 = vrot.slane %v3664_v42, 1  ;;  %v3688_v30 = vadd.f32 %v3687_v18, %v3686_v43 }
 0x550   : > { %v3711_v22 = vrot.slane %v3710_v62, 2  ;;  %v3648_v34 = vadd.f32 %v3647_v17, %v3646_v44  ;;  %v3671_v25 = vrot.slane %v3670_v19, 1  ;;  %v3694_v36 = vadd.f32 %v3693_v59, %v3692_v46 }
 0x551   : > { %v3717_v26 = vrot.slane %v3716_v1, 2  ;;  %v3654_v38 = vadd.f32 %v3653_v60, %v3652_v49  ;;  %v3677_v27 = vrot.slane %v3676_v23, 1  ;;  %v3700_v41 = vadd.f32 %v3699_v3, %v3698_v13 }
 0x552   : > { %v3723_v29 = vrot.slane %v3722_v24, 2  ;;  %v3660_v2 = vadd.f32 %v3659_v15, %v3658_v11  ;;  %v3737_v31 = vadd.f32 %v5657_v7, %v3636_v8  ;;  %v3683_v32 = vrot.slane %v3682_v20, 1 }
 0x553   : > { %v3706_v35 = vadd.f32 %v3705_v28, %v3704_v14  ;;  %v3666_v45 = vadd.f32 %v3665_v21, %v3664_v42  ;;  %v3738_v37 = vadd.f32 %v5657_v7, %v3642_v61  ;;  %v3689_v39 = vrot.slane %v3688_v30, 1 }
 0x554   : > { %v3712_v47 = vadd.f32 %v3711_v22, %v3710_v62  ;;  %v3672_v43 = vadd.f32 %v3671_v25, %v3670_v19  ;;  %v3739_v44 = vadd.f32 %v5657_v7, %v3648_v34  ;;  %v3695_v50 = vrot.slane %v3694_v36, 1 }
 0x555   : > { %v3718_v46 = vadd.f32 %v3717_v26, %v3716_v1  ;;  %v3678_v51 = vadd.f32 %v3677_v27, %v3676_v23  ;;  %v3740_v49 = vadd.f32 %v5657_v7, %v3654_v38  ;;  %v3701_v13 = vrot.slane %v3700_v41, 1 }
 0x556   : > { %v3724_v33 = vadd.f32 %v3723_v29, %v3722_v24  ;;  %v3741_v11 = vadd.f32 %v5657_v7, %v3660_v2  ;;  %v4394_v40 = vmul.f32 -1.442695, %v3737_v31  ;;  %v3684_v48 = vadd.f32 %v3683_v32, %v3682_v20 }
 0x557   : > { %v3707_v14 = vrot.slane %v3706_v35, 1  ;;  %v3742_v42 = vadd.f32 %v5657_v7, %v3666_v45  ;;  %v4395_v18 = vmul.f32 -1.442695, %v3738_v37  ;;  %v3690_v17 = vadd.f32 %v3689_v39, %v3688_v30 }
 0x558   : > { %v3713_v62 = vrot.slane %v3712_v47, 1  ;;  %v3743_v19 = vadd.f32 %v5657_v7, %v3672_v43  ;;  %v4396_v59 = vmul.f32 -1.442695, %v3739_v44  ;;  %v3696_v60 = vadd.f32 %v3695_v50, %v3694_v36 }
 0x559   : > { %v3719_v1 = vrot.slane %v3718_v46, 1  ;;  %v3744_v23 = vadd.f32 %v5657_v7, %v3678_v51  ;;  %v4397_v3 = vmul.f32 -1.442695, %v3740_v49  ;;  %v3702_v8 = vadd.f32 %v3701_v13, %v3700_v41 }
 0x55a   : > { %v3725_v24 = vrot.slane %v3724_v33, 1  ;;  %4729 = vpow2.f32 %v4394_v40  ;;  %v4398_v15 = vmul.f32 -1.442695, %v3741_v11  ;;  %v3708_v28 = vadd.f32 %v3707_v14, %v3706_v35 }
 0x55b   : > { %v3745_v20 = vadd.f32 %v5657_v7, %v3684_v48  ;;  %4731 = vpow2.f32 %v4395_v18  ;;  %v4399_v61 = vmul.f32 -1.442695, %v3742_v42  ;;  %v3714_v21 = vadd.f32 %v3713_v62, %v3712_v47 }
 0x55c   : > { %v3746_v30 = vadd.f32 %v5657_v7, %v3690_v17  ;;  %4733 = vpow2.f32 %v4396_v59  ;;  %v4400_v22 = vmul.f32 -1.442695, %v3743_v19  ;;  %v3720_v34 = vadd.f32 %v3719_v1, %v3718_v46 }
 0x55d   : > { %v3747_v25 = vadd.f32 %v5657_v7, %v3696_v60  ;;  %4735 = vpow2.f32 %v4397_v3  ;;  %v4401_v36 = vmul.f32 -1.442695, %v3744_v23  ;;  %v3726_v26 = vadd.f32 %v3725_v24, %v3724_v33 }
 0x55e   : > { %v3748_v38 = vadd.f32 %v5657_v7, %v3702_v8  ;;  %4737 = vpow2.f32 %v4398_v15  ;;  %v3749_v27 = vadd.f32 %v5657_v7, %v3708_v28  ;;  %v4402_v41 = vmul.f32 -1.442695, %v3745_v20 }
 0x55f   : > { %4739 = vpow2.f32 %v4399_v61  ;;  %v3750_v29 = vadd.f32 %v5657_v7, %v3714_v21  ;;  %v4403_v2 = vmul.f32 -1.442695, %v3746_v30  ;;  %v3751_v31 = vadd.f32 %v5657_v7, %v3720_v34 }
 0x560   : > { %4741 = vpow2.f32 %v4400_v22  ;;  %v4404_v32 = vmul.f32 -1.442695, %v3747_v25  ;;  %v3752_v35 = vadd.f32 %v5657_v7, %v3726_v26  ;;  %v4405_v45 = vmul.f32 -1.442695, %v3748_v38 }
 0x561   : > { %4743 = vpow2.f32 %v4401_v36  ;;  %v4406_v37 = vmul.f32 -1.442695, %v3749_v27  ;;  %v4407_v39 = vmul.f32 -1.442695, %v3750_v29  ;;  %v4408_v43 = vmul.f32 -1.442695, %v3751_v31 }
 0x562   : > { %4745 = vpow2.f32 %v4402_v41  ;;  %v4409_v50 = vmul.f32 -1.442695, %v3752_v35 }
 0x563   : > { %4747 = vpow2.f32 %v4403_v2 }
 0x564   : > { %v4730_v47 = vpop.eup %4729  ;;  %4749 = vpow2.f32 %v4404_v32 }
 0x565   : > { %v4732_v44 = vpop.eup %4731  ;;  %4751 = vpow2.f32 %v4405_v45  ;;  %v3801_v49 = vadd.f32 1.0, %v4730_v47 }
 0x566   : > { %v4734_v46 = vpop.eup %4733  ;;  %4753 = vpow2.f32 %v4406_v37  ;;  %v3802_v33 = vadd.f32 1.0, %v4732_v44 }
 0x567   : > { %v4736_v51 = vpop.eup %4735  ;;  %4755 = vpow2.f32 %v4407_v39  ;;  %v3803_v11 = vadd.f32 1.0, %v4734_v46 }
 0x568   : > { %v4738_v13 = vpop.eup %4737  ;;  %4757 = vpow2.f32 %v4408_v43  ;;  %v3804_v48 = vadd.f32 1.0, %v4736_v51 }
 0x569   : > { %v4740_v7 = vpop.eup %4739  ;;  %4759 = vpow2.f32 %v4409_v50  ;;  %v3805_v42 = vadd.f32 1.0, %v4738_v13 }
 0x56a   : > { %v4742_v40 = vpop.eup %4741  ;;  %4761 = vrcp.f32 %v3801_v49  ;;  %v3806_v17 = vadd.f32 1.0, %v4740_v7 }
 0x56b   : > { %v4744_v14 = vpop.eup %4743  ;;  %4763 = vrcp.f32 %v3802_v33  ;;  %v3807_v19 = vadd.f32 1.0, %v4742_v40 }
 0x56c   : > { %v4746_v18 = vpop.eup %4745  ;;  %4765 = vrcp.f32 %v3803_v11  ;;  %v3808_v60 = vadd.f32 1.0, %v4744_v14 }
 0x56d   : > { %v4748_v62 = vpop.eup %4747  ;;  %4767 = vrcp.f32 %v3804_v48  ;;  %v3809_v23 = vadd.f32 1.0, %v4746_v18 }
 0x56e   : > { %v4750_v59 = vpop.eup %4749  ;;  %4769 = vrcp.f32 %v3805_v42  ;;  %v3810_v8 = vadd.f32 1.0, %v4748_v62 }
 0x56f   : > { %v4752_v1 = vpop.eup %4751  ;;  %4771 = vrcp.f32 %v3806_v17  ;;  %v3811_v15 = vadd.f32 1.0, %v4750_v59 }
 0x570   : > { %v4754_v3 = vpop.eup %4753  ;;  %4773 = vrcp.f32 %v3807_v19  ;;  %v3812_v20 = vadd.f32 1.0, %v4752_v1 }
 0x571   : > { %v4756_v24 = vpop.eup %4755  ;;  %4775 = vrcp.f32 %v3808_v60  ;;  %v3813_v21 = vadd.f32 1.0, %v4754_v3 }
 0x572   : > { %v4758_v28 = vpop.eup %4757  ;;  %4777 = vrcp.f32 %v3809_v23  ;;  %v3814_v30 = vadd.f32 1.0, %v4756_v24 }
 0x573   : > { %v4760_v61 = vpop.eup %4759  ;;  %4779 = vrcp.f32 %v3810_v8  ;;  %v3815_v34 = vadd.f32 1.0, %v4758_v28 }
 0x574   : > { %v4762_v22 = vpop.eup %4761  ;;  %4781 = vrcp.f32 %v3811_v15  ;;  %v3816_v36 = vadd.f32 1.0, %v4760_v61 }
 0x575   : > { %v4764_v25 = vpop.eup %4763  ;;  %4783 = vrcp.f32 %v3812_v20 }
 0x576   : > { %v4766_v26 = vpop.eup %4765  ;;  %4785 = vrcp.f32 %v3813_v21 }
 0x577   : > { %v4768_v38 = vpop.eup %4767  ;;  %4787 = vrcp.f32 %v3814_v30 }
 0x578   : > { %v4770_v27 = vpop.eup %4769  ;;  %4789 = vrcp.f32 %v3815_v34 }
 0x579   : > { %v4772_v41 = vpop.eup %4771  ;;  %4791 = vrcp.f32 %v3816_v36 }
 0x57a   : > { %v4774_v29 = vpop.eup %4773 }
 0x57b   : > { %v4776_v2 = vpop.eup %4775 }
 0x57c   : > { %v4778_v31 = vpop.eup %4777 }
 0x57d   : > { %v4780_v32 = vpop.eup %4779 }
 0x57e   : > { %v4782_v35 = vpop.eup %4781 }
 0x57f   : > { %v4784_v37 = vpop.eup %4783 }
 0x580   : > { %v4786_v50 = vpop.eup %4785 }
 0x581   : > { %v4788_v7 = vpop.eup %4787 }
 0x582   : > { %v4790_v42 = vpop.eup %4789 }
 0x583   : > { %v4792_v59 = vpop.eup %4791 }
 0x5ab   : > { %v3852_v45 = vpop.permute.xlu1 %3851 }
 0x5ac   : > { %v3859_v39 = vadd.f32 %v4762_v22, %v3852_v45  ;;  %v3860_v47 = vadd.f32 %v4764_v25, %v3852_v45  ;;  %v3861_v43 = vadd.f32 %v4766_v26, %v3852_v45  ;;  %v3862_v44 = vadd.f32 %v4768_v38, %v3852_v45 }
 0x5ad   : > { %v3863_v46 = vadd.f32 %v4770_v27, %v3852_v45  ;;  %v3864_v51 = vadd.f32 %v4772_v41, %v3852_v45  ;;  %v3865_v49 = vadd.f32 %v4774_v29, %v3852_v45  ;;  %v3866_v13 = vadd.f32 %v4776_v2, %v3852_v45  ;;  %v3857_v33 = vpop.permute.xlu0 %3856 }
 0x5ae   : > { %v3875_v11 = vmul.f32 %v3859_v39, %v5524_v52  ;;  %v3876_v40 = vmul.f32 %v3860_v47, %v5528_v54  ;;  %v3877_v48 = vmul.f32 %v3861_v43, %v5526_v53  ;;  %v3878_v14 = vmul.f32 %v3862_v44, %v5530_v16 }
 0x5af   : > { %v3879_v18 = vmul.f32 %v3863_v46, %v5548_v63  ;;  %v3880_v17 = vmul.f32 %v3864_v51, %v5553_v4  ;;  %v3881_v62 = vmul.f32 %v3865_v49, %v5550_v0  ;;  %v3882_v19 = vmul.f32 %v3866_v13, %v5555_v5 }
 0x5b0   : > { %3891 = vst [vmem:[%s5690_s14] sm:$0xff] %v3875_v11  ;;  %3892 = vst [vmem:[%s5690_s14 + $0x8] sm:$0xff] %v3876_v40  ;;  %v3867_v52 = vadd.f32 %v4778_v31, %v3857_v33  ;;  %v3868_v53 = vadd.f32 %v4780_v32, %v3857_v33  ;;  %v3869_v54 = vadd.f32 %v4782_v35, %v3857_v33 }
 0x5b1   : > { %3893 = vst [vmem:[%s5690_s14 + $0x10] sm:$0xff] %v3877_v48  ;;  %3894 = vst [vmem:[%s5690_s14 + $0x18] sm:$0xff] %v3878_v14  ;;  %v3870_v16 = vadd.f32 %v4784_v37, %v3857_v33  ;;  %v3871_v63 = vadd.f32 %v4786_v50, %v3857_v33  ;;  %v3872_v0 = vadd.f32 %v4788_v7, %v3857_v33 }
 0x5b2   : > { %3895 = vst [vmem:[%s5690_s14 + $0x20] sm:$0xff] %v3879_v18  ;;  %3896 = vst [vmem:[%s5690_s14 + $0x28] sm:$0xff] %v3880_v17  ;;  %v3873_v4 = vadd.f32 %v4790_v42, %v3857_v33  ;;  %v3874_v5 = vadd.f32 %v4792_v59, %v3857_v33  ;;  %v3883_v60 = vmul.f32 %v3867_v52, %v5534_v55 }
 0x5b3   : > { %3897 = vst [vmem:[%s5690_s14 + $0x30] sm:$0xff] %v3881_v62  ;;  %3898 = vst [vmem:[%s5690_s14 + $0x38] sm:$0xff] %v3882_v19  ;;  %v3884_v1 = vmul.f32 %v3868_v53, %v5538_v57  ;;  %v3885_v23 = vmul.f32 %v3869_v54, %v5536_v56  ;;  %v3886_v3 = vmul.f32 %v3870_v16, %v5540_v58 }
 0x5b4   : > { %v3887_v8 = vmul.f32 %v3871_v63, %v5557_v6  ;;  %v3888_v24 = vmul.f32 %v3872_v0, %v5563_v10  ;;  %v3889_v55 = vmul.f32 %v3873_v4, %v5559_v9  ;;  %v3890_v57 = vmul.f32 %v3874_v5, %v5565_v12  ;;  %3899 = vst [vmem:[%s5690_s14 + $0x40] sm:$0xff] %v3883_v60 }
 0x5b5   : > { %3900 = vst [vmem:[%s5690_s14 + $0x48] sm:$0xff] %v3884_v1  ;;  %3901 = vst [vmem:[%s5690_s14 + $0x50] sm:$0xff] %v3885_v23 }
 0x5b6   : > { %3902 = vst [vmem:[%s5690_s14 + $0x58] sm:$0xff] %v3886_v3  ;;  %3903 = vst [vmem:[%s5690_s14 + $0x60] sm:$0xff] %v3887_v8 }
 0x5b7   : > { %3904 = vst [vmem:[%s5690_s14 + $0x68] sm:$0xff] %v3888_v24  ;;  %3905 = vst [vmem:[%s5690_s14 + $0x70] sm:$0xff] %v3889_v55 }
 0x5b8   : > { %3906 = vst [vmem:[%s5690_s14 + $0x78] sm:$0xff] %v3890_v57 }
 0x5b9   : > { %4890 = shalt.err (!%p4887_p5)
}
 0x5ba   : > { %s4891_s29 = scalar_lea.hbm %s5708_s22, 2048  ;;  %s4895_s26 = scalar_lea.hbm %s5778_s12, 4096 }
 0x5bb   : > { %p4892_p6 = scmp.ne.s32.totalorder %s5708_s22, %s4891_s29  ;;  %p4896_p10 = scmp.lt.u32.totalorder %s5708_s22, %s5778_s12 }
 0x5bc   : > { %p4897_p2 = scmp.lt.u32.totalorder %s4895_s26, %s4891_s29  ;;  %p4899_p4 = scmp.lt.u32.totalorder %s4891_s29, %s5708_s22 }
 0x5bd   : > { %p4893_p9 = pnand %p4892_p6, %p5810_p1 }
 0x5be   : > { %p4898_p3 = por %p4897_p2, %p4896_p10 }
 0x5bf   : > { %p4894_p12 = pneg %p4893_p9 }
 0x5c0   : > { %p4900_p7 = por %p4899_p4, %p4898_p3 }
 0x5c2   : > { %p4901_p8 = pnand %p4900_p7, %p4894_p12 }
 0x5c4   : > { %4904 = shalt.err (!%p4901_p8)
}
 0x5c5   : > { %s4973_s20 = smov 1024  }
 0x5c6   : > { %4518 = dma.vmem_to_hbm [thread:$0]  (%p5810_p1), %s5714_s11, 2048, %s5708_s22, %s3918_s25, %s4973_s20, %s4973_s20, %s4967_s18  }
 0x5c7 PF: > { %s5811_s15 = sld [smem:[#allocation17_spill]]  ;;  %s5812_s30 = sld [smem:[#allocation15_spill]] }
 0x5c8   : > { %s5813_s24 = sld [smem:[#allocation20_spill]] }
 0x5cd   : > { %p4540_p11 = scmp.ge.s32.totalorder %s5811_s15, 2  ;;  %s3969_s21 = sand.u32 1, %s5812_s30  }
 0x5ce   : > { %p5814_p13 = scmp.ne.s32.totalorder %s5813_s24, 0  ;;  %s3970_s29 = scalar_lea.sflag [#allocation5], %s3969_s21 }
 0x5d0   : > { %p4530_p0 = pnand %p4540_p11, %p5814_p13 }
 0x5d2   : > { %4930 = dma.done.wait (!%p4530_p0), %s3970_s29, 2048  }
 0x5d3   : > { %4932 = vsyncadd (!%p4530_p0), %s3970_s29, 4294965248  ;;  %s3979_s16 = scalar_lea.sflag [#allocation10], %s3969_s21 }
 0x5d4   : > { %4934 = dma.done.wait (!%p4530_p0), %s3979_s16, 1280  }
 0x5d5   : > { %4936 = vsyncadd (!%p4530_p0), %s3979_s16, 4294966016  ;;  %s5815_s30 = sld [smem:[#allocation18_spill]]  ;;  %s5816_s19 = sld [smem:[#allocation16_spill]] }
 0x5d6   : > { %s5817_s29 = sld [smem:[#allocation19_spill]]  ;;  %s5818_s27 = smov %s4943_s28 }
 0x5db   : > { %p31_p1 = scmp.ge.s32.totalorder %s5815_s30, 4   ;;  %s5819_s28 = smov %s5816_s19 }
 0x5dd   :  { %33 = sbr.rel (!%p31_p1) target bundleno = 10 (0xa), region = 137 }
 0x5e4   :  { %3984 = vsyncpa [#allocation4], 1 }
 0x5e5   :  { %3986 = vsyncpa [#allocation4 + $0x1], 1 }
 0x5e6   :  { %3987 = vsyncpa [#allocation7], 1 }
 0x5e7   :  { %3988 = vsyncpa [#allocation5], 1 }
 0x5e8   :  { %3990 = vsyncpa [#allocation5 + $0x1], 1 }
 0x5e9   :  { %3991 = vsyncpa [#allocation10], 1 }
 0x5ea   :  { %3993 = vsyncpa [#allocation10 + $0x1], 1 }

</bundles_post_ra>
